<compile_context>
chip_gen: v7x
topology: tpu7x:2x2x1
jax: 0.10.0
libtpu: 0.0.40
codegen_flags: <defaults>
</compile_context>

<pallas_src>
import functools

import jax
import jax.numpy as jnp
from jax.experimental import pallas as pl
from jax.experimental.pallas import tpu as pltpu

GN_EPS = 1e-5       # GroupNormAct default eps
WS_EPS = 1e-6       # StdConv2d default eps
NUM_GROUPS = 32     # norm_layer = partial(GroupNormAct, num_groups=32)


def make_div(v, divisor=8):
    min_value = divisor
    new_v = max(min_value, int(v + divisor / 2) // divisor * divisor)
    if new_v < 0.9 * v:
        new_v += divisor
    return new_v


# ----------------------------- Pallas kernel ------------------------------- #

def _group_norm_act(x, gamma, beta, gmat, num_groups, eps, apply_relu):
    """GroupNorm (+ optional ReLU) on an [Nb, HW, C] f32 block.

    gmat is the hoisted (C, C) group-membership matrix; mean and mean-of-squares are
    produced by ONE [2*Nb, C] @ [C, C] matmul and the affine is folded to a single FMA.
    """
    nb, hw, c = x.shape
    cpg = c // num_groups
    s = jnp.sum(x, axis=1)                                    # [Nb, C]
    ss = jnp.sum(x * x, axis=1)                               # [Nb, C]
    stats = jnp.concatenate([s, ss], axis=0)                  # [2*Nb, C]
    gstats = jnp.dot(stats, gmat,
                     preferred_element_type=jnp.float32) / float(hw * cpg)
    mean = gstats[:nb]                                        # group mean, per channel
    var = jnp.maximum(gstats[nb:] - mean * mean, 0.0)         # biased var (torch), clamped
    scale = jax.lax.rsqrt(var + eps) * gamma                  # [Nb, C]
    bias = beta - mean * scale                                # [Nb, C]
    y = x * scale[:, None, :] + bias[:, None, :]
    if apply_relu:
        y = jnp.maximum(y, 0.0)
    return y


def _bottleneck_kernel(x_ref, w1_ref, g1_ref, b1_ref, w2_ref, g2_ref, b2_ref,
                       w3_ref, g3_ref, b3_ref, gm_mid_ref, gm_out_ref, o_ref,
                       *, num_groups):
    nb, H, W, Cin = x_ref.shape
    Cmid = w1_ref.shape[1]
    Cout = w3_ref.shape[1]
    HW = H * W
    Wr = ((W + 2 + 7) // 8) * 8          # padded row stride (multiple of 8 sublanes)
    L = H * Wr                           # rows of the flat conv2 accumulator

    # ---- conv1 (1x1 StdConv) in bf16 + norm1 (GN + ReLU) ----
    x_bf = x_ref[...].astype(jnp.bfloat16).reshape(nb * HW, Cin)
    h = jnp.dot(x_bf, w1_ref[...], preferred_element_type=jnp.float32)
    h = _group_norm_act(h.reshape(nb, HW, Cmid), g1_ref[...], b1_ref[...],
                        gm_mid_ref[...], num_groups, GN_EPS, True)

    # ---- conv2 (3x3 StdConv, stride 1, pad 1) as ONE im2col matmul (K = 9*Cmid) ----
    # Zero-pad each HxW image to rows of stride Wr (col 0 = left pad, cols >= W+1 = zeros),
    # flatten rows, and add Wr top / Wr+8 bottom zero rows.  Then the (dy,dx) tap for flat
    # output index f = y*Wr + x is just P[:, f + dy*Wr + dx, :]; row wrap only lands in the
    # discarded columns x >= W.  All nine taps concatenate on the lane axis -> one matmul.
    hb = h.astype(jnp.bfloat16).reshape(nb, H, W, Cmid)
    zl = jnp.zeros((nb, H, 1, Cmid), jnp.bfloat16)
    zr = jnp.zeros((nb, H, Wr - W - 1, Cmid), jnp.bfloat16)
    hp = jnp.concatenate([zl, hb, zr], axis=2).reshape(nb, H * Wr, Cmid)
    ztop = jnp.zeros((nb, Wr, Cmid), jnp.bfloat16)
    zbot = jnp.zeros((nb, Wr + 8, Cmid), jnp.bfloat16)
    P = jnp.concatenate([ztop, hp, zbot], axis=1)             # [nb, (H+2)*Wr + 8, Cmid]
    cols = [P[:, dy * Wr + dx: dy * Wr + dx + L, :]
            for dy in range(3) for dx in range(3)]
    im2col = jnp.concatenate(cols, axis=-1).reshape(nb * L, 9 * Cmid)
    acc = jnp.dot(im2col, w2_ref[...], preferred_element_type=jnp.float32)
    h2 = acc.reshape(nb, H, Wr, Cmid)[:, :, :W, :].reshape(nb, HW, Cmid)
    h2 = _group_norm_act(h2, g2_ref[...], b2_ref[...],
                         gm_mid_ref[...], num_groups, GN_EPS, True)

    # ---- conv3 (1x1 StdConv) + norm3 (GN, no act) ----
    h3 = jnp.dot(h2.astype(jnp.bfloat16).reshape(nb * HW, Cmid), w3_ref[...],
                 preferred_element_type=jnp.float32)
    h3 = _group_norm_act(h3.reshape(nb, HW, Cout), g3_ref[...], b3_ref[...],
                         gm_out_ref[...], num_groups, GN_EPS, False)

    # ---- drop_path is None (rate=0); residual add (re-read x, f32) + final ReLU ----
    xs = x_ref[...].astype(jnp.float32).reshape(nb, HW, Cout)
    y = jnp.maximum(h3 + xs, 0.0)
    o_ref[...] = y.reshape(nb, H, W, Cout).astype(o_ref.dtype)


# ------------------------------ JAX wrapper -------------------------------- #

def standardize_weight(w, eps=WS_EPS):
    """StdConv2d weight standardization: per-out-channel over (in, kh, kw)."""
    m = jnp.mean(w, axis=(1, 2, 3), keepdims=True)
    v = jnp.var(w, axis=(1, 2, 3), keepdims=True)
    return (w - m) * jax.lax.rsqrt(v + eps)


def _group_matrix(c, groups):
    gid = jnp.arange(c, dtype=jnp.int32) // (c // groups)
    return (gid[:, None] == gid[None, :]).astype(jnp.float32)


@jax.jit
def bottleneck_forward(x_nchw, params):
    x = jnp.transpose(x_nchw, (0, 2, 3, 1)).astype(jnp.float32)       # NCHW -> NHWC
    N, H, W, Cin = x.shape
    Cmid = params["conv1.weight"].shape[0]
    Cout = params["conv3.weight"].shape[0]

    # Standardized weights, cast to bf16 for the MXU (f32 accumulation in-kernel).
    w1 = standardize_weight(params["conv1.weight"])[:, :, 0, 0].T.astype(jnp.bfloat16)      # [Cin, Cmid]
    w2 = jnp.transpose(standardize_weight(params["conv2.weight"]), (2, 3, 1, 0))            # [kh,kw,ci,co]
    w2 = w2.reshape(9 * Cmid, Cmid).astype(jnp.bfloat16)                                    # [9*Cmid, Cmid]
    w3 = standardize_weight(params["conv3.weight"])[:, :, 0, 0].T.astype(jnp.bfloat16)      # [Cmid, Cout]
    g1 = params["norm1.weight"].reshape(1, Cmid)
    b1 = params["norm1.bias"].reshape(1, Cmid)
    g2 = params["norm2.weight"].reshape(1, Cmid)
    b2 = params["norm2.bias"].reshape(1, Cmid)
    g3 = params["norm3.weight"].reshape(1, Cout)
    b3 = params["norm3.bias"].reshape(1, Cout)
    gm_mid = _group_matrix(Cmid, NUM_GROUPS)    # hoisted group-membership matrices
    gm_out = _group_matrix(Cout, NUM_GROUPS)

    nb = next(b for b in (4, 2, 1) if N % b == 0)   # images per grid step

    def const_spec(shape):
        nd = len(shape)
        return pl.BlockSpec(shape, lambda n, _nd=nd: (0,) * _nd)

    kernel = functools.partial(_bottleneck_kernel, num_groups=NUM_GROUPS)
    out = pl.pallas_call(
        kernel,
        out_shape=jax.ShapeDtypeStruct((N, H, W, Cout), jnp.float32),
        grid_spec=pltpu.PrefetchScalarGridSpec(
            num_scalar_prefetch=0,
            grid=(N // nb,),
            in_specs=[
                pl.BlockSpec((nb, H, W, Cin), lambda n: (n, 0, 0, 0)),
                const_spec((Cin, Cmid)), const_spec((1, Cmid)), const_spec((1, Cmid)),
                const_spec((9 * Cmid, Cmid)), const_spec((1, Cmid)), const_spec((1, Cmid)),
                const_spec((Cmid, Cout)), const_spec((1, Cout)), const_spec((1, Cout)),
                const_spec((Cmid, Cmid)), const_spec((Cout, Cout)),
            ],
            out_specs=pl.BlockSpec((nb, H, W, Cout), lambda n: (n, 0, 0, 0)),
        ),
        compiler_params=pltpu.CompilerParams(
            dimension_semantics=("parallel",),
            vmem_limit_bytes=32 * 1024 * 1024),
    )(x, w1, g1, b1, w2, g2, b2, w3, g3, b3, gm_mid, gm_out)
    return jnp.transpose(out, (0, 3, 1, 2))                           # NHWC -> NCHW


# --------------------------- pure-JAX reference ----------------------------- #

def ref_forward(x, params):
    def conv(x, w, padding=0):
        w = standardize_weight(w)
        return jax.lax.conv_general_dilated(
            x, w, (1, 1), [(padding, padding)] * 2,
            dimension_numbers=("NCHW", "OIHW", "NCHW"))

    def gn(x, gamma, beta, relu):
        N, C, H, W = x.shape
        xr = x.reshape(N, NUM_GROUPS, -1)
        m = jnp.mean(xr, axis=-1, keepdims=True)
        v = jnp.var(xr, axis=-1, keepdims=True)
        y = ((xr - m) / jnp.sqrt(v + GN_EPS)).reshape(N, C, H, W)
        y = y * gamma.reshape(1, C, 1, 1) + beta.reshape(1, C, 1, 1)
        return jnp.maximum(y, 0.0) if relu else y

    shortcut = x
    h = conv(x, params["conv1.weight"])
    h = gn(h, params["norm1.weight"], params["norm1.bias"], True)
    h = conv(h, params["conv2.weight"], padding=1)
    h = gn(h, params["norm2.weight"], params["norm2.bias"], True)
    h = conv(h, params["conv3.weight"])
    h = gn(h, params["norm3.weight"], params["norm3.bias"], False)
    return jnp.maximum(h + shortcut, 0.0)


# ---------------------------------- main ------------------------------------ #

if __name__ == "__main__":
    key = jax.random.PRNGKey(0)
    # in_chs == out_chs (no proj/downsample); channels >= 128 so that
    # mid_chs = make_div(out_chs * 0.25) is divisible by the 32 GroupNorm groups.
    N, Cin, H, W = 8, 128, 8, 8
    out_chs = Cin
    mid_chs = make_div(out_chs * 0.25)     # = 32
    k0, k1, k2, k3 = jax.random.split(key, 4)

    params = {
        "conv1.weight": 0.1 * jax.random.normal(k0, (mid_chs, Cin, 1, 1), jnp.float32),
        "conv2.weight": 0.1 * jax.random.normal(k1, (mid_chs, mid_chs, 3, 3), jnp.float32),
        "conv3.weight": 0.1 * jax.random.normal(k2, (out_chs, mid_chs, 1, 1), jnp.float32),
        "norm1.weight": jnp.ones((mid_chs,), jnp.float32),
        "norm1.bias": jnp.zeros((mid_chs,), jnp.float32),
        "norm2.weight": jnp.ones((mid_chs,), jnp.float32),
        "norm2.bias": jnp.zeros((mid_chs,), jnp.float32),
        "norm3.weight": jnp.ones((out_chs,), jnp.float32),
        "norm3.bias": jnp.zeros((out_chs,), jnp.float32),
    }
    x = jax.random.normal(k3, (N, Cin, H, W), jnp.float32)

    y = bottleneck_forward(x, params)
    y = jax.block_until_ready(y)

    y_ref = ref_forward(x, params)
    assert y.shape == (N, out_chs, H, W), y.shape
    max_err = float(jnp.max(jnp.abs(y - y_ref)))
    # bf16 matmuls (f32 accumulation) => looser tolerance vs the f32 reference.
    assert jnp.allclose(y, y_ref, atol=1e-1, rtol=1e-1), f"max_err={max_err}"
    print("KERNEL_OK")
</pallas_src>

<mosaic_0001>
module attributes {stable_mosaic.version = 11 : i64} {
  func.func @_bottleneck_kernel(%arg0: i32, %arg1: memref<4x8x8x128xf32, #tpu.memory_space<vmem>>, %arg2: memref<128x32xbf16, #tpu.memory_space<vmem>>, %arg3: memref<1x32xf32, #tpu.memory_space<vmem>>, %arg4: memref<1x32xf32, #tpu.memory_space<vmem>>, %arg5: memref<288x32xbf16, #tpu.memory_space<vmem>>, %arg6: memref<1x32xf32, #tpu.memory_space<vmem>>, %arg7: memref<1x32xf32, #tpu.memory_space<vmem>>, %arg8: memref<32x128xbf16, #tpu.memory_space<vmem>>, %arg9: memref<1x128xf32, #tpu.memory_space<vmem>>, %arg10: memref<1x128xf32, #tpu.memory_space<vmem>>, %arg11: memref<32x32xf32, #tpu.memory_space<vmem>>, %arg12: memref<128x128xf32, #tpu.memory_space<vmem>>, %arg13: memref<4x8x8x128xf32, #tpu.memory_space<vmem>>) attributes {dimension_semantics = [#tpu.dimension_semantics<parallel>], iteration_bounds = array<i64: 2>, scalar_prefetch = 0 : i64, scratch_operands = 0 : i64, tpu.core_type = #tpu.core_type<tc>, window_params = [{transform_indices = @transform_0, window_bounds = array<i64: 4, 8, 8, 128>}, {pipeline_mode = #tpu.pipeline_mode<synchronous>, transform_indices = @transform_1, window_bounds = array<i64: 128, 32>}, {pipeline_mode = #tpu.pipeline_mode<synchronous>, transform_indices = @transform_2, window_bounds = array<i64: 1, 32>}, {pipeline_mode = #tpu.pipeline_mode<synchronous>, transform_indices = @transform_3, window_bounds = array<i64: 1, 32>}, {pipeline_mode = #tpu.pipeline_mode<synchronous>, transform_indices = @transform_4, window_bounds = array<i64: 288, 32>}, {pipeline_mode = #tpu.pipeline_mode<synchronous>, transform_indices = @transform_5, window_bounds = array<i64: 1, 32>}, {pipeline_mode = #tpu.pipeline_mode<synchronous>, transform_indices = @transform_6, window_bounds = array<i64: 1, 32>}, {pipeline_mode = #tpu.pipeline_mode<synchronous>, transform_indices = @transform_7, window_bounds = array<i64: 32, 128>}, {pipeline_mode = #tpu.pipeline_mode<synchronous>, transform_indices = @transform_8, window_bounds = array<i64: 1, 128>}, {pipeline_mode = #tpu.pipeline_mode<synchronous>, transform_indices = @transform_9, window_bounds = array<i64: 1, 128>}, {pipeline_mode = #tpu.pipeline_mode<synchronous>, transform_indices = @transform_10, window_bounds = array<i64: 32, 32>}, {pipeline_mode = #tpu.pipeline_mode<synchronous>, transform_indices = @transform_11, window_bounds = array<i64: 128, 128>}, {transform_indices = @transform_12, window_bounds = array<i64: 4, 8, 8, 128>}]} {
    %c0 = arith.constant 0 : index
    %c0_0 = arith.constant 0 : index
    %c0_1 = arith.constant 0 : index
    %c0_2 = arith.constant 0 : index
    %0 = vector.load %arg1[%c0, %c0_0, %c0_1, %c0_2] : memref<4x8x8x128xf32, #tpu.memory_space<vmem>>, vector<4x8x8x128xf32>
    %1 = arith.truncf %0 : vector<4x8x8x128xf32> to vector<4x8x8x128xbf16>
    %2 = vector.shape_cast %1 : vector<4x8x8x128xbf16> to vector<256x128xbf16>
    %c0_3 = arith.constant 0 : index
    %c0_4 = arith.constant 0 : index
    %3 = vector.load %arg2[%c0_3, %c0_4] : memref<128x32xbf16, #tpu.memory_space<vmem>>, vector<128x32xbf16>
    %cst = arith.constant dense<0.000000e+00> : vector<256x32xf32>
    %4 = tpu.matmul %2, %3, %cst {dimension_numbers = #tpu.dot_dimension_numbers<[1], [0], [0], [1], [0, 0, 1, 1], [], []>} : vector<256x128xbf16>, vector<128x32xbf16>, vector<256x32xf32> -> vector<256x32xf32>
    %5 = vector.shape_cast %4 : vector<256x32xf32> to vector<4x64x32xf32>
    %c0_5 = arith.constant 0 : index
    %c0_6 = arith.constant 0 : index
    %6 = vector.load %arg3[%c0_5, %c0_6] : memref<1x32xf32, #tpu.memory_space<vmem>>, vector<1x32xf32>
    %c0_7 = arith.constant 0 : index
    %c0_8 = arith.constant 0 : index
    %7 = vector.load %arg4[%c0_7, %c0_8] : memref<1x32xf32, #tpu.memory_space<vmem>>, vector<1x32xf32>
    %c0_9 = arith.constant 0 : index
    %c0_10 = arith.constant 0 : index
    %8 = vector.load %arg11[%c0_9, %c0_10] : memref<32x32xf32, #tpu.memory_space<vmem>>, vector<32x32xf32>
    %cst_11 = arith.constant dense<0.000000e+00> : vector<4x32xf32>
    %9 = vector.multi_reduction <add>, %5, %cst_11 [1] : vector<4x64x32xf32> to vector<4x32xf32>
    %10 = arith.mulf %5, %5 : vector<4x64x32xf32>
    %cst_12 = arith.constant dense<0.000000e+00> : vector<4x32xf32>
    %11 = vector.multi_reduction <add>, %10, %cst_12 [1] : vector<4x64x32xf32> to vector<4x32xf32>
    %12 = tpu.concatenate %9, %11 in 0 : vector<4x32xf32>, vector<4x32xf32> -> vector<8x32xf32>
    %cst_13 = arith.constant dense<0.000000e+00> : vector<8x32xf32>
    %13 = tpu.matmul %12, %8, %cst_13 {dimension_numbers = #tpu.dot_dimension_numbers<[1], [0], [0], [1], [0, 0, 1, 1], [], []>} : vector<8x32xf32>, vector<32x32xf32>, vector<8x32xf32> -> vector<8x32xf32>
    %cst_14 = arith.constant 6.400000e+01 : f32
    %14 = vector.broadcast %cst_14 : f32 to vector<8x32xf32>
    %15 = arith.divf %13, %14 : vector<8x32xf32>
    %16 = vector.extract_strided_slice %15 {offsets = [0, 0], sizes = [4, 32], strides = [1, 1]} : vector<8x32xf32> to vector<4x32xf32>
    %17 = vector.extract_strided_slice %15 {offsets = [4, 0], sizes = [4, 32], strides = [1, 1]} : vector<8x32xf32> to vector<4x32xf32>
    %18 = arith.mulf %16, %16 : vector<4x32xf32>
    %19 = arith.subf %17, %18 : vector<4x32xf32>
    %cst_15 = arith.constant 0.000000e+00 : f32
    %20 = vector.broadcast %cst_15 : f32 to vector<4x32xf32>
    %21 = arith.maximumf %19, %20 : vector<4x32xf32>
    %cst_16 = arith.constant 9.99999974E-6 : f32
    %22 = vector.broadcast %cst_16 : f32 to vector<4x32xf32>
    %23 = arith.addf %21, %22 : vector<4x32xf32>
    %24 = math.rsqrt %23 : vector<4x32xf32>
    %25 = vector.broadcast %6 : vector<1x32xf32> to vector<4x32xf32>
    %26 = arith.mulf %24, %25 : vector<4x32xf32>
    %27 = arith.mulf %16, %26 : vector<4x32xf32>
    %28 = vector.broadcast %7 : vector<1x32xf32> to vector<4x32xf32>
    %29 = arith.subf %28, %27 : vector<4x32xf32>
    %30 = vector.shape_cast %26 : vector<4x32xf32> to vector<4x1x32xf32>
    %31 = vector.broadcast %30 : vector<4x1x32xf32> to vector<4x64x32xf32>
    %32 = arith.mulf %5, %31 : vector<4x64x32xf32>
    %33 = vector.shape_cast %29 : vector<4x32xf32> to vector<4x1x32xf32>
    %34 = vector.broadcast %33 : vector<4x1x32xf32> to vector<4x64x32xf32>
    %35 = arith.addf %32, %34 : vector<4x64x32xf32>
    %cst_17 = arith.constant 0.000000e+00 : f32
    %36 = vector.broadcast %cst_17 : f32 to vector<4x64x32xf32>
    %37 = arith.maximumf %35, %36 : vector<4x64x32xf32>
    %38 = arith.truncf %37 : vector<4x64x32xf32> to vector<4x64x32xbf16>
    %39 = vector.shape_cast %38 : vector<4x64x32xbf16> to vector<4x8x8x32xbf16>
    %cst_18 = arith.constant 0.000000e+00 : bf16
    %40 = vector.broadcast %cst_18 : bf16 to vector<4x8x1x32xbf16>
    %cst_19 = arith.constant 0.000000e+00 : bf16
    %41 = vector.broadcast %cst_19 : bf16 to vector<4x8x7x32xbf16>
    %42 = tpu.concatenate %40, %39, %41 in 2 : vector<4x8x1x32xbf16>, vector<4x8x8x32xbf16>, vector<4x8x7x32xbf16> -> vector<4x8x16x32xbf16>
    %43 = vector.shape_cast %42 : vector<4x8x16x32xbf16> to vector<4x128x32xbf16>
    %cst_20 = arith.constant 0.000000e+00 : bf16
    %44 = vector.broadcast %cst_20 : bf16 to vector<4x16x32xbf16>
    %cst_21 = arith.constant 0.000000e+00 : bf16
    %45 = vector.broadcast %cst_21 : bf16 to vector<4x24x32xbf16>
    %46 = tpu.concatenate %44, %43, %45 in 1 : vector<4x16x32xbf16>, vector<4x128x32xbf16>, vector<4x24x32xbf16> -> vector<4x168x32xbf16>
    %47 = vector.extract_strided_slice %46 {offsets = [0, 0, 0], sizes = [4, 128, 32], strides = [1, 1, 1]} : vector<4x168x32xbf16> to vector<4x128x32xbf16>
    %48 = vector.extract_strided_slice %46 {offsets = [0, 1, 0], sizes = [4, 128, 32], strides = [1, 1, 1]} : vector<4x168x32xbf16> to vector<4x128x32xbf16>
    %49 = vector.extract_strided_slice %46 {offsets = [0, 2, 0], sizes = [4, 128, 32], strides = [1, 1, 1]} : vector<4x168x32xbf16> to vector<4x128x32xbf16>
    %50 = vector.extract_strided_slice %46 {offsets = [0, 16, 0], sizes = [4, 128, 32], strides = [1, 1, 1]} : vector<4x168x32xbf16> to vector<4x128x32xbf16>
    %51 = vector.extract_strided_slice %46 {offsets = [0, 17, 0], sizes = [4, 128, 32], strides = [1, 1, 1]} : vector<4x168x32xbf16> to vector<4x128x32xbf16>
    %52 = vector.extract_strided_slice %46 {offsets = [0, 18, 0], sizes = [4, 128, 32], strides = [1, 1, 1]} : vector<4x168x32xbf16> to vector<4x128x32xbf16>
    %53 = vector.extract_strided_slice %46 {offsets = [0, 32, 0], sizes = [4, 128, 32], strides = [1, 1, 1]} : vector<4x168x32xbf16> to vector<4x128x32xbf16>
    %54 = vector.extract_strided_slice %46 {offsets = [0, 33, 0], sizes = [4, 128, 32], strides = [1, 1, 1]} : vector<4x168x32xbf16> to vector<4x128x32xbf16>
    %55 = vector.extract_strided_slice %46 {offsets = [0, 34, 0], sizes = [4, 128, 32], strides = [1, 1, 1]} : vector<4x168x32xbf16> to vector<4x128x32xbf16>
    %56 = tpu.concatenate %47, %48, %49, %50, %51, %52, %53, %54, %55 in 2 : vector<4x128x32xbf16>, vector<4x128x32xbf16>, vector<4x128x32xbf16>, vector<4x128x32xbf16>, vector<4x128x32xbf16>, vector<4x128x32xbf16>, vector<4x128x32xbf16>, vector<4x128x32xbf16>, vector<4x128x32xbf16> -> vector<4x128x288xbf16>
    %57 = vector.shape_cast %56 : vector<4x128x288xbf16> to vector<512x288xbf16>
    %c0_22 = arith.constant 0 : index
    %c0_23 = arith.constant 0 : index
    %58 = vector.load %arg5[%c0_22, %c0_23] : memref<288x32xbf16, #tpu.memory_space<vmem>>, vector<288x32xbf16>
    %cst_24 = arith.constant dense<0.000000e+00> : vector<512x32xf32>
    %59 = tpu.matmul %57, %58, %cst_24 {dimension_numbers = #tpu.dot_dimension_numbers<[1], [0], [0], [1], [0, 0, 1, 1], [], []>} : vector<512x288xbf16>, vector<288x32xbf16>, vector<512x32xf32> -> vector<512x32xf32>
    %60 = vector.shape_cast %59 : vector<512x32xf32> to vector<4x8x16x32xf32>
    %61 = vector.extract_strided_slice %60 {offsets = [0, 0, 0, 0], sizes = [4, 8, 8, 32], strides = [1, 1, 1, 1]} : vector<4x8x16x32xf32> to vector<4x8x8x32xf32>
    %62 = vector.shape_cast %61 : vector<4x8x8x32xf32> to vector<4x64x32xf32>
    %c0_25 = arith.constant 0 : index
    %c0_26 = arith.constant 0 : index
    %63 = vector.load %arg6[%c0_25, %c0_26] : memref<1x32xf32, #tpu.memory_space<vmem>>, vector<1x32xf32>
    %c0_27 = arith.constant 0 : index
    %c0_28 = arith.constant 0 : index
    %64 = vector.load %arg7[%c0_27, %c0_28] : memref<1x32xf32, #tpu.memory_space<vmem>>, vector<1x32xf32>
    %c0_29 = arith.constant 0 : index
    %c0_30 = arith.constant 0 : index
    %65 = vector.load %arg11[%c0_29, %c0_30] : memref<32x32xf32, #tpu.memory_space<vmem>>, vector<32x32xf32>
    %cst_31 = arith.constant dense<0.000000e+00> : vector<4x32xf32>
    %66 = vector.multi_reduction <add>, %62, %cst_31 [1] : vector<4x64x32xf32> to vector<4x32xf32>
    %67 = arith.mulf %62, %62 : vector<4x64x32xf32>
    %cst_32 = arith.constant dense<0.000000e+00> : vector<4x32xf32>
    %68 = vector.multi_reduction <add>, %67, %cst_32 [1] : vector<4x64x32xf32> to vector<4x32xf32>
    %69 = tpu.concatenate %66, %68 in 0 : vector<4x32xf32>, vector<4x32xf32> -> vector<8x32xf32>
    %cst_33 = arith.constant dense<0.000000e+00> : vector<8x32xf32>
    %70 = tpu.matmul %69, %65, %cst_33 {dimension_numbers = #tpu.dot_dimension_numbers<[1], [0], [0], [1], [0, 0, 1, 1], [], []>} : vector<8x32xf32>, vector<32x32xf32>, vector<8x32xf32> -> vector<8x32xf32>
    %cst_34 = arith.constant 6.400000e+01 : f32
    %71 = vector.broadcast %cst_34 : f32 to vector<8x32xf32>
    %72 = arith.divf %70, %71 : vector<8x32xf32>
    %73 = vector.extract_strided_slice %72 {offsets = [0, 0], sizes = [4, 32], strides = [1, 1]} : vector<8x32xf32> to vector<4x32xf32>
    %74 = vector.extract_strided_slice %72 {offsets = [4, 0], sizes = [4, 32], strides = [1, 1]} : vector<8x32xf32> to vector<4x32xf32>
    %75 = arith.mulf %73, %73 : vector<4x32xf32>
    %76 = arith.subf %74, %75 : vector<4x32xf32>
    %cst_35 = arith.constant 0.000000e+00 : f32
    %77 = vector.broadcast %cst_35 : f32 to vector<4x32xf32>
    %78 = arith.maximumf %76, %77 : vector<4x32xf32>
    %cst_36 = arith.constant 9.99999974E-6 : f32
    %79 = vector.broadcast %cst_36 : f32 to vector<4x32xf32>
    %80 = arith.addf %78, %79 : vector<4x32xf32>
    %81 = math.rsqrt %80 : vector<4x32xf32>
    %82 = vector.broadcast %63 : vector<1x32xf32> to vector<4x32xf32>
    %83 = arith.mulf %81, %82 : vector<4x32xf32>
    %84 = arith.mulf %73, %83 : vector<4x32xf32>
    %85 = vector.broadcast %64 : vector<1x32xf32> to vector<4x32xf32>
    %86 = arith.subf %85, %84 : vector<4x32xf32>
    %87 = vector.shape_cast %83 : vector<4x32xf32> to vector<4x1x32xf32>
    %88 = vector.broadcast %87 : vector<4x1x32xf32> to vector<4x64x32xf32>
    %89 = arith.mulf %62, %88 : vector<4x64x32xf32>
    %90 = vector.shape_cast %86 : vector<4x32xf32> to vector<4x1x32xf32>
    %91 = vector.broadcast %90 : vector<4x1x32xf32> to vector<4x64x32xf32>
    %92 = arith.addf %89, %91 : vector<4x64x32xf32>
    %cst_37 = arith.constant 0.000000e+00 : f32
    %93 = vector.broadcast %cst_37 : f32 to vector<4x64x32xf32>
    %94 = arith.maximumf %92, %93 : vector<4x64x32xf32>
    %95 = arith.truncf %94 : vector<4x64x32xf32> to vector<4x64x32xbf16>
    %96 = vector.shape_cast %95 : vector<4x64x32xbf16> to vector<256x32xbf16>
    %c0_38 = arith.constant 0 : index
    %c0_39 = arith.constant 0 : index
    %97 = vector.load %arg8[%c0_38, %c0_39] : memref<32x128xbf16, #tpu.memory_space<vmem>>, vector<32x128xbf16>
    %cst_40 = arith.constant dense<0.000000e+00> : vector<256x128xf32>
    %98 = tpu.matmul %96, %97, %cst_40 {dimension_numbers = #tpu.dot_dimension_numbers<[1], [0], [0], [1], [0, 0, 1, 1], [], []>} : vector<256x32xbf16>, vector<32x128xbf16>, vector<256x128xf32> -> vector<256x128xf32>
    %99 = vector.shape_cast %98 : vector<256x128xf32> to vector<4x64x128xf32>
    %c0_41 = arith.constant 0 : index
    %c0_42 = arith.constant 0 : index
    %100 = vector.load %arg9[%c0_41, %c0_42] : memref<1x128xf32, #tpu.memory_space<vmem>>, vector<1x128xf32>
    %c0_43 = arith.constant 0 : index
    %c0_44 = arith.constant 0 : index
    %101 = vector.load %arg10[%c0_43, %c0_44] : memref<1x128xf32, #tpu.memory_space<vmem>>, vector<1x128xf32>
    %c0_45 = arith.constant 0 : index
    %c0_46 = arith.constant 0 : index
    %102 = vector.load %arg12[%c0_45, %c0_46] : memref<128x128xf32, #tpu.memory_space<vmem>>, vector<128x128xf32>
    %cst_47 = arith.constant dense<0.000000e+00> : vector<4x128xf32>
    %103 = vector.multi_reduction <add>, %99, %cst_47 [1] : vector<4x64x128xf32> to vector<4x128xf32>
    %104 = arith.mulf %99, %99 : vector<4x64x128xf32>
    %cst_48 = arith.constant dense<0.000000e+00> : vector<4x128xf32>
    %105 = vector.multi_reduction <add>, %104, %cst_48 [1] : vector<4x64x128xf32> to vector<4x128xf32>
    %106 = tpu.concatenate %103, %105 in 0 : vector<4x128xf32>, vector<4x128xf32> -> vector<8x128xf32>
    %cst_49 = arith.constant dense<0.000000e+00> : vector<8x128xf32>
    %107 = tpu.matmul %106, %102, %cst_49 {dimension_numbers = #tpu.dot_dimension_numbers<[1], [0], [0], [1], [0, 0, 1, 1], [], []>} : vector<8x128xf32>, vector<128x128xf32>, vector<8x128xf32> -> vector<8x128xf32>
    %cst_50 = arith.constant 2.560000e+02 : f32
    %108 = vector.broadcast %cst_50 : f32 to vector<8x128xf32>
    %109 = arith.divf %107, %108 : vector<8x128xf32>
    %110 = vector.extract_strided_slice %109 {offsets = [0, 0], sizes = [4, 128], strides = [1, 1]} : vector<8x128xf32> to vector<4x128xf32>
    %111 = vector.extract_strided_slice %109 {offsets = [4, 0], sizes = [4, 128], strides = [1, 1]} : vector<8x128xf32> to vector<4x128xf32>
    %112 = arith.mulf %110, %110 : vector<4x128xf32>
    %113 = arith.subf %111, %112 : vector<4x128xf32>
    %cst_51 = arith.constant 0.000000e+00 : f32
    %114 = vector.broadcast %cst_51 : f32 to vector<4x128xf32>
    %115 = arith.maximumf %113, %114 : vector<4x128xf32>
    %cst_52 = arith.constant 9.99999974E-6 : f32
    %116 = vector.broadcast %cst_52 : f32 to vector<4x128xf32>
    %117 = arith.addf %115, %116 : vector<4x128xf32>
    %118 = math.rsqrt %117 : vector<4x128xf32>
    %119 = vector.broadcast %100 : vector<1x128xf32> to vector<4x128xf32>
    %120 = arith.mulf %118, %119 : vector<4x128xf32>
    %121 = arith.mulf %110, %120 : vector<4x128xf32>
    %122 = vector.broadcast %101 : vector<1x128xf32> to vector<4x128xf32>
    %123 = arith.subf %122, %121 : vector<4x128xf32>
    %124 = vector.shape_cast %120 : vector<4x128xf32> to vector<4x1x128xf32>
    %125 = vector.broadcast %124 : vector<4x1x128xf32> to vector<4x64x128xf32>
    %126 = arith.mulf %99, %125 : vector<4x64x128xf32>
    %127 = vector.shape_cast %123 : vector<4x128xf32> to vector<4x1x128xf32>
    %128 = vector.broadcast %127 : vector<4x1x128xf32> to vector<4x64x128xf32>
    %129 = arith.addf %126, %128 : vector<4x64x128xf32>
    %c0_53 = arith.constant 0 : index
    %c0_54 = arith.constant 0 : index
    %c0_55 = arith.constant 0 : index
    %c0_56 = arith.constant 0 : index
    %130 = vector.load %arg1[%c0_53, %c0_54, %c0_55, %c0_56] : memref<4x8x8x128xf32, #tpu.memory_space<vmem>>, vector<4x8x8x128xf32>
    %131 = vector.shape_cast %130 : vector<4x8x8x128xf32> to vector<4x64x128xf32>
    %132 = arith.addf %129, %131 : vector<4x64x128xf32>
    %cst_57 = arith.constant 0.000000e+00 : f32
    %133 = vector.broadcast %cst_57 : f32 to vector<4x64x128xf32>
    %134 = arith.maximumf %132, %133 : vector<4x64x128xf32>
    %135 = vector.shape_cast %134 : vector<4x64x128xf32> to vector<4x8x8x128xf32>
    %c0_58 = arith.constant 0 : index
    %c0_59 = arith.constant 0 : index
    %c0_60 = arith.constant 0 : index
    %c0_61 = arith.constant 0 : index
    %136 = vector.load %arg13[%c0_58, %c0_59, %c0_60, %c0_61] : memref<4x8x8x128xf32, #tpu.memory_space<vmem>>, vector<4x8x8x128xf32>
    tpu.vector_store %arg13[%c0_58, %c0_59, %c0_60, %c0_61], %135 {strides = array<i32>} : memref<4x8x8x128xf32, #tpu.memory_space<vmem>>, vector<4x8x8x128xf32>,
    return
  }
  func.func @transform_0(%arg0: i32) -> (i32, i32, i32, i32) {
    %c0_i32 = arith.constant 0 : i32
    %c0_i32_0 = arith.constant 0 : i32
    %c0_i32_1 = arith.constant 0 : i32
    %c0_i32_2 = arith.constant 0 : i32
    return %arg0, %c0_i32, %c0_i32_0, %c0_i32_1 : i32, i32, i32, i32
  }
  func.func @transform_1(%arg0: i32) -> (i32, i32) {
    %c0_i32 = arith.constant 0 : i32
    %c0_i32_0 = arith.constant 0 : i32
    %c0_i32_1 = arith.constant 0 : i32
    return %c0_i32, %c0_i32_0 : i32, i32
  }
  func.func @transform_2(%arg0: i32) -> (i32, i32) {
    %c0_i32 = arith.constant 0 : i32
    %c0_i32_0 = arith.constant 0 : i32
    %c0_i32_1 = arith.constant 0 : i32
    return %c0_i32, %c0_i32_0 : i32, i32
  }
  func.func @transform_3(%arg0: i32) -> (i32, i32) {
    %c0_i32 = arith.constant 0 : i32
    %c0_i32_0 = arith.constant 0 : i32
    %c0_i32_1 = arith.constant 0 : i32
    return %c0_i32, %c0_i32_0 : i32, i32
  }
  func.func @transform_4(%arg0: i32) -> (i32, i32) {
    %c0_i32 = arith.constant 0 : i32
    %c0_i32_0 = arith.constant 0 : i32
    %c0_i32_1 = arith.constant 0 : i32
    return %c0_i32, %c0_i32_0 : i32, i32
  }
  func.func @transform_5(%arg0: i32) -> (i32, i32) {
    %c0_i32 = arith.constant 0 : i32
    %c0_i32_0 = arith.constant 0 : i32
    %c0_i32_1 = arith.constant 0 : i32
    return %c0_i32, %c0_i32_0 : i32, i32
  }
  func.func @transform_6(%arg0: i32) -> (i32, i32) {
    %c0_i32 = arith.constant 0 : i32
    %c0_i32_0 = arith.constant 0 : i32
    %c0_i32_1 = arith.constant 0 : i32
    return %c0_i32, %c0_i32_0 : i32, i32
  }
  func.func @transform_7(%arg0: i32) -> (i32, i32) {
    %c0_i32 = arith.constant 0 : i32
    %c0_i32_0 = arith.constant 0 : i32
    %c0_i32_1 = arith.constant 0 : i32
    return %c0_i32, %c0_i32_0 : i32, i32
  }
  func.func @transform_8(%arg0: i32) -> (i32, i32) {
    %c0_i32 = arith.constant 0 : i32
    %c0_i32_0 = arith.constant 0 : i32
    %c0_i32_1 = arith.constant 0 : i32
    return %c0_i32, %c0_i32_0 : i32, i32
  }
  func.func @transform_9(%arg0: i32) -> (i32, i32) {
    %c0_i32 = arith.constant 0 : i32
    %c0_i32_0 = arith.constant 0 : i32
    %c0_i32_1 = arith.constant 0 : i32
    return %c0_i32, %c0_i32_0 : i32, i32
  }
  func.func @transform_10(%arg0: i32) -> (i32, i32) {
    %c0_i32 = arith.constant 0 : i32
    %c0_i32_0 = arith.constant 0 : i32
    %c0_i32_1 = arith.constant 0 : i32
    return %c0_i32, %c0_i32_0 : i32, i32
  }
  func.func @transform_11(%arg0: i32) -> (i32, i32) {
    %c0_i32 = arith.constant 0 : i32
    %c0_i32_0 = arith.constant 0 : i32
    %c0_i32_1 = arith.constant 0 : i32
    return %c0_i32, %c0_i32_0 : i32, i32
  }
  func.func @transform_12(%arg0: i32) -> (i32, i32, i32, i32) {
    %c0_i32 = arith.constant 0 : i32
    %c0_i32_0 = arith.constant 0 : i32
    %c0_i32_1 = arith.constant 0 : i32
    %c0_i32_2 = arith.constant 0 : i32
    return %arg0, %c0_i32, %c0_i32_0, %c0_i32_1 : i32, i32, i32, i32
  }
}

</mosaic_0001>

<bundles_post_ra>
// kernel: bottleneck_forward.1
= control target key start
LH: loop header
LB: loop body
LE: loop exit
PB: predicated region body
PF: predicated region fallthrough
CT: control target
= control target key end

     0   :  { %17 = vsyncpa [#allocation3], 0  ;;  %s8930_s0 = inlined_call_operand.vmem [shape: f32[8,8,8,128], index: 0, kind: input, shape index: {}]   ;;  %s8931_s1 = inlined_call_operand.vmem [shape: bf16[128,32], index: 1, kind: input, shape index: {}]   ;;  %s8932_s2 = inlined_call_operand.vmem [shape: f32[1,32], index: 2, kind: input, shape index: {}]   ;;  %s8933_s3 = inlined_call_operand.vmem [shape: f32[1,32], index: 3, kind: input, shape index: {}]   ;;  %s8934_s4 = inlined_call_operand.vmem [shape: bf16[288,32], index: 4, kind: input, shape index: {}]   ;;  %s8935_s5 = inlined_call_operand.vmem [shape: f32[1,32], index: 5, kind: input, shape index: {}]   ;;  %s8936_s6 = inlined_call_operand.vmem [shape: f32[1,32], index: 6, kind: input, shape index: {}]   ;;  %s8937_s7 = inlined_call_operand.vmem [shape: bf16[32,128], index: 7, kind: input, shape index: {}]   ;;  %s8938_s8 = inlined_call_operand.vmem [shape: f32[1,128], index: 8, kind: input, shape index: {}]   ;;  %s8939_s9 = inlined_call_operand.vmem [shape: f32[1,128], index: 9, kind: input, shape index: {}]   ;;  %s8940_s10 = inlined_call_operand.vmem [shape: f32[32,32], index: 10, kind: input, shape index: {}]   ;;  %s8941_s11 = inlined_call_operand.vmem [shape: f32[128,128], index: 11, kind: input, shape index: {}]   ;;  %s8942_s12 = inlined_call_operand.hbm [shape: f32[8,8,8,128], index: 12, kind: output, shape index: {}]  }
   0x1   :  { %19 = vsyncpa [#allocation3 + $0x1], 0  ;;  %s5857_s21 = smov 0   ;;  %s5859_s22 = smov 0  }
   0x2   :  { %s5861_s23 = smov 0   ;;  %s5863_s24 = smov 0  }
   0x3 LB: > { %s5878_s25 = sadd.s32 4294967295, %s5779_s24   ;;  %s5052_s26 = sadd.s32 4294967294, %s5779_s24   ;;  %s5779_s24 = sphi %s5863_s24, %s9262_s24   ;;  %s5775_s23 = sphi %s5861_s23, %s9261_s23   ;;  %s5771_s22 = sphi %s5859_s22, %s9260_s22   ;;  %s5767_s21 = sphi %s5857_s21, %s9259_s21  }
   0x4   : > { %s5882_s27 = sadd.s32 1, %s5779_s24   ;;  %s289_s28 = sadd.s32 1, %s5775_s23 }
   0x5   : > { %s286_s29 = ssub.s32 %s5779_s24, %s5882_s27  ;;  %p299_p0 = scmp.ne.s32.totalorder %s5775_s23, %s5771_s22 }
   0x6   : > { %p287_p1 = scmp.eq.s32.totalorder %s286_s29, 0  ;;  %p300_p2 = scmp.eq.s32.totalorder %s5878_s25, 1 }
   0x7   : > { %p305_p3 = scmp.ne.s32.totalorder %s5771_s22, %s5767_s21  ;;  %p306_p4 = scmp.eq.s32.totalorder %s5052_s26, 1 }
   0x8   : > { %s5893_s30 = scalar_select %p287_p1, %s5775_s23, %s289_s28  }
   0x9   : > { %p5895_p5 = por %p300_p2, %p299_p0  ;;  %p5899_p6 = por %p306_p4, %p305_p3 }
   0xa   : > { %9025 = sst [smem:[#allocation5_spill]] %s5893_s30  ;;  %p5055_p7 = scmp.ge.s32.totalorder %s5779_s24, 1 }
   0xb   : > { %p367_p8 = scmp.lt.s32.totalorder %s5779_s24, 3 }
   0xd   : > { %p368_p9 = pnand %p5055_p7, %p367_p8 }
   0xf   : > { %371 = sbr.rel (%p368_p9) target bundleno = 2184 (0x888), region = 68 }
  0x16   : > { %v5651_v0 = vld [vmem:[%s8931_s1] sm:$0xff]   ;;  %s5057_s17 = sshll.u32 %s5878_s25, 2  ;;  %v5652_v1 = vld [vmem:[%s8931_s1 + $0x8] sm:$0xff]   ;;  %v5653_v2 = vld [vmem:[%s8931_s1 + $0x10] sm:$0xff]   ;;  %v8947_v58 = vmov 0.0|0.0   ;;  %vm5782_vm0 = vmmov 0  }
  0x17   : > { %p411_p10 = scmp.lt.s32.totalorder %s5057_s17, 7  ;;  %5352 = vmatprep.subr.bf16.mxu0 %v5651_v0  ;;  %v5654_v3 = vld [vmem:[%s8931_s1 + $0x18] sm:$0xff]   ;;  %v5655_v7 = vld [vmem:[%s8931_s1 + $0x20] sm:$0xff]   ;;  %v5656_v8 = vld [vmem:[%s8931_s1 + $0x28] sm:$0xff]   ;;  %v8943_v63 = vmov 0.0   ;;  %vm810_vm1 = vcmask 261120  }
  0x18   : > { %5353 = vmatpush3.bf16.msra.mxu0 %v5651_v0  ;;  %v5657_v9 = vld [vmem:[%s8931_s1 + $0x30] sm:$0xff]   ;;  %v5658_v10 = vld [vmem:[%s8931_s1 + $0x38] sm:$0xff]   ;;  %v806_v56 = vld [vmem:[%s8940_s10] sm:$0xff]  ;;  %vm1015_vm2 = vcmask 1041409   ;;  %vm1026_vm3 = vcmask 1045509   ;;  %vm1017_vm4 = vcmask 1042434  }
  0x19   : > { %s9264_s17 = smov (!%p411_p10, %s5057_s17), 7  ;;  %5354 = vmatprep.subr.bf16.mxu0 %v5652_v1  ;;  %v807_v57 = vld [vmem:[%s8940_s10 + $0x8] sm:$0xff]  ;;  %v808_v60 = vld [vmem:[%s8940_s10 + $0x10] sm:$0xff]  ;;  %v809_v61 = vld [vmem:[%s8940_s10 + $0x18] sm:$0xff]  ;;  %vm1028_vm5 = vcmask 1046534   ;;  %vm1019_vm6 = vcmask 1043459  }
  0x1a   : > { %s5198_s28 = sshll.u32 %s9264_s17, 6  ;;  %v5974_v59 = vpack.c.bf16 %v807_v57, %v806_v56  ;;  %v5984_v62 = vpack.c.bf16 %v809_v61, %v808_v60  ;;  %vm1030_vm7 = vcmask 1047559   ;;  %vm1033_vm8 = vcmask 1043456   ;;  %s5785_s19 = smov 64  }
  0x1b   : > { %s5918_s15 = scalar_lea.vmem %s8930_s0, %s5198_s28  ;;  %s5786_s20 = smov 96   ;;  %vm1674_vm9 = vcmask 1040384   ;;  %vm1675_vm10 = vsmask.f32 256  ;;  %vm1709_vm11 = vcmask 1044480   ;;  %vm2093_vm13 = vcmask 1046528  }
  0x1c   : > { %5355 = vmatpush3.bf16.msra.mxu0 %v5652_v1  ;;  %v419_v4 = vld [vmem:[%s5918_s15] sm:$0xff]  ;;  %v420_v5 = vld [vmem:[%s5918_s15 + $0x8] sm:$0xff]  ;;  %v421_v11 = vld [vmem:[%s5918_s15 + $0x10] sm:$0xff]  ;;  %vm1710_vm12 = vsmask.f32 4352  ;;  %s5788_s16 = smov 32  }
  0x1d   : > { %5356 = vmatprep.subr.bf16.mxu0 %v5653_v2  ;;  %v5199_v6 = vpack.c.bf16 %v420_v5, %v419_v4  ;;  %v422_v12 = vld [vmem:[%s5918_s15 + $0x18] sm:$0xff]  ;;  %v423_v13 = vld [vmem:[%s5918_s15 + $0x20] sm:$0xff]  ;;  %v424_v14 = vld [vmem:[%s5918_s15 + $0x28] sm:$0xff]  ;;  %s407_s30 = sand.u32 1, %s5771_s22   ;;  %s5789_s18 = smov [#allocation2]  }
  0x1e   : > { %v5200_v15 = vpack.c.bf16 %v422_v12, %v421_v11  ;;  %v5201_v16 = vpack.c.bf16 %v424_v14, %v423_v13  ;;  %v425_v17 = vld [vmem:[%s5918_s15 + $0x30] sm:$0xff]  ;;  %v426_v18 = vld [vmem:[%s5918_s15 + $0x38] sm:$0xff]  ;;  %v427_v19 = vld [vmem:[%s5918_s15 + $0x40] sm:$0xff]  ;;  %s8889_s28 = scalar_lea.sflag [#allocation3], %s407_s30 }
  0x1f   : > { %5368 = vmatprep.mubr.bf16.mxu0 %v5199_v6  ;;  %v428_v20 = vld [vmem:[%s5918_s15 + $0x48] sm:$0xff]  ;;  %v5202_v21 = vpack.c.bf16 %v426_v18, %v425_v17  ;;  %v429_v23 = vld [vmem:[%s5918_s15 + $0x50] sm:$0xff]  ;;  %v430_v24 = vld [vmem:[%s5918_s15 + $0x58] sm:$0xff] }
  0x20   : > { %5357 = vmatpush3.bf16.msra.mxu0 %v5653_v2  ;;  %v5203_v22 = vpack.c.bf16 %v428_v20, %v427_v19  ;;  %v431_v25 = vld [vmem:[%s5918_s15 + $0x60] sm:$0xff]  ;;  %v432_v26 = vld [vmem:[%s5918_s15 + $0x68] sm:$0xff]  ;;  %v5204_v27 = vpack.c.bf16 %v430_v24, %v429_v23  ;;  %v433_v29 = vld [vmem:[%s5918_s15 + $0x70] sm:$0xff] }
  0x21   : > { %5358 = vmatprep.subr.bf16.mxu0 %v5654_v3  ;;  %v5205_v28 = vpack.c.bf16 %v432_v26, %v431_v25  ;;  %v434_v30 = vld [vmem:[%s5918_s15 + $0x78] sm:$0xff]  ;;  %v435_v31 = vld [vmem:[%s5918_s15 + $0x80] sm:$0xff]  ;;  %v436_v32 = vld [vmem:[%s5918_s15 + $0x88] sm:$0xff] }
  0x22   : > { %v5206_v33 = vpack.c.bf16 %v434_v30, %v433_v29  ;;  %v5207_v34 = vpack.c.bf16 %v436_v32, %v435_v31  ;;  %v437_v35 = vld [vmem:[%s5918_s15 + $0x90] sm:$0xff]  ;;  %v438_v36 = vld [vmem:[%s5918_s15 + $0x98] sm:$0xff]  ;;  %v439_v37 = vld [vmem:[%s5918_s15 + $0xa0] sm:$0xff] }
  0x23   : > { %v440_v38 = vld [vmem:[%s5918_s15 + $0xa8] sm:$0xff]  ;;  %v5208_v39 = vpack.c.bf16 %v438_v36, %v437_v35  ;;  %v441_v41 = vld [vmem:[%s5918_s15 + $0xb0] sm:$0xff]  ;;  %v442_v42 = vld [vmem:[%s5918_s15 + $0xb8] sm:$0xff] }
  0x24   : > { %5359 = vmatpush3.bf16.msra.mxu0 %v5654_v3  ;;  %v5209_v40 = vpack.c.bf16 %v440_v38, %v439_v37  ;;  %v443_v43 = vld [vmem:[%s5918_s15 + $0xc0] sm:$0xff]  ;;  %v444_v44 = vld [vmem:[%s5918_s15 + $0xc8] sm:$0xff]  ;;  %v5210_v45 = vpack.c.bf16 %v442_v42, %v441_v41  ;;  %v445_v47 = vld [vmem:[%s5918_s15 + $0xd0] sm:$0xff] }
  0x25   : > { %5360 = vmatprep.subr.bf16.mxu0 %v5655_v7  ;;  %v5211_v46 = vpack.c.bf16 %v444_v44, %v443_v43  ;;  %v446_v48 = vld [vmem:[%s5918_s15 + $0xd8] sm:$0xff]  ;;  %v447_v49 = vld [vmem:[%s5918_s15 + $0xe0] sm:$0xff]  ;;  %v448_v50 = vld [vmem:[%s5918_s15 + $0xe8] sm:$0xff] }
  0x26   : > { %v5212_v51 = vpack.c.bf16 %v446_v48, %v445_v47  ;;  %v5213_v52 = vpack.c.bf16 %v448_v50, %v447_v49  ;;  %v449_v53 = vld [vmem:[%s5918_s15 + $0xf0] sm:$0xff]  ;;  %v450_v54 = vld [vmem:[%s5918_s15 + $0xf8] sm:$0xff]  ;;  %vm6289_vm14 = vmand %vm1674_vm9, %vm1675_vm10  ;;  %vm1744_vm9 = vsmask.f32 7424  ;;  %vm2553_vm10 = vcmask 523264  }
  0x27   : > { %v5214_v55 = vpack.c.bf16 %v450_v54, %v449_v53  ;;  %vm6295_vm15 = vmand %vm1709_vm11, %vm1710_vm12  ;;  %vm2618_vm11 = vcmask 785408  }
  0x28   : > { %5361 = vmatpush3.bf16.msra.mxu0 %v5655_v7 }
  0x29   : > { %5362 = vmatprep.subr.bf16.mxu0 %v5656_v8 }
  0x2c   : > { %5363 = vmatpush3.bf16.msra.mxu0 %v5656_v8 }
  0x2d   : > { %5364 = vmatprep.subr.bf16.mxu0 %v5657_v9 }
  0x30   : > { %5365 = vmatpush3.bf16.msra.mxu0 %v5657_v9 }
  0x31   : > { %5366 = vmatprep.subr.bf16.mxu0 %v5658_v10 }
  0x34   : > { %5367 = vmatpush3.bf16.msra.mxu0 %v5658_v10 }
  0x35   : > { %5561 = vmatprep.subr.bf16.mxu0 %v8947_v58 }
  0x37   : > { %5369 = vmatmul.mubr.bf16.vlgmr.msra.gmra.mrb[0].mxu0 %v5200_v15 }
  0x38   : > { %5372 = vmatprep.mubr.bf16.mxu0 %v5201_v16  ;;  %5563 = vmatpush3.bf16.msra.mxu0 %v5974_v59 }
  0x39   : > { %5564 = vmatprep.subr.bf16.mxu0 %v8947_v58 }
  0x3c   : > { %5566 = vmatpush3.bf16.msra.mxu0 %v5984_v62 }
  0x3f   : > { %5373 = vmatmul.mubr.bf16.gmra.mrb[4].mxu0 %v5202_v21 }
  0x40   : > { %5376 = vmatprep.mubr.bf16.mxu0 %v5203_v22 }
  0x47   : > { %5377 = vmatmul.mubr.bf16.gmra.mrb[8].mxu0 %v5204_v27 }
  0x48   : > { %5380 = vmatprep.mubr.bf16.mxu0 %v5205_v28 }
  0x4f   : > { %5381 = vmatmul.mubr.bf16.gmra.mrb[12].mxu0 %v5206_v33 }
  0x50   : > { %5384 = vmatprep.mubr.bf16.mxu0 %v5207_v34 }
  0x57   : > { %5385 = vmatmul.mubr.bf16.gmra.mrb[16].mxu0 %v5208_v39 }
  0x58   : > { %5388 = vmatprep.mubr.bf16.mxu0 %v5209_v40 }
  0x5f   : > { %5389 = vmatmul.mubr.bf16.gmra.mrb[20].mxu0 %v5210_v45 }
  0x60   : > { %5392 = vmatprep.mubr.bf16.mxu0 %v5211_v46 }
  0x67   : > { %5393 = vmatmul.mubr.bf16.gmra.mrb[24].mxu0 %v5212_v51 }
  0x68   : > { %5396 = vmatprep.mubr.bf16.mxu0 %v5213_v52 }
  0x6f   : > { %5397 = vmatmul.mubr.bf16.gmra.mrb[28].mxu0 %v5214_v55 }
  0x70   : > { %5408 = vmatprep.mubr.msk.f32.mxu0 %vm5782_vm0, %v8943_v63 }
 0x10a   : > { %v5989_v0 = vpop.f32.mrb[0].mxu0 }
 0x10b   : > { %v5991_v1 = vpop.f32.mrb[1].mxu0  ;;  %v897_v5 = vmul.f32 %v5989_v0, %v5989_v0  ;;  %v814_v10 = vsel %vm810_vm1, %v5989_v0, 0.0 }
 0x10c   : > { %v895_v2 = vmul.f32 %v5991_v1, %v5991_v1  ;;  %v5995_v3 = vpop.f32.mrb[2].mxu0  ;;  %v811_v6 = vsel %vm810_vm1, %v5991_v1, 0.0 }
 0x10d   : > { %v5997_v4 = vpop.f32.mrb[3].mxu0  ;;  %v898_v12 = vmul.f32 %v5995_v3, %v5995_v3  ;;  %v930_v16 = vsel %vm810_vm1, %v897_v5, 0.0  ;;  %v816_v17 = vsel %vm810_vm1, %v5995_v3, 0.0 }
 0x10e   : > { %v812_v7 = vsel %vm810_vm1, %v5997_v4, 0.0  ;;  %v896_v8 = vmul.f32 %v5997_v4, %v5997_v4  ;;  %v927_v11 = vsel %vm810_vm1, %v895_v2, 0.0 }
 0x10f   : > { %v813_v9 = vadd.f32 %v812_v7, %v811_v6  ;;  %v932_v22 = vsel %vm810_vm1, %v898_v12, 0.0 }
 0x110   : > { %v928_v13 = vsel %vm810_vm1, %v896_v8, 0.0 }
 0x111   : > { %v815_v14 = vadd.f32 %v814_v10, %v813_v9  ;;  %v929_v15 = vadd.f32 %v928_v13, %v927_v11 }
 0x112   : > { %v6016_v18 = vpop.f32.mrb[4].mxu0 }
 0x113   : > { %v931_v19 = vadd.f32 %v930_v16, %v929_v15  ;;  %v6018_v20 = vpop.f32.mrb[5].mxu0  ;;  %v817_v21 = vadd.f32 %v816_v17, %v815_v14  ;;  %v901_v29 = vmul.f32 %v6016_v18, %v6016_v18  ;;  %v822_v35 = vsel %vm810_vm1, %v6016_v18, 0.0 }
 0x114   : > { %v818_v23 = vsel %vm810_vm1, %v6018_v20, 0.0  ;;  %v899_v24 = vmul.f32 %v6018_v20, %v6018_v20  ;;  %v6025_v25 = vpop.f32.mrb[6].mxu0 }
 0x115   : > { %v819_v26 = vadd.f32 %v818_v23, %v817_v21  ;;  %v933_v27 = vadd.f32 %v932_v22, %v931_v19  ;;  %v6027_v28 = vpop.f32.mrb[7].mxu0  ;;  %v902_v36 = vmul.f32 %v6025_v25, %v6025_v25  ;;  %v938_v40 = vsel %vm810_vm1, %v901_v29, 0.0 }
 0x116   : > { %v934_v30 = vsel %vm810_vm1, %v899_v24, 0.0  ;;  %v820_v31 = vsel %vm810_vm1, %v6027_v28, 0.0  ;;  %v900_v32 = vmul.f32 %v6027_v28, %v6027_v28  ;;  %v824_v41 = vsel %vm810_vm1, %v6025_v25, 0.0 }
 0x117   : > { %v935_v33 = vadd.f32 %v934_v30, %v933_v27  ;;  %v821_v34 = vadd.f32 %v820_v31, %v819_v26  ;;  %v940_v46 = vsel %vm810_vm1, %v902_v36, 0.0 }
 0x118   : > { %v936_v37 = vsel %vm810_vm1, %v900_v32, 0.0 }
 0x119   : > { %v823_v38 = vadd.f32 %v822_v35, %v821_v34  ;;  %v937_v39 = vadd.f32 %v936_v37, %v935_v33 }
 0x11a   : > { %v6044_v42 = vpop.f32.mrb[8].mxu0 }
 0x11b   : > { %v825_v43 = vadd.f32 %v824_v41, %v823_v38  ;;  %v939_v44 = vadd.f32 %v938_v40, %v937_v39  ;;  %v6046_v45 = vpop.f32.mrb[9].mxu0  ;;  %v905_v51 = vmul.f32 %v6044_v42, %v6044_v42  ;;  %v835_v57 = vsel %vm810_vm1, %v6044_v42, 0.0 }
 0x11c   : > { %v903_v47 = vmul.f32 %v6046_v45, %v6046_v45  ;;  %v6051_v48 = vpop.f32.mrb[10].mxu0  ;;  %v832_v52 = vsel %vm810_vm1, %v6046_v45, 0.0 }
 0x11d   : > { %v941_v49 = vadd.f32 %v940_v46, %v939_v44  ;;  %v6053_v50 = vpop.f32.mrb[11].mxu0  ;;  %v826_v55 = vrot.slane %v825_v43, 4  ;;  %v906_v61 = vmul.f32 %v6051_v48, %v6051_v48  ;;  %v951_v7 = vsel %vm810_vm1, %v905_v51, 0.0 }
 0x11e   : > { %v833_v53 = vsel %vm810_vm1, %v6053_v50, 0.0  ;;  %v904_v54 = vmul.f32 %v6053_v50, %v6053_v50  ;;  %v948_v60 = vsel %vm810_vm1, %v903_v47, 0.0  ;;  %v837_v10 = vsel %vm810_vm1, %v6051_v48, 0.0 }
 0x11f   : > { %v834_v56 = vadd.f32 %v833_v53, %v832_v52  ;;  %v827_v9 = vadd.f32 %v826_v55, %v825_v43  ;;  %v953_v13 = vsel %vm810_vm1, %v906_v61, 0.0  ;;  %v942_v19 = vrot.slane %v941_v49, 4 }
 0x120   : > { %v949_v2 = vsel %vm810_vm1, %v904_v54, 0.0 }
 0x121   : > { %v836_v5 = vadd.f32 %v835_v57, %v834_v56  ;;  %v950_v6 = vadd.f32 %v949_v2, %v948_v60  ;;  %v828_v29 = vrot.slane %v827_v9, 2  ;;  %v943_v33 = vadd.f32 %v942_v19, %v941_v49 }
 0x122   : > { %v6070_v8 = vpop.f32.mrb[12].mxu0 }
 0x123   : > { %v952_v11 = vadd.f32 %v951_v7, %v950_v6  ;;  %v6074_v12 = vpop.f32.mrb[13].mxu0  ;;  %v838_v14 = vadd.f32 %v837_v10, %v836_v5  ;;  %v909_v30 = vmul.f32 %v6070_v8, %v6070_v8  ;;  %v843_v34 = vsel %vm810_vm1, %v6070_v8, 0.0 }
 0x124   : > { %v839_v15 = vsel %vm810_vm1, %v6074_v12, 0.0  ;;  %v907_v16 = vmul.f32 %v6074_v12, %v6074_v12  ;;  %v6081_v17 = vpop.f32.mrb[14].mxu0  ;;  %v829_v43 = vadd.f32 %v828_v29, %v827_v9  ;;  %v944_v51 = vrot.slane %v943_v33, 2 }
 0x125   : > { %v954_v21 = vadd.f32 %v953_v13, %v952_v11  ;;  %v6083_v22 = vpop.f32.mrb[15].mxu0  ;;  %v840_v23 = vadd.f32 %v839_v15, %v838_v14  ;;  %v910_v35 = vmul.f32 %v6081_v17, %v6081_v17  ;;  %v845_v39 = vsel %vm810_vm1, %v6081_v17, 0.0 }
 0x126   : > { %v955_v24 = vsel %vm810_vm1, %v907_v16, 0.0  ;;  %v841_v27 = vsel %vm810_vm1, %v6083_v22, 0.0  ;;  %v908_v32 = vmul.f32 %v6083_v22, %v6083_v22  ;;  %v959_v44 = vsel %vm810_vm1, %v909_v30, 0.0 }
 0x127   : > { %v956_v26 = vadd.f32 %v955_v24, %v954_v21  ;;  %v842_v31 = vadd.f32 %v841_v27, %v840_v23  ;;  %v961_v52 = vsel %vm810_vm1, %v910_v35, 0.0  ;;  %v945_v13 = vadd.f32 %v944_v51, %v943_v33 }
 0x128   : > { %v957_v37 = vsel %vm810_vm1, %v908_v32, 0.0  ;;  %v830_v19 = vrot.slane %v829_v43, 1 }
 0x129   : > { %v844_v36 = vadd.f32 %v843_v34, %v842_v31  ;;  %v958_v40 = vadd.f32 %v957_v37, %v956_v26  ;;  %v946_v37 = vrot.slane %v945_v13, 1 }
 0x12a   : > { %v6097_v38 = vpop.f32.mrb[16].mxu0 }
 0x12b   : > { %v6101_v41 = vpop.f32.mrb[17].mxu0  ;;  %v846_v46 = vadd.f32 %v845_v39, %v844_v36  ;;  %v960_v53 = vadd.f32 %v959_v44, %v958_v40  ;;  %v913_v54 = vmul.f32 %v6097_v38, %v6097_v38  ;;  %v856_v9 = vsel %vm810_vm1, %v6097_v38, 0.0 }
 0x12c   : > { %v911_v47 = vmul.f32 %v6101_v41, %v6101_v41  ;;  %v6106_v49 = vpop.f32.mrb[18].mxu0  ;;  %v853_v57 = vsel %vm810_vm1, %v6101_v41, 0.0 }
 0x12d   : > { %v6111_v55 = vpop.f32.mrb[19].mxu0  ;;  %v847_v56 = vrot.slane %v846_v46, 4  ;;  %v962_v2 = vadd.f32 %v961_v52, %v960_v53  ;;  %v914_v5 = vmul.f32 %v6106_v49, %v6106_v49  ;;  %v972_v23 = vsel %vm810_vm1, %v913_v54, 0.0 }
 0x12e   : > { %v854_v60 = vsel %vm810_vm1, %v6111_v55, 0.0  ;;  %v912_v61 = vmul.f32 %v6111_v55, %v6111_v55  ;;  %v969_v10 = vsel %vm810_vm1, %v911_v47, 0.0  ;;  %v858_v27 = vsel %vm810_vm1, %v6106_v49, 0.0 }
 0x12f   : > { %v855_v6 = vadd.f32 %v854_v60, %v853_v57  ;;  %v848_v7 = vadd.f32 %v847_v56, %v846_v46  ;;  %v963_v14 = vrot.slane %v962_v2, 4  ;;  %v974_v29 = vsel %vm810_vm1, %v914_v5, 0.0 }
 0x130   : > { %v970_v11 = vsel %vm810_vm1, %v912_v61, 0.0  ;;  %v831_v60 = vadd.f32 %v830_v19, %v829_v43  ;;  %v947_v43 = vadd.f32 %v946_v37, %v945_v13 }
 0x131   : > { %v857_v15 = vadd.f32 %v856_v9, %v855_v6  ;;  %v971_v16 = vadd.f32 %v970_v11, %v969_v10  ;;  %v849_v21 = vrot.slane %v848_v7, 2  ;;  %v964_v26 = vadd.f32 %v963_v14, %v962_v2 }
 0x132   : > { %v6126_v24 = vpop.f32.mrb[20].mxu0 }
 0x133   : > { %v973_v30 = vadd.f32 %v972_v23, %v971_v16  ;;  %v6131_v31 = vpop.f32.mrb[21].mxu0  ;;  %v850_v32 = vadd.f32 %v849_v21, %v848_v7  ;;  %v859_v33 = vadd.f32 %v858_v27, %v857_v15  ;;  %v965_v39 = vrot.slane %v964_v26, 2 }
 0x134   : > { %v860_v34 = vsel %vm810_vm1, %v6131_v31, 0.0  ;;  %v915_v35 = vmul.f32 %v6131_v31, %v6131_v31  ;;  %v6137_v36 = vpop.f32.mrb[22].mxu0  ;;  %v917_v47 = vmul.f32 %v6126_v24, %v6126_v24  ;;  %v864_v6 = vsel %vm810_vm1, %v6126_v24, 0.0 }
 0x135   : > { %v975_v40 = vadd.f32 %v974_v29, %v973_v30  ;;  %v6139_v44 = vpop.f32.mrb[23].mxu0  ;;  %v851_v46 = vrot.slane %v850_v32, 1  ;;  %v861_v51 = vadd.f32 %v860_v34, %v859_v33  ;;  %v966_v53 = vadd.f32 %v965_v39, %v964_v26 }
 0x136   : > { %v976_v52 = vsel %vm810_vm1, %v915_v35, 0.0  ;;  %v862_v56 = vsel %vm810_vm1, %v6139_v44, 0.0  ;;  %v916_v57 = vmul.f32 %v6139_v44, %v6139_v44  ;;  %v918_v7 = vmul.f32 %v6137_v36, %v6137_v36 }
 0x137   : > { %v977_v54 = vadd.f32 %v976_v52, %v975_v40  ;;  %v852_v61 = vadd.f32 %v851_v46, %v850_v32  ;;  %v863_v2 = vadd.f32 %v862_v56, %v861_v51  ;;  %v967_v5 = vrot.slane %v966_v53, 1 }
 0x138   : > { %v978_v9 = vsel %vm810_vm1, %v916_v57, 0.0  ;;  %v980_v19 = vsel %vm810_vm1, %v917_v47, 0.0  ;;  %v866_v21 = vsel %vm810_vm1, %v6137_v36, 0.0  ;;  %v982_v30 = vsel %vm810_vm1, %v918_v7, 0.0 }
 0x139   : > { %v865_v10 = vadd.f32 %v864_v6, %v863_v2  ;;  %v979_v11 = vadd.f32 %v978_v9, %v977_v54  ;;  %v6156_v15 = vsel %vm1015_vm2, %v852_v61, %v831_v60  ;;  %v968_v16 = vadd.f32 %v967_v5, %v966_v53 }
 0x13a   : > { %v6153_v14 = vpop.f32.mrb[24].mxu0 }
 0x13b   : > { %v6161_v23 = vpop.f32.mrb[25].mxu0  ;;  %v867_v26 = vadd.f32 %v866_v21, %v865_v10  ;;  %v981_v27 = vadd.f32 %v980_v19, %v979_v11  ;;  %v1027_v13 = vsel %vm1026_vm3, %v968_v16, %v947_v43  ;;  %v921_v40 = vmul.f32 %v6153_v14, %v6153_v14 }
 0x13c   : > { %v6163_v29 = vpop.f32.mrb[26].mxu0  ;;  %v919_v32 = vmul.f32 %v6161_v23, %v6161_v23  ;;  %v874_v37 = vsel %vm810_vm1, %v6161_v23, 0.0  ;;  %v877_v53 = vsel %vm810_vm1, %v6153_v14, 0.0 }
 0x13d   : > { %v6168_v33 = vpop.f32.mrb[27].mxu0  ;;  %v868_v34 = vrot.slane %v867_v26, 4  ;;  %v983_v35 = vadd.f32 %v982_v30, %v981_v27  ;;  %v922_v56 = vmul.f32 %v6163_v29, %v6163_v29  ;;  %v879_v5 = vsel %vm810_vm1, %v6163_v29, 0.0 }
 0x13e   : > { %v875_v39 = vsel %vm810_vm1, %v6168_v33, 0.0  ;;  %v920_v47 = vmul.f32 %v6168_v33, %v6168_v33  ;;  %v990_v54 = vsel %vm810_vm1, %v919_v32, 0.0  ;;  %v993_v9 = vsel %vm810_vm1, %v921_v40, 0.0 }
 0x13f   : > { %v876_v46 = vadd.f32 %v875_v39, %v874_v37  ;;  %v869_v51 = vadd.f32 %v868_v34, %v867_v26  ;;  %v984_v52 = vrot.slane %v983_v35, 4  ;;  %v995_v27 = vsel %vm810_vm1, %v922_v56, 0.0 }
 0x140   : > { %v991_v60 = vsel %vm810_vm1, %v920_v47, 0.0 }
 0x141   : > { %v878_v57 = vadd.f32 %v877_v53, %v876_v46  ;;  %v870_v61 = vrot.slane %v869_v51, 2  ;;  %v985_v2 = vadd.f32 %v984_v52, %v983_v35  ;;  %v992_v6 = vadd.f32 %v991_v60, %v990_v54 }
 0x142   : > { %v6187_v7 = vpop.f32.mrb[28].mxu0 }
 0x143   : > { %v6190_v10 = vpop.f32.mrb[29].mxu0  ;;  %v880_v11 = vadd.f32 %v879_v5, %v878_v57  ;;  %v871_v43 = vadd.f32 %v870_v61, %v869_v51  ;;  %v986_v16 = vrot.slane %v985_v2, 2  ;;  %v994_v19 = vadd.f32 %v993_v9, %v992_v6 }
 0x144   : > { %v881_v21 = vsel %vm810_vm1, %v6190_v10, 0.0  ;;  %v6194_v26 = vpop.f32.mrb[30].mxu0  ;;  %v923_v32 = vmul.f32 %v6190_v10, %v6190_v10  ;;  %v925_v40 = vmul.f32 %v6187_v7, %v6187_v7 }
 0x145   : > { %v882_v30 = vadd.f32 %v881_v21, %v880_v11  ;;  %v6199_v34 = vpop.f32.mrb[31].mxu0  ;;  %v872_v35 = vrot.slane %v871_v43, 1  ;;  %v987_v37 = vadd.f32 %v986_v16, %v985_v2  ;;  %v996_v39 = vadd.f32 %v995_v27, %v994_v19 }
 0x146   : > { %v997_v46 = vsel %vm810_vm1, %v923_v32, 0.0  ;;  %v883_v47 = vsel %vm810_vm1, %v6199_v34, 0.0  ;;  %v924_v51 = vmul.f32 %v6199_v34, %v6199_v34  ;;  %v926_v56 = vmul.f32 %v6194_v26, %v6194_v26 }
 0x147   : > { %v873_v52 = vadd.f32 %v872_v35, %v871_v43  ;;  %v988_v53 = vrot.slane %v987_v37, 1  ;;  %v998_v54 = vadd.f32 %v997_v46, %v996_v39  ;;  %v884_v57 = vadd.f32 %v883_v47, %v882_v30 }
 0x148   : > { %v999_v60 = vsel %vm810_vm1, %v924_v51, 0.0  ;;  %v885_v2 = vsel %vm810_vm1, %v6187_v7, 0.0  ;;  %v1001_v9 = vsel %vm810_vm1, %v925_v40, 0.0  ;;  %v887_v43 = vsel %vm810_vm1, %v6194_v26, 0.0 }
 0x149   : > { %v989_v61 = vadd.f32 %v988_v53, %v987_v37  ;;  %v1000_v5 = vadd.f32 %v999_v60, %v998_v54  ;;  %v1018_v6 = vsel %vm1017_vm4, %v873_v52, %v6156_v15  ;;  %v886_v11 = vadd.f32 %v885_v2, %v884_v57  ;;  %v5659_v60 = vld [vmem:[%s8934_s4 + $0x80] sm:$0xff]  }
 0x14a   : > { %v1003_v21 = vsel %vm810_vm1, %v926_v56, 0.0  ;;  %v8945_v2 = vmov 0   ;;  %5411 = vmatprep.subr.bf16.mxu0 %v5659_v60 }
 0x14b   : > { %v1002_v16 = vadd.f32 %v1001_v9, %v1000_v5  ;;  %v1029_v19 = vsel %vm1028_vm5, %v989_v61, %v1027_v13  ;;  %v888_v27 = vadd.f32 %v887_v43, %v886_v11  ;;  %v5660_v61 = vld [vmem:[%s8934_s4 + $0x88] sm:$0xff]   ;;  %2385 = vrot.lane.b32.xlu0 %v8945_v2, %s5785_s19  ;;  %v6233_v5 = vrot.slane %v8945_v2, 1  ;;  %3196 = vmatprep.subr.bf16.mxu1 %v8945_v2 }
 0x14d   : > { %v1004_v30 = vadd.f32 %v1003_v21, %v1002_v16  ;;  %v889_v32 = vrot.slane %v888_v27, 4 }
 0x14f   : > { %v1005_v35 = vrot.slane %v1004_v30, 4  ;;  %v890_v37 = vadd.f32 %v889_v32, %v888_v27  ;;  %2444 = vrot.lane.b32.xlu0 %v6233_v5, %s5786_s20 }
 0x151   : > { %v1006_v39 = vadd.f32 %v1005_v35, %v1004_v30  ;;  %v891_v46 = vrot.slane %v890_v37, 2  ;;  %v5787_v30 = vmov 1966171168   ;;  %v1140_v35 = vlaneseq }
 0x152   : > { %v1138_v32 = vunpack.c.l.s4 %v5787_v30 }
 0x153   : > { %v1007_v47 = vrot.slane %v1006_v39, 2  ;;  %v892_v15 = vadd.f32 %v891_v46, %v890_v37  ;;  %v5085_v46 = vld [vmem:[%s8932_s2] ss:$0 sm:$0xff] }
 0x154   : > { %v1139_v37 = vunpack.c.0.s8 %v1138_v32 }
 0x155   : > { %v1008_v51 = vadd.f32 %v1007_v47, %v1006_v39  ;;  %v893_v40 = vrot.slane %v892_v15, 1  ;;  %v1141_v39 = vshrl.u32 %v1140_v35, 7 }
 0x157   : > { %v1009_v52 = vrot.slane %v1008_v51, 1  ;;  %v894_v53 = vadd.f32 %v893_v40, %v892_v15 }
 0x159   : > { %v1010_v54 = vadd.f32 %v1009_v52, %v1008_v51  ;;  %v1020_v13 = vsel %vm1019_vm6, %v894_v53, %v1018_v6  ;;  %v6242_v51 = vsub.s32 %v1139_v37, %v1141_v39  ;;  %v5086_v53 = vld [vmem:[%s8933_s3] ss:$0 sm:$0xff] }
 0x15b   : > { %v1031_v56 = vsel %vm1030_vm7, %v1010_v54, %v1029_v19  ;;  %9028 = vst [vmem:[#allocation6_spill] sm:$0xff] %v6242_v51 }
 0x15c   : > { %v1034_v57 = vsel %vm1033_vm8, %v1020_v13, %v1031_v56  ;;  %v6248_v56 = vsub.s32 0, %v1141_v39 }
 0x15d   : > { %5409 = vmatmul.mubr.msk.f32.vlgmr.msra.gmra.mrb[32].mxu0 %vm810_vm1, %v1034_v57 }
 0x15e   : > { %5412 = vmatpush3.bf16.msra.mxu0 %v5659_v60  ;;  %9029 = vst [vmem:[#allocation7_spill] sm:$0xff] %v6248_v56 }
 0x15f   : > { %5413 = vmatprep.subr.bf16.mxu0 %v5660_v61 }
 0x162   : > { %5414 = vmatpush3.bf16.msra.mxu0 %v5660_v61 }
 0x163   : > { %5567 = vmatprep.subr.bf16.mxu0 %v8947_v58 }
 0x230   : > { %v1104_v6 = vpop.f32.mrb[32].mxu0 }
 0x231   : > { %v1109_v9 = vmul.f32 0.015625, %v1104_v6  ;;  %v5410_v11 = vpop.f32.mrb[33].mxu0 }
 0x233   : > { %v1110_v43 = vmul.f32 %v1109_v9, %v1109_v9 }
 0x235   : > { %v1112_v16 = vrot.slane %v1110_v43, 4 }
 0x237   : > { %v1114_v19 = vsub.f32 %v1109_v9, %v1112_v16 }
 0x239   : > { %v1115_v21 = vmax.f32 %v1114_v19, 0.0 }
 0x23b   : > { %v1116_v27 = vadd.f32 1e-05, %v1115_v21 }
 0x23d   : > { %5679 = vrsqrt.f32 %v1116_v27 }
 0x247   : > { %v5680_v47 = vpop.eup %5679 }
 0x248   : > { %v1124_v15 = vmul.f32 %v5680_v47, %v5085_v46 }
 0x24a   : > { %v1126_v40 = vrot.slane %v1124_v15, 4  ;;  %v1136_v52 = vcombine.high %v1124_v15, %v1124_v15 }
 0x24c   : > { %v1128_v54 = vmul.f32 %v1126_v40, %v1109_v9  ;;  %v1143_v13 = vrot.slane %v1136_v52, %v6242_v51 }
 0x24e   : > { %v1135_v57 = vsub.f32 %v5086_v53, %v1128_v54  ;;  %v1144_v60 = vcombine.high %v1143_v13, %v1143_v13  ;;  %v6251_v61 = vrot.slane %v1143_v13, %v6242_v51 }
 0x250   : > { %v6254_v6 = vrot.slane %v1144_v60, %v6242_v51  ;;  %v1164_v11 = vrot.slane %v6251_v61, %v6248_v56  ;;  %v1220_v43 = vrot.slane %v1135_v57, %v6242_v51 }
 0x252   : > { %v6261_v9 = vrot.slane %v6254_v6, %v6248_v56  ;;  %v1221_v16 = vcombine.high %v1220_v43, %v1220_v43  ;;  %v6264_v19 = vrot.slane %v1220_v43, %v6242_v51  ;;  %v1183_v21 = vmul.f32 %v5989_v0, %v1164_v11 }
 0x253   : > { %v1182_v27 = vmul.f32 %v1164_v11, %v5997_v4  ;;  %v1184_v30 = vmul.f32 %v5995_v3, %v1164_v11  ;;  %v1181_v35 = vmul.f32 %v1164_v11, %v5991_v1  ;;  %v1185_v37 = vmul.f32 %v1164_v11, %v6018_v20 }
 0x254   : > { %v6270_v32 = vrot.slane %v1221_v16, %v6242_v51  ;;  %v1241_v39 = vrot.slane %v6264_v19, %v6248_v56  ;;  %v1186_v46 = vmul.f32 %v1164_v11, %v6027_v28  ;;  %v1187_v47 = vmul.f32 %v6016_v18, %v1164_v11 }
 0x255   : > { %v1188_v0 = vmul.f32 %v6025_v25, %v1164_v11  ;;  %v6281_v3 = vmul.f32 %v6261_v9, %v6046_v45 }
 0x256   : > { %v1260_v4 = vadd.f32 %v1241_v39, %v1183_v21  ;;  %v1259_v1 = vadd.f32 %v1241_v39, %v1182_v27  ;;  %v1261_v20 = vadd.f32 %v1241_v39, %v1184_v30  ;;  %v6285_v15 = vrot.slane %v6270_v32, %v6248_v56 }
 0x257   : > { %v1258_v40 = vadd.f32 %v1241_v39, %v1181_v35  ;;  %v1262_v28 = vadd.f32 %v1241_v39, %v1185_v37  ;;  %v1263_v52 = vadd.f32 %v1241_v39, %v1186_v46  ;;  %v1264_v13 = vadd.f32 %v1241_v39, %v1187_v47 }
 0x258   : > { %v1292_v18 = vmax.f32 %v1260_v4, 0.0  ;;  %v1291_v53 = vmax.f32 %v1259_v1, 0.0  ;;  %v1293_v54 = vmax.f32 %v1261_v20, 0.0  ;;  %v1265_v45 = vadd.f32 %v1241_v39, %v1188_v0 }
 0x259   : > { %v1290_v25 = vmax.f32 %v1258_v40, 0.0  ;;  %v1294_v57 = vmax.f32 %v1262_v28, 0.0  ;;  %v1295_v60 = vmax.f32 %v1263_v52, 0.0  ;;  %v1296_v21 = vmax.f32 %v1264_v13, 0.0 }
 0x25a   : > { %v5217_v11 = vpack.c.bf16 %v1292_v18, %v1292_v18  ;;  %v5216_v43 = vpack.c.bf16 %v1291_v53, %v1291_v53  ;;  %v5218_v16 = vpack.c.bf16 %v1293_v54, %v1293_v54  ;;  %v1297_v2 = vmax.f32 %v1265_v45, 0.0 }
 0x25b   : > { %v5215_v27 = vpack.c.bf16 %v1290_v25, %v1290_v25  ;;  %v5219_v30 = vpack.c.bf16 %v1294_v57, %v1294_v57  ;;  %v5220_v63 = vpack.c.bf16 %v1295_v60, %v1295_v60 }
 0x25c   : > { %v1433_v35 = vshrl.u32 %v5217_v11, 16  ;;  %v1436_v37 = vshll.u32 %v5217_v11, 16  ;;  %v1426_v46 = vshrl.u32 %v5216_v43, 16  ;;  %v1429_v4 = vshll.u32 %v5216_v43, 16 }
 0x25d   : > { %v1440_v1 = vshrl.u32 %v5218_v16, 16  ;;  %v1443_v20 = vshll.u32 %v5218_v16, 16  ;;  %v1419_v47 = vshrl.u32 %v5215_v27, 16  ;;  %v1422_v40 = vshll.u32 %v5215_v27, 16 }
 0x25e   : > { %v1435_v28 = vrot.slane %v1433_v35, 7  ;;  %v1428_v52 = vrot.slane %v1426_v46, 7  ;;  %v1447_v39 = vshrl.u32 %v5219_v30, 16  ;;  %v1450_v0 = vshll.u32 %v5219_v30, 16 }
 0x25f   : > { %v1442_v53 = vrot.slane %v1440_v1, 7  ;;  %v1421_v54 = vrot.slane %v1419_v47, 7  ;;  %v1454_v13 = vshrl.u32 %v5220_v63, 16  ;;  %v1457_v25 = vshll.u32 %v5220_v63, 16 }
 0x260   : > { %v1438_v57 = vor.u32 %v1436_v37, %v1435_v28  ;;  %v1431_v45 = vor.u32 %v1429_v4, %v1428_v52  ;;  %v1449_v11 = vrot.slane %v1447_v39, 7  ;;  %v5221_v43 = vpack.c.bf16 %v1296_v21, %v1296_v21 }
 0x261   : > { %v1445_v16 = vor.u32 %v1443_v20, %v1442_v53  ;;  %v1424_v27 = vor.u32 %v1422_v40, %v1421_v54  ;;  %v1456_v30 = vrot.slane %v1454_v13, 7  ;;  %v5222_v35 = vpack.c.bf16 %v1297_v2, %v1297_v2 }
 0x262   : > { %v1679_v46 = vsel %vm6289_vm14, 0, %v1438_v57  ;;  %v1678_v63 = vsel %vm6289_vm14, 0, %v1431_v45  ;;  %v1452_v37 = vor.u32 %v1450_v0, %v1449_v11  ;;  %v1461_v1 = vshrl.u32 %v5221_v43, 16 }
 0x263   : > { %v6305_v47 = vsel %vm6295_vm15, %v1679_v46, 0  ;;  %v6309_v4 = vsel %vm6295_vm15, %v1678_v63, 0  ;;  %v1680_v21 = vsel %vm6289_vm14, 0, %v1445_v16  ;;  %v1677_v2 = vsel %vm6289_vm14, 0, %v1424_v27 }
 0x264   : > { %2373 = vrot.lane.b32.xlu0 %v6305_v47, %s5785_s19  ;;  %2371 = vrot.lane.b32.xlu1 %v6309_v4, %s5785_s19  ;;  %v8949_v20 = vrot.slane %v6309_v4, 1  ;;  %v2099_v40 = vrot.slane %v6305_v47, 1  ;;  %v6323_v28 = vsel %vm6295_vm15, %v1680_v21, 0  ;;  %v6327_v52 = vsel %vm6295_vm15, %v1677_v2, 0 }
 0x265   : > { %v2101_v39 = vrot.slane %v6323_v28, 1  ;;  %v1681_v0 = vsel %vm6289_vm14, 0, %v1452_v37  ;;  %v1459_v53 = vor.u32 %v1457_v25, %v1456_v30  ;;  %v1463_v54 = vrot.slane %v1461_v1, 7 }
 0x266   : > { %v6335_v13 = vsel %vm2093_vm13, %v8949_v20, %v2099_v40  ;;  %v6339_v57 = vsel %vm6295_vm15, %v1681_v0, 0  ;;  %v1464_v45 = vshll.u32 %v5221_v43, 16  ;;  %v1468_v11 = vshrl.u32 %v5222_v35, 16 }
 0x267   : > { %9034 = vst [vmem:[#allocation8_spill] sm:$0xff] %v6339_v57  ;;  %5415 = vmatprep.mubr.msk.bf16.mxu0 %vm810_vm1, %v6335_v13  ;;  %v6344_v16 = vsel %vm2093_vm13, %v2099_v40, %v2101_v39  ;;  %v2103_v25 = vrot.slane %v6339_v57, 1  ;;  %v1682_v27 = vsel %vm6289_vm14, 0, %v1459_v53  ;;  %v1471_v30 = vshll.u32 %v5222_v35, 16 }
 0x268   : > { %2375 = vrot.lane.b32.xlu0 %v6323_v28, %s5785_s19  ;;  %5416 = vmatmul.mubr.msk.bf16.vlgmr.msra.gmra.mrb[36].mxu0 %vm810_vm1, %v6344_v16  ;;  %v6355_v43 = vsel %vm6295_vm15, %v1682_v27, 0  ;;  %v1466_v46 = vor.u32 %v1464_v45, %v1463_v54  ;;  %v1470_v63 = vrot.slane %v1468_v11, 7  ;;  %v1266_v37 = vadd.f32 %v6285_v15, %v6281_v3 }
 0x269   : > { %9035 = vst [vmem:[#allocation9_spill] sm:$0xff] %v6355_v43  ;;  %2223 = vrot.lane.b32.xlu1 %v6327_v52, %s5786_s20  ;;  %v6362_v35 = vsel %vm2093_vm13, %v2101_v39, %v2103_v25  ;;  %v2105_v1 = vrot.slane %v6355_v43, 1  ;;  %v1190_v21 = vmul.f32 %v6261_v9, %v6053_v50  ;;  %v1191_v2 = vmul.f32 %v6044_v42, %v6261_v9 }
 0x26a   : > { %5569 = vmatpush3.bf16.msra.mxu0 %v5974_v59  ;;  %5419 = vmatprep.mubr.msk.bf16.mxu0 %vm810_vm1, %v6362_v35  ;;  %v1683_v3 = vsel %vm6289_vm14, 0, %v1466_v46  ;;  %v1473_v40 = vor.u32 %v1471_v30, %v1470_v63  ;;  %v1298_v0 = vmax.f32 %v1266_v37, 0.0  ;;  %v1192_v39 = vmul.f32 %v6051_v48, %v6261_v9 }
 0x26b   : > { %5570 = vmatprep.subr.bf16.mxu0 %v8947_v58  ;;  %v6379_v50 = vsel %vm6295_vm15, %v1683_v3, 0  ;;  %v1267_v42 = vadd.f32 %v6285_v15, %v1190_v21  ;;  %v1268_v59 = vadd.f32 %v6285_v15, %v1191_v2  ;;  %v1193_v46 = vmul.f32 %v6261_v9, %v6074_v12 }
 0x26c   : > { %9036 = vst [vmem:[#allocation10_spill] sm:$0xff] %v6379_v50  ;;  %2377 = vrot.lane.b32.xlu0 %v6339_v57, %s5785_s19  ;;  %v2107_v53 = vrot.slane %v6379_v50, 1  ;;  %v1684_v54 = vsel %vm6289_vm14, 0, %v1473_v40  ;;  %v5223_v45 = vpack.c.bf16 %v1298_v0, %v1298_v0  ;;  %v1269_v48 = vadd.f32 %v6285_v15, %v1192_v39 }
 0x26d   : > { %2225 = vrot.lane.b32.xlu1 %v6309_v4, %s5786_s20  ;;  %v6393_v11 = vsel %vm6295_vm15, %v1684_v54, 0  ;;  %v1299_v27 = vmax.f32 %v1267_v42, 0.0  ;;  %v1300_v30 = vmax.f32 %v1268_v59, 0.0  ;;  %v1159_v63 = vcombine.high %v6251_v61, %v6251_v61 }
 0x26e   : > { %9037 = vst [vmem:[#allocation11_spill] sm:$0xff] %v6393_v11  ;;  %5572 = vmatpush3.bf16.msra.mxu0 %v5984_v62  ;;  %v6401_v37 = vsel %vm2093_vm13, %v2103_v25, %v2105_v1  ;;  %v6404_v21 = vsel %vm2093_vm13, %v2105_v1, %v2107_v53  ;;  %v1475_v2 = vshrl.u32 %v5223_v45, 16  ;;  %v1301_v0 = vmax.f32 %v1269_v48, 0.0 }
 0x26f   : > { %v5224_v3 = vpack.c.bf16 %v1299_v27, %v1299_v27  ;;  %v5225_v40 = vpack.c.bf16 %v1300_v30, %v1300_v30  ;;  %v1270_v39 = vadd.f32 %v6285_v15, %v1193_v46  ;;  %v2109_v62 = vrot.slane %v6393_v11, 1 }
 0x270   : > { %2379 = vrot.lane.b32.xlu0 %v6355_v43, %s5785_s19  ;;  %5420 = vmatmul.mubr.msk.bf16.gmra.mrb[40].mxu0 %vm810_vm1, %v6401_v37  ;;  %v1477_v12 = vrot.slane %v1475_v2, 7  ;;  %v1478_v61 = vshll.u32 %v5223_v45, 16  ;;  %v1194_v25 = vmul.f32 %v6261_v9, %v6083_v22  ;;  %v1236_v1 = vcombine.high %v6264_v19, %v6264_v19 }
 0x271   : > { %2227 = vrot.lane.b32.xlu1 %v6305_v47, %s5786_s20  ;;  %5423 = vmatprep.mubr.msk.bf16.mxu0 %vm810_vm1, %v6404_v21  ;;  %v1482_v42 = vshrl.u32 %v5224_v3, 16  ;;  %v1485_v59 = vshll.u32 %v5224_v3, 16  ;;  %v1489_v54 = vshrl.u32 %v5225_v40, 16  ;;  %v5226_v27 = vpack.c.bf16 %v1301_v0, %v1301_v0 }
 0x272   : > { %v1480_v48 = vor.u32 %v1478_v61, %v1477_v12  ;;  %v1302_v30 = vmax.f32 %v1270_v39, 0.0  ;;  %v1271_v45 = vadd.f32 %v6285_v15, %v1194_v25  ;;  %v1492_v22 = vshll.u32 %v5225_v40, 16 }
 0x273   : > { %v1484_v46 = vrot.slane %v1482_v42, 7  ;;  %v1491_v2 = vrot.slane %v1489_v54, 7  ;;  %v1195_v19 = vmul.f32 %v6070_v8, %v6261_v9  ;;  %v6426_v58 = vsel %vm2093_vm13, %v2107_v53, %v2109_v62 }
 0x274   : > { %2381 = vrot.lane.b32.xlu0 %v6379_v50, %s5785_s19  ;;  %v6430_v3 = vsel %vm2093_vm13, %v2109_v62, %v6233_v5  ;;  %v1496_v0 = vshrl.u32 %v5226_v27, 16  ;;  %v5227_v39 = vpack.c.bf16 %v1302_v30, %v1302_v30  ;;  %v1685_v40 = vsel %vm6289_vm14, 0, %v1480_v48 }
 0x275   : > { %2229 = vrot.lane.b32.xlu1 %v6323_v28, %s5786_s20  ;;  %v1487_v12 = vor.u32 %v1485_v59, %v1484_v46  ;;  %v1494_v8 = vor.u32 %v1492_v22, %v1491_v2  ;;  %v1303_v61 = vmax.f32 %v1271_v45, 0.0  ;;  %v1499_v42 = vshll.u32 %v5226_v27, 16 }
 0x276   : > { %v1498_v25 = vrot.slane %v1496_v0, 7  ;;  %v1503_v54 = vshrl.u32 %v5227_v39, 16  ;;  %v1506_v53 = vshll.u32 %v5227_v39, 16  ;;  %v1272_v51 = vadd.f32 %v6285_v15, %v1195_v19 }
 0x277   : > { %v1686_v20 = vsel %vm6289_vm14, 0, %v1487_v12  ;;  %v1687_v62 = vsel %vm6289_vm14, 0, %v1494_v8  ;;  %v5228_v30 = vpack.c.bf16 %v1303_v61, %v1303_v61  ;;  %v6454_v46 = vrot.slane %v1159_v63, %v6248_v56 }
 0x278   : > { %2383 = vrot.lane.b32.xlu0 %v6393_v11, %s5785_s19  ;;  %5424 = vmatmul.mubr.msk.bf16.gmra.mrb[44].mxu0 %vm810_vm1, %v6426_v58  ;;  %v6447_v59 = vsel %vm6295_vm15, %v1686_v20, 0  ;;  %v6451_v48 = vsel %vm6295_vm15, %v1687_v62, 0  ;;  %v1501_v27 = vor.u32 %v1499_v42, %v1498_v25  ;;  %v1505_v45 = vrot.slane %v1503_v54, 7 }
 0x279   : > { %9038 = vst [vmem:[#allocation12_spill] sm:$0xff] %v6447_v59  ;;  %9039 = vst [vmem:[#allocation13_spill] sm:$0xff] %v6451_v48  ;;  %2231 = vrot.lane.b32.xlu1 %v6339_v57, %s5786_s20  ;;  %5427 = vmatprep.mubr.msk.bf16.mxu0 %vm810_vm1, %v6430_v3  ;;  %v8952_v2 = vrot.slane %v6447_v59, 1  ;;  %v1510_v22 = vshrl.u32 %v5228_v30, 16  ;;  %v2115_v20 = vrot.slane %v6451_v48, 1  ;;  %v1304_v0 = vmax.f32 %v1272_v51, 0.0 }
 0x27a   : > { %v1508_v19 = vor.u32 %v1506_v53, %v1505_v45  ;;  %v1196_v39 = vmul.f32 %v6081_v17, %v6261_v9  ;;  %v6465_v12 = vrot.slane %v1236_v1, %v6248_v56  ;;  %v6469_v63 = vsel %vm6295_vm15, %v1685_v40, 0 }
 0x27b   : > { %9040 = vst [vmem:[#allocation14_spill] sm:$0xff] %v6469_v63  ;;  %v1688_v8 = vsel %vm6289_vm14, 0, %v1501_v27  ;;  %v5229_v61 = vpack.c.bf16 %v1304_v0, %v1304_v0  ;;  %v1512_v51 = vrot.slane %v1510_v22, 7  ;;  %v1198_v9 = vmul.f32 %v6454_v46, %v6111_v55 }
 0x27c   : > { %2239 = vrot.lane.b32.xlu0 %v6469_v63, %s5786_s20  ;;  %v1273_v25 = vadd.f32 %v6285_v15, %v1196_v39  ;;  %v1689_v17 = vsel %vm6289_vm14, 0, %v1508_v19  ;;  %v1199_v1 = vmul.f32 %v6097_v38, %v6454_v46  ;;  %v6487_v40 = vsel %vm2093_vm13, %v8952_v2, %v2115_v20 }
 0x27d   : > { %2233 = vrot.lane.b32.xlu1 %v6355_v43, %s5786_s20  ;;  %v1513_v42 = vshll.u32 %v5228_v30, 16  ;;  %v1517_v15 = vshrl.u32 %v5229_v61, 16  ;;  %v6491_v54 = vsel %vm6295_vm15, %v1688_v8, 0  ;;  %v1275_v62 = vadd.f32 %v6465_v12, %v1198_v9 }
 0x27e   : > { %9041 = vst [vmem:[#allocation15_spill] sm:$0xff] %v6491_v54  ;;  %v1305_v53 = vmax.f32 %v1273_v25, 0.0  ;;  %v1276_v27 = vadd.f32 %v6465_v12, %v1199_v1  ;;  %v6501_v38 = vsel %vm6295_vm15, %v1689_v17, 0  ;;  %v1520_v30 = vshll.u32 %v5229_v61, 16 }
 0x27f   : > { %9042 = vst [vmem:[#allocation16_spill] sm:$0xff] %v6501_v38  ;;  %v1519_v55 = vrot.slane %v1517_v15, 7  ;;  %v1200_v45 = vmul.f32 %v6106_v49, %v6454_v46  ;;  %v1515_v22 = vor.u32 %v1513_v42, %v1512_v51  ;;  %v1307_v0 = vmax.f32 %v1275_v62, 0.0 }
 0x280   : > { %5428 = vmatmul.mubr.msk.bf16.gmra.mrb[48].mxu0 %vm810_vm1, %v6233_v5  ;;  %2241 = vrot.lane.b32.xlu0 %v6447_v59, %s5786_s20  ;;  %v5230_v19 = vpack.c.bf16 %v1305_v53, %v1305_v53  ;;  %v1308_v39 = vmax.f32 %v1276_v27, 0.0  ;;  %v1201_v17 = vmul.f32 %v6454_v46, %v6131_v31  ;;  %v1202_v61 = vmul.f32 %v6454_v46, %v6139_v44  ;;  %v5661_v44 = vld [vmem:[%s8934_s4] sm:$0xff]  }
 0x281   : > { %2235 = vrot.lane.b32.xlu1 %v6379_v50, %s5786_s20  ;;  %5431 = vmatprep.mubr.msk.bf16.mxu0 %vm810_vm1, %v6487_v40  ;;  %v1522_v8 = vor.u32 %v1520_v30, %v1519_v55  ;;  %v1277_v25 = vadd.f32 %v6465_v12, %v1200_v45  ;;  %v2117_v49 = vrot.slane %v6491_v54, 1  ;;  %v2119_v51 = vrot.slane %v6501_v38, 1 }
 0x282   : > { %v1524_v9 = vshrl.u32 %v5230_v19, 16  ;;  %v1278_v1 = vadd.f32 %v6465_v12, %v1201_v17  ;;  %v1690_v42 = vsel %vm6289_vm14, 0, %v1515_v22  ;;  %v5232_v15 = vpack.c.bf16 %v1307_v0, %v1307_v0  ;;  %3197 = vmatpush1.bf16.msra.mxu1 %v5661_v44 }
 0x283   : > { %v1691_v53 = vsel %vm6289_vm14, 0, %v1522_v8  ;;  %v5233_v62 = vpack.c.bf16 %v1308_v39, %v1308_v39  ;;  %v6529_v27 = vsel %vm2093_vm13, %v2115_v20, %v2117_v49  ;;  %v1527_v55 = vshll.u32 %v5230_v19, 16  ;;  %v5662_v8 = vld [vmem:[%s8934_s4 + $0x8] sm:$0xff]  }
 0x284   : > { %2243 = vrot.lane.b32.xlu0 %v6451_v48, %s5786_s20  ;;  %v1526_v31 = vrot.slane %v1524_v9, 7  ;;  %v6532_v30 = vadd.f32 %v6465_v12, %v1202_v61  ;;  %v6539_v45 = vsel %vm2093_vm13, %v2117_v49, %v2119_v51  ;;  %v6543_v22 = vsel %vm6295_vm15, %v1690_v42, 0 }
 0x285   : > { %2237 = vrot.lane.b32.xlu1 %v6393_v11, %s5786_s20  ;;  %9043 = vst [vmem:[#allocation17_spill] sm:$0xff] %v6543_v22  ;;  %v1309_v20 = vmax.f32 %v1277_v25, 0.0  ;;  %v6551_v19 = vsel %vm6295_vm15, %v1691_v53, 0  ;;  %v1538_v39 = vshrl.u32 %v5232_v15, 16  ;;  %v1160_v17 = vcombine.high %v6254_v6, %v6254_v6 }
 0x286   : > { %9044 = vst [vmem:[#allocation18_spill] sm:$0xff] %v6551_v19  ;;  %v1529_v0 = vor.u32 %v1527_v55, %v1526_v31  ;;  %v1237_v25 = vcombine.high %v6270_v32, %v6270_v32  ;;  %v1545_v61 = vshrl.u32 %v5233_v62, 16  ;;  %v1310_v49 = vmax.f32 %v1278_v1, 0.0  ;;  %v5663_v1 = vld [vmem:[%s8934_s4 + $0x10] sm:$0xff]  }
 0x287   : > { %v9045_v9 = vmov 0   ;;  %v2121_v42 = vrot.slane %v6543_v22, 1  ;;  %v2123_v31 = vrot.slane %v6551_v19, 1  ;;  %v6566_v53 = vpack.c.bf16 %v1309_v20, %v1309_v20 }
 0x288   : > { %5432 = vmatmul.mubr.msk.bf16.gmra.mrb[52].mxu0 %vm810_vm1, %v6529_v27  ;;  %2245 = vrot.lane.b32.xlu0 %v6491_v54, %s5786_s20  ;;  %v1692_v6 = vsel %vm6289_vm14, 0, %v1529_v0  ;;  %v1540_v32 = vrot.slane %v1538_v39, 7  ;;  %v6577_v55 = vrot.slane %v1160_v17, %v6248_v56  ;;  %v1547_v20 = vrot.slane %v1545_v61, 7 }
 0x289   : > { %2387 = vrot.lane.b32.xlu1 %v6447_v59, %s5785_s19  ;;  %5435 = vmatprep.mubr.msk.bf16.mxu0 %vm810_vm1, %v6539_v45  ;;  %v5235_v2 = vpack.c.bf16 %v1310_v49, %v1310_v49  ;;  %v6583_v44 = vsel %vm2093_vm13, %v2119_v51, %v2121_v42  ;;  %v9047_v0 = vrot.slane %v6327_v52, 1  ;;  %v1541_v11 = vshll.u32 %v5232_v15, 16 }
 0x28a   : > { %3198 = vmatprep.subr.bf16.mxu1 %v9045_v9  ;;  %v1203_v17 = vmul.f32 %v6126_v24, %v6454_v46  ;;  %v6599_v51 = vsel %vm2093_vm13, %v2121_v42, %v2123_v31  ;;  %v1552_v15 = vshrl.u32 %v6566_v53, 16  ;;  %v1311_v61 = vmax.f32 %v6532_v30, 0.0 }
 0x28b   : > { %3199 = vmatpush1.bf16.msra.mxu1 %v5662_v8  ;;  %v6580_v8 = vrot.slane %v1237_v25, %v6248_v56  ;;  %v6603_v25 = vsel %vm6295_vm15, %v1692_v6, 0  ;;  %v1543_v24 = vor.u32 %v1541_v11, %v1540_v32  ;;  %v1204_v42 = vmul.f32 %v6137_v36, %v6454_v46 }
 0x28c   : > { %2247 = vrot.lane.b32.xlu0 %v6501_v38, %s5786_s20  ;;  %3200 = vmatprep.subr.bf16.mxu1 %v9045_v9  ;;  %v1280_v49 = vadd.f32 %v6465_v12, %v1203_v17  ;;  %v2125_v11 = vrot.slane %v6603_v25, 1  ;;  %v1207_v17 = vmul.f32 %v6153_v14, %v6577_v55  ;;  %v5236_v14 = vpack.c.bf16 %v1311_v61, %v1311_v61 }
 0x28d   : > { %2389 = vrot.lane.b32.xlu1 %v6451_v48, %s5785_s19  ;;  %v9046_v48 = vrot.slane %v6309_v4, 1  ;;  %v1281_v30 = vadd.f32 %v6465_v12, %v1204_v42  ;;  %v5665_v42 = vld [vmem:[%s8934_s4 + $0x20] sm:$0xff]  }
 0x28e   : > { %v1312_v32 = vmax.f32 %v1280_v49, 0.0  ;;  %v6637_v49 = vadd.f32 %v6580_v8, %v1207_v17 }
 0x28f   : > { %v6590_v39 = vsel %vm2093_vm13, %v9047_v0, %v9046_v48  ;;  %3201 = vmatpush1.bf16.msra.mxu1 %v5663_v1  ;;  %v1548_v48 = vshll.u32 %v5233_v62, 16  ;;  %v5664_v62 = vld [vmem:[%s8934_s4 + $0x18] sm:$0xff]   ;;  %v1559_v1 = vshrl.u32 %v5235_v2, 16  ;;  %v1206_v0 = vmul.f32 %v6577_v55, %v6168_v33 }
 0x290   : > { %5436 = vmatmul.mubr.msk.bf16.gmra.mrb[56].mxu0 %vm810_vm1, %v6583_v44  ;;  %2307 = vrot.lane.b32.xlu0 %v6590_v39, %s5788_s16  ;;  %v1208_v33 = vmul.f32 %v6163_v29, %v6577_v55 }
 0x291   : > { %2391 = vrot.lane.b32.xlu1 %v6491_v54, %s5785_s19  ;;  %5439 = vmatprep.mubr.msk.bf16.mxu0 %vm810_vm1, %v6599_v51  ;;  %v1550_v6 = vor.u32 %v1548_v48, %v1547_v20  ;;  %v6627_v36 = vadd.f32 %v6580_v8, %v1206_v0  ;;  %v1694_v20 = vsel %vm6289_vm14, 0, %v1543_v24  ;;  %v1554_v48 = vrot.slane %v1552_v15, 7 }
 0x292   : > { %3202 = vmatprep.subr.bf16.mxu1 %v9045_v9  ;;  %v5237_v0 = vpack.c.bf16 %v1312_v32, %v1312_v32  ;;  %v6645_v56 = vadd.f32 %v6580_v8, %v1208_v33  ;;  %v1555_v15 = vshll.u32 %v6566_v53, 16  ;;  %v6657_v24 = vsel %vm2093_vm13, %v2125_v11, %v6233_v5 }
 0x293   : > { %3203 = vmatpush1.bf16.msra.mxu1 %v5664_v62  ;;  %v1695_v29 = vsel %vm6289_vm14, 0, %v1550_v6  ;;  %v1561_v62 = vrot.slane %v1559_v1, 7  ;;  %v6661_v61 = vsel %vm6295_vm15, %v1694_v20, 0  ;;  %v1562_v6 = vshll.u32 %v5235_v2, 16  ;;  %v5666_v2 = vld [vmem:[%s8934_s4 + $0x28] sm:$0xff]  }
 0x294   : > { %2309 = vrot.lane.b32.xlu0 %v6335_v13, %s5788_s16  ;;  %3204 = vmatprep.subr.bf16.mxu1 %v9045_v9  ;;  %v6671_v53 = vsel %vm6295_vm15, %v1695_v29, 0  ;;  %v1557_v1 = vor.u32 %v1555_v15, %v1554_v48  ;;  %v1313_v32 = vmax.f32 %v1281_v30, 0.0  ;;  %v1573_v33 = vshrl.u32 %v5237_v0, 16 }
 0x295   : > { %2393 = vrot.lane.b32.xlu1 %v6501_v38, %s5785_s19  ;;  %v6648_v38 = vsel %vm2093_vm13, %v2123_v31, %v2125_v11  ;;  %v1209_v31 = vmul.f32 %v6577_v55, %v6190_v10  ;;  %v1566_v11 = vshrl.u32 %v5236_v14, 16  ;;  %v1564_v17 = vor.u32 %v1562_v6, %v1561_v62  ;;  %v5667_v62 = vld [vmem:[%s8934_s4 + $0x30] sm:$0xff]  }
 0x296   : > { %v2131_v48 = vrot.slane %v6671_v53, 1  ;;  %v1696_v30 = vsel %vm6289_vm14, 0, %v1557_v1  ;;  %v5238_v29 = vpack.c.bf16 %v1313_v32, %v1313_v32  ;;  %v1575_v6 = vrot.slane %v1573_v33, 7 }
 0x297   : > { %3205 = vmatpush1.bf16.msra.mxu1 %v5665_v42  ;;  %v6677_v10 = vadd.f32 %v6580_v8, %v1209_v31  ;;  %v1568_v42 = vrot.slane %v1566_v11, 7  ;;  %v1697_v15 = vsel %vm6289_vm14, 0, %v1564_v17  ;;  %v1569_v31 = vshll.u32 %v5236_v14, 16 }
 0x298   : > { %5440 = vmatmul.mubr.msk.bf16.gmra.mrb[60].mxu0 %vm810_vm1, %v6648_v38  ;;  %2311 = vrot.lane.b32.xlu0 %v6344_v16, %s5788_s16  ;;  %v9049_v1 = vrot.slane %v6661_v61, 1  ;;  %v6709_v14 = vsel %vm6295_vm15, %v1696_v30, 0  ;;  %v1576_v32 = vshll.u32 %v5237_v0, 16  ;;  %v6716_v17 = vsel %vm6295_vm15, %v1697_v15, 0 }
 0x299   : > { %2395 = vrot.lane.b32.xlu1 %v6543_v22, %s5785_s19  ;;  %5443 = vmatprep.mubr.msk.bf16.mxu0 %vm810_vm1, %v6657_v24  ;;  %9050 = vst [vmem:[#allocation19_spill] sm:$0xff] %v6716_v17  ;;  %v1571_v33 = vor.u32 %v1569_v31, %v1568_v42  ;;  %v1315_v30 = vmax.f32 %v6627_v36, 0.0  ;;  %v1316_v0 = vmax.f32 %v6637_v49, 0.0  ;;  %v2135_v42 = vrot.slane %v6716_v17, 1 }
 0x29a   : > { %3206 = vmatprep.subr.bf16.mxu1 %v9045_v9  ;;  %v6705_v11 = vsel %vm2093_vm13, %v9049_v1, %v2131_v48  ;;  %v1578_v1 = vor.u32 %v1576_v32, %v1575_v6  ;;  %v1210_v49 = vmul.f32 %v6577_v55, %v6199_v34  ;;  %v5669_v6 = vld [vmem:[%s8934_s4 + $0x40] sm:$0xff]  }
 0x29b   : > { %3207 = vmatpush1.bf16.msra.mxu1 %v5666_v2  ;;  %v9048_v2 = vrot.slane %v6327_v52, 1  ;;  %v1698_v36 = vsel %vm6289_vm14, 0, %v1571_v33  ;;  %v5240_v32 = vpack.c.bf16 %v1315_v30, %v1315_v30  ;;  %v1211_v33 = vmul.f32 %v6187_v7, %v6577_v55  ;;  %v5670_v30 = vld [vmem:[%s8934_s4 + $0x48] sm:$0xff]  }
 0x29c   : > { %2313 = vrot.lane.b32.xlu0 %v6362_v35, %s5788_s16  ;;  %3208 = vmatprep.subr.bf16.mxu1 %v9045_v9  ;;  %v1699_v31 = vsel %vm6289_vm14, 0, %v1578_v1  ;;  %v6744_v54 = vadd.f32 %v6580_v8, %v1210_v49  ;;  %v1212_v49 = vmul.f32 %v6194_v26, %v6577_v55  ;;  %v5671_v26 = vld [vmem:[%s8934_s4 + $0x50] sm:$0xff]  }
 0x29d   : > { %2397 = vrot.lane.b32.xlu1 %v6551_v19, %s5785_s19  ;;  %v2096_v20 = vsel %vm2093_vm13, %v6233_v5, %v9048_v2  ;;  %v5668_v2 = vld [vmem:[%s8934_s4 + $0x38] sm:$0xff]   ;;  %v6766_v7 = vsel %vm6295_vm15, %v1699_v31, 0  ;;  %v1288_v1 = vadd.f32 %v6580_v8, %v1211_v33 }
 0x29e   : > { %9051 = vst [vmem:[#allocation20_spill] sm:$0xff] %v6766_v7  ;;  %v6787_v31 = vadd.f32 %v6580_v8, %v1212_v49 }
 0x29f   : > { %3209 = vmatpush1.bf16.msra.mxu1 %v5667_v62  ;;  %v1580_v62 = vshrl.u32 %v5238_v29, 16 }
 0x2a0   : > { %5444 = vmatmul.mubr.msk.bf16.gmra.mrb[64].mxu0 %vm810_vm1, %v6233_v5  ;;  %2315 = vrot.lane.b32.xlu0 %v6401_v37, %s5788_s16 }
 0x2a1   : > { %2159 = vrot.lane.b32.xlu1 %v2096_v20, %s5785_s19  ;;  %5447 = vmatprep.mubr.msk.bf16.mxu0 %vm810_vm1, %v6705_v11  ;;  %v2133_v20 = vrot.slane %v6709_v14, 1  ;;  %v1582_v15 = vrot.slane %v1580_v62, 7 }
 0x2a2   : > { %3210 = vmatprep.subr.bf16.mxu1 %v9045_v9 }
 0x2a3   : > { %3211 = vmatpush1.bf16.msra.mxu1 %v5668_v2  ;;  %v5241_v2 = vpack.c.bf16 %v1316_v0, %v1316_v0  ;;  %v6741_v17 = vsel %vm2093_vm13, %v2131_v48, %v2133_v20  ;;  %v6753_v34 = vsel %vm2093_vm13, %v2133_v20, %v2135_v42  ;;  %v6757_v48 = vsel %vm6295_vm15, %v1698_v36, 0 }
 0x2a4   : > { %2317 = vrot.lane.b32.xlu0 %v6404_v21, %s5788_s16  ;;  %3212 = vmatprep.subr.bf16.mxu1 %v9045_v9  ;;  %v1594_v0 = vshrl.u32 %v5240_v32, 16  ;;  %v2111_v36 = vrot.slane %v6469_v63, 1 }
 0x2a5   : > { %2161 = vrot.lane.b32.xlu1 %v6590_v39, %s5785_s19  ;;  %v1583_v39 = vshll.u32 %v5238_v29, 16  ;;  %v1317_v29 = vmax.f32 %v6645_v56, 0.0  ;;  %v1601_v20 = vshrl.u32 %v5241_v2, 16  ;;  %v1318_v56 = vmax.f32 %v6677_v10, 0.0 }
 0x2a7   : > { %3213 = vmatpush1.bf16.msra.mxu1 %v5669_v6  ;;  %v1585_v62 = vor.u32 %v1583_v39, %v1582_v15  ;;  %v2139_v15 = vrot.slane %v6766_v7, 1  ;;  %v5242_v6 = vpack.c.bf16 %v1317_v29, %v1317_v29  ;;  %v1596_v39 = vrot.slane %v1594_v0, 7 }
 0x2a8   : > { %5448 = vmatmul.mubr.msk.bf16.gmra.mrb[68].mxu0 %vm810_vm1, %v6741_v17  ;;  %2319 = vrot.lane.b32.xlu0 %v6426_v58, %s5788_s16  ;;  %v5243_v33 = vpack.c.bf16 %v1318_v56, %v1318_v56  ;;  %v1597_v7 = vshll.u32 %v5240_v32, 16  ;;  %v1319_v32 = vmax.f32 %v6744_v54, 0.0  ;;  %v1197_v56 = vmul.f32 %v6454_v46, %v6101_v41 }
 0x2a9   : > { %2163 = vrot.lane.b32.xlu1 %v6335_v13, %s5785_s19  ;;  %5451 = vmatprep.mubr.msk.bf16.mxu0 %vm810_vm1, %v6753_v34  ;;  %v2137_v13 = vrot.slane %v6757_v48, 1  ;;  %v1700_v10 = vsel %vm6289_vm14, 0, %v1585_v62  ;;  %v1611_v46 = vshll.u32 %v5242_v6, 16 }
 0x2aa   : > { %3214 = vmatprep.subr.bf16.mxu1 %v9045_v9  ;;  %v6806_v0 = vsel %vm6295_vm15, %v1700_v10, 0  ;;  %v1599_v49 = vor.u32 %v1597_v7, %v1596_v39  ;;  %v6824_v41 = vadd.f32 %v6465_v12, %v1197_v56  ;;  %v5244_v7 = vpack.c.bf16 %v1319_v32, %v1319_v32 }
 0x2ab   : > { %3215 = vmatpush1.bf16.msra.mxu1 %v5670_v30  ;;  %v6793_v29 = vsel %vm2093_vm13, %v2135_v42, %v2137_v13  ;;  %v9052_v30 = vrot.slane %v6447_v59, 1  ;;  %v6802_v62 = vsel %vm2093_vm13, %v2137_v13, %v2139_v15  ;;  %v1604_v42 = vshll.u32 %v5241_v2, 16  ;;  %v5672_v13 = vld [vmem:[%s8934_s4 + $0x58] sm:$0xff]  }
 0x2ac   : > { %2321 = vrot.lane.b32.xlu0 %v6430_v3, %s5788_s16  ;;  %3216 = vmatprep.subr.bf16.mxu1 %v9045_v9  ;;  %v1603_v3 = vrot.slane %v1601_v20, 7  ;;  %v1608_v20 = vshrl.u32 %v5242_v6, 16  ;;  %v1320_v2 = vmax.f32 %v1288_v1, 0.0  ;;  %v5673_v1 = vld [vmem:[%s8934_s4 + $0x60] sm:$0xff]   ;;  %v1321_v56 = vmax.f32 %v6787_v31, 0.0 }
 0x2ad   : > { %2165 = vrot.lane.b32.xlu1 %v6344_v16, %s5785_s19  ;;  %v2114_v16 = vsel %vm2093_vm13, %v2111_v36, %v9052_v30  ;;  %v2141_v30 = vrot.slane %v6806_v0, 1 }
 0x2ae   : > { %v1606_v10 = vor.u32 %v1604_v42, %v1603_v3  ;;  %v1610_v54 = vrot.slane %v1608_v20, 7  ;;  %v5245_v12 = vpack.c.bf16 %v1320_v2, %v1320_v2  ;;  %v1618_v20 = vshll.u32 %v5243_v33, 16 }
 0x2af   : > { %3217 = vmatpush1.bf16.msra.mxu1 %v5671_v26  ;;  %v1615_v26 = vshrl.u32 %v5243_v33, 16  ;;  %v6837_v42 = vsel %vm2093_vm13, %v2139_v15, %v2141_v30  ;;  %v5674_v33 = vld [vmem:[%s8934_s4 + $0x68] sm:$0xff]   ;;  %v5246_v2 = vpack.c.bf16 %v1321_v56, %v1321_v56 }
 0x2b0   : > { %5452 = vmatmul.mubr.msk.bf16.gmra.mrb[72].mxu0 %vm810_vm1, %v6793_v29  ;;  %2323 = vrot.lane.b32.xlu0 %v2114_v16, %s5788_s16  ;;  %v1703_v39 = vsel %vm6289_vm14, 0, %v1606_v10  ;;  %v1613_v6 = vor.u32 %v1611_v46, %v1610_v54  ;;  %v1814_v46 = vshll.u32 %v6469_v63, 16 }
 0x2b1   : > { %2167 = vrot.lane.b32.xlu1 %v6362_v35, %s5785_s19  ;;  %5455 = vmatprep.mubr.msk.bf16.mxu0 %vm810_vm1, %v6802_v62  ;;  %v2112_v35 = vsel %vm2093_vm13, %v6233_v5, %v2111_v36  ;;  %v1702_v36 = vsel %vm6289_vm14, 0, %v1599_v49  ;;  %v1617_v3 = vrot.slane %v1615_v26, 7  ;;  %v6856_v32 = vsel %vm6295_vm15, %v1703_v39, 0 }
 0x2b2   : > { %3218 = vmatprep.subr.bf16.mxu1 %v9045_v9  ;;  %v6852_v15 = vsel %vm6295_vm15, %v1702_v36, 0  ;;  %9054 = vst [vmem:[#allocation22_spill] sm:$0xff] %v6856_v32  ;;  %v2147_v10 = vrot.slane %v6856_v32, 1  ;;  %v1704_v31 = vsel %vm6289_vm14, 0, %v1613_v6  ;;  %v1753_v39 = vshll.u32 %v6327_v52, 16 }
 0x2b3   : > { %3219 = vmatpush1.bf16.msra.mxu1 %v5672_v13  ;;  %9053 = vst [vmem:[#allocation21_spill] sm:$0xff] %v6852_v15  ;;  %v1620_v13 = vor.u32 %v1618_v20, %v1617_v3  ;;  %v8967_v49 = vrot.slane %v6852_v15, 1  ;;  %v6889_v36 = vsel %vm6295_vm15, %v1704_v31, 0  ;;  %v1632_v3 = vshll.u32 %v5245_v12, 16 }
 0x2b4   : > { %2175 = vrot.lane.b32.xlu0 %v2112_v35, %s5785_s19  ;;  %3220 = vmatprep.subr.bf16.mxu1 %v9045_v9  ;;  %v5675_v35 = vld [vmem:[%s8934_s4 + $0x70] sm:$0xff]   ;;  %9056 = vst [vmem:[#allocation24_spill] sm:$0xff] %v6889_v36  ;;  %v1636_v20 = vshrl.u32 %v5246_v2, 16 }
 0x2b5   : > { %2169 = vrot.lane.b32.xlu1 %v6401_v37, %s5785_s19  ;;  %v6844_v37 = vsel %vm2093_vm13, %v2141_v30, %v6233_v5  ;;  %v1705_v30 = vsel %vm6289_vm14, 0, %v1620_v13 }
 0x2b6   : > { %v1638_v31 = vrot.slane %v1636_v20, 7  ;;  %v1205_v20 = vmul.f32 %v6577_v55, %v6161_v23 }
 0x2b7   : > { %3221 = vmatpush1.bf16.msra.mxu1 %v5673_v1  ;;  %v1625_v1 = vshll.u32 %v5244_v7, 16 }
 0x2b8   : > { %5456 = vmatmul.mubr.msk.bf16.gmra.mrb[76].mxu0 %vm810_vm1, %v6837_v42  ;;  %2177 = vrot.lane.b32.xlu0 %v2114_v16, %s5785_s19  ;;  %v1622_v16 = vshrl.u32 %v5244_v7, 16  ;;  %v6898_v7 = vsel %vm6295_vm15, %v1705_v30, 0 }
 0x2b9   : > { %2171 = vrot.lane.b32.xlu1 %v6404_v21, %s5785_s19  ;;  %5459 = vmatprep.mubr.msk.bf16.mxu0 %vm810_vm1, %v6844_v37  ;;  %v1629_v21 = vshrl.u32 %v5245_v12, 16  ;;  %9057 = vst [vmem:[#allocation25_spill] sm:$0xff] %v6898_v7  ;;  %v2149_v12 = vrot.slane %v6889_v36, 1  ;;  %v2151_v13 = vrot.slane %v6898_v7, 1  ;;  %v9075_v36 = vld [vmem:[#allocation11_spill] sm:$0xff] }
 0x2ba   : > { %3222 = vmatprep.subr.bf16.mxu1 %v9045_v9  ;;  %v1624_v26 = vrot.slane %v1622_v16, 7  ;;  %v5676_v16 = vld [vmem:[%s8934_s4 + $0x78] sm:$0xff]  }
 0x2bb   : > { %3223 = vmatpush1.bf16.msra.mxu1 %v5674_v33  ;;  %v1631_v54 = vrot.slane %v1629_v21, 7  ;;  %v6905_v33 = vrot.slane %v1814_v46, 1  ;;  %v1755_v21 = vrot.slane %v1753_v39, 1  ;;  %v1639_v46 = vshll.u32 %v5246_v2, 16 }
 0x2bc   : > { %2179 = vrot.lane.b32.xlu0 %v6487_v40, %s5785_s19  ;;  %3224 = vmatprep.subr.bf16.mxu1 %v9045_v9  ;;  %v1627_v6 = vor.u32 %v1625_v1, %v1624_v26  ;;  %v1769_v2 = vshll.u32 %v6305_v47, 16 }
 0x2bd   : > { %2173 = vrot.lane.b32.xlu1 %v6426_v58, %s5785_s19  ;;  %v6885_v58 = vsel %vm2093_vm13, %v8967_v49, %v2147_v10  ;;  %v1634_v56 = vor.u32 %v1632_v3, %v1631_v54  ;;  %v1817_v30 = vsel %vm1744_vm9, %v6233_v5, %v6905_v33  ;;  %v1756_v1 = vsel %vm1744_vm9, %v6233_v5, %v1755_v21 }
 0x2be   : > { %9055 = vst [vmem:[#allocation23_spill] sm:$0xff] %v6885_v58 }
 0x2bf   : > { %3225 = vmatpush1.bf16.msra.mxu1 %v5675_v35  ;;  %v1707_v26 = vsel %vm6289_vm14, 0, %v1634_v56  ;;  %v6918_v35 = vsel %vm2093_vm13, %v2147_v10, %v2149_v12  ;;  %v1765_v10 = vshrl.u32 %v6309_v4, 16  ;;  %v6948_v56 = vpop.permute.xlu0 %2385 }
 0x2c0   : > { %5460 = vmatmul.mubr.msk.bf16.gmra.mrb[80].mxu0 %vm810_vm1, %v6233_v5  ;;  %2181 = vrot.lane.b32.xlu0 %v6529_v27, %s5785_s19  ;;  %9058 = vst [vmem:[#allocation26_spill] sm:$0xff] %v6918_v35  ;;  %v6944_v3 = vsel %vm6295_vm15, %v1707_v26, 0  ;;  %9062 = vst [vmem:[#allocation30_spill] sm:$0xff] %v6948_v56 }
 0x2c1   : > { %2325 = vrot.lane.b32.xlu1 %v6487_v40, %s5788_s16  ;;  %5463 = vmatprep.mubr.msk.bf16.mxu0 %vm810_vm1, %v6885_v58  ;;  %v1761_v40 = vshll.u32 %v6309_v4, 16  ;;  %9061 = vst [vmem:[#allocation29_spill] sm:$0xff] %v6944_v3 }
 0x2c2   : > { %3226 = vmatprep.subr.bf16.mxu1 %v9045_v9  ;;  %v1706_v9 = vsel %vm6289_vm14, 0, %v1627_v6  ;;  %v1641_v6 = vor.u32 %v1639_v46, %v1638_v31  ;;  %v1771_v31 = vrot.slane %v1769_v2, 1  ;;  %v1777_v46 = vshll.u32 %v6323_v28, 16 }
 0x2c3   : > { %3227 = vmatpush1.bf16.msra.mxu1 %v5676_v16  ;;  %v1763_v54 = vrot.slane %v1761_v40, 1  ;;  %v6935_v39 = vsel %vm6295_vm15, %v1706_v9, 0  ;;  %v5646_v16 = vpack.i.bf16 %v1817_v30, %v1756_v1  ;;  %v2155_v9 = vrot.slane %v6944_v3, 1 }
 0x2c4   : > { %2183 = vrot.lane.b32.xlu0 %v6539_v45, %s5785_s19  ;;  %9060 = vst [vmem:[#allocation28_spill] sm:$0xff] %v6935_v39  ;;  %v2153_v40 = vrot.slane %v6935_v39, 1  ;;  %v1708_v23 = vsel %vm6289_vm14, 0, %v1641_v6  ;;  %v1306_v1 = vmax.f32 %v6824_v41, 0.0  ;;  %v1779_v6 = vrot.slane %v1777_v46, 1 }
 0x2c5   : > { %2327 = vrot.lane.b32.xlu1 %v6529_v27, %s5788_s16  ;;  %v6928_v27 = vsel %vm2093_vm13, %v2149_v12, %v2151_v13  ;;  %v1767_v12 = vor.u32 %v1765_v10, %v1763_v54  ;;  %v6977_v30 = vsel %vm6295_vm15, %v1708_v23, 0  ;;  %v1785_v46 = vshll.u32 %v6339_v57, 16 }
 0x2c6   : > { %9059 = vst [vmem:[#allocation27_spill] sm:$0xff] %v6928_v27  ;;  %v6964_v26 = vsel %vm2093_vm13, %v2151_v13, %v2153_v40  ;;  %9066 = vst [vmem:[#allocation34_spill] sm:$0xff] %v6977_v30  ;;  %v1773_v13 = vshrl.u32 %v6305_v47, 16  ;;  %v2157_v2 = vrot.slane %v6977_v30, 1 }
 0x2c7   : > { %v6961_v55 = vsel %vm1744_vm9, %v1767_v12, %v1771_v31  ;;  %9063 = vst [vmem:[#allocation31_spill] sm:$0xff] %v6964_v26  ;;  %v1757_v12 = vshrl.u32 %v6327_v52, 16 }
 0x2c8   : > { %2185 = vrot.lane.b32.xlu0 %v6583_v44, %s5785_s19  ;;  %5464 = vmatmul.mubr.msk.bf16.gmra.mrb[84].mxu0 %vm810_vm1, %v6918_v35  ;;  %v1775_v10 = vor.u32 %v1773_v13, %v1771_v31  ;;  %v7000_v41 = vsel %vm2093_vm13, %v2155_v9, %v2157_v2  ;;  %v7008_v31 = vsel %vm2093_vm13, %v2157_v2, %v6233_v5 }
 0x2c9   : > { %2329 = vrot.lane.b32.xlu1 %v6539_v45, %s5788_s16  ;;  %5467 = vmatprep.mubr.msk.bf16.mxu0 %vm810_vm1, %v6928_v27  ;;  %v6952_v45 = vadd.f32 %v6580_v8, %v1205_v20  ;;  %v6971_v8 = vsel %vm2093_vm13, %v2153_v40, %v2155_v9  ;;  %v5231_v40 = vpack.c.bf16 %v1306_v1, %v1306_v1  ;;  %v1781_v9 = vshrl.u32 %v6323_v28, 16 }
 0x2ca   : > { %9064 = vst [vmem:[#allocation32_spill] sm:$0xff] %v6971_v8  ;;  %v6997_v23 = vsel %vm1744_vm9, %v1775_v10, %v1779_v6  ;;  %9067 = vst [vmem:[#allocation35_spill] sm:$0xff] %v7000_v41  ;;  %v1759_v13 = vor.u32 %v1757_v12, %v1755_v21  ;;  %v1787_v21 = vrot.slane %v1785_v46, 1  ;;  %v9074_v27 = vrot.slane %v6661_v61, 1 }
 0x2cb   : > { %9068 = vst [vmem:[#allocation36_spill] sm:$0xff] %v7008_v31  ;;  %v1531_v10 = vshrl.u32 %v5231_v40, 16 }
 0x2cc   : > { %5647 = vrot.lane.b32.xlu0 %v5646_v16, %s5788_s16  ;;  %v7021_v2 = vsel %vm1744_vm9, %v1759_v13, %v1763_v54  ;;  %v1534_v54 = vshll.u32 %v5231_v40, 16  ;;  %v9069_v13 = vmov 0.0  }
 0x2cd   : > { %2331 = vrot.lane.b32.xlu1 %v6583_v44, %s5788_s16  ;;  %v6973_v44 = vpop.permute.xlu0 %2444 }
 0x2ce   : > { %9065 = vst [vmem:[#allocation33_spill] sm:$0xff] %v6973_v44 }
 0x2d0   : > { %2430 = vrot.lane.b32.xlu0 %v6961_v55, %s5786_s20  ;;  %5468 = vmatmul.mubr.msk.bf16.gmra.mrb[88].mxu0 %vm810_vm1, %v6964_v26 }
 0x2d1   : > { %2333 = vrot.lane.b32.xlu1 %v6599_v51, %s5788_s16  ;;  %5471 = vmatprep.mubr.msk.bf16.mxu0 %vm810_vm1, %v6971_v8 }
 0x2d4   : > { %2249 = vrot.lane.b32.xlu0 %v6543_v22, %s5786_s20 }
 0x2d5   : > { %2335 = vrot.lane.b32.xlu1 %v6648_v38, %s5788_s16 }
 0x2d6   : > { %v6991_v20 = vpop.permute.xlu0 %2373  ;;  %v6993_v16 = vpop.permute.xlu1 %2371 }
 0x2d8   : > { %2432 = vrot.lane.b32.xlu0 %v6997_v23, %s5786_s20  ;;  %5472 = vmatmul.mubr.msk.bf16.gmra.mrb[92].mxu0 %vm810_vm1, %v7000_v41  ;;  %v1783_v41 = vor.u32 %v1781_v9, %v1779_v6  ;;  %v1793_v6 = vshll.u32 %v6355_v43, 16 }
 0x2d9   : > { %2399 = vrot.lane.b32.xlu1 %v6603_v25, %s5785_s19  ;;  %5475 = vmatprep.mubr.msk.bf16.mxu0 %vm810_vm1, %v7008_v31  ;;  %v1533_v31 = vrot.slane %v1531_v10, 7 }
 0x2da   : > { %v7016_v1 = vpop.permute.xlu0 %2375  ;;  %v7032_v3 = vsel %vm1744_vm9, %v1783_v41, %v1787_v21  ;;  %v1795_v40 = vrot.slane %v1793_v6, 1 }
 0x2db   : > { %v7018_v49 = vpop.permute.xlu1 %2223  ;;  %v1536_v41 = vor.u32 %v1534_v54, %v1533_v31  ;;  %v1797_v31 = vshrl.u32 %v6355_v43, 16 }
 0x2dc   : > { %2187 = vrot.lane.b32.xlu0 %v6599_v51, %s5785_s19  ;;  %v1789_v51 = vshrl.u32 %v6339_v57, 16 }
 0x2dd   : > { %1998 = vrot.lane.b32.xlu1 %v7021_v2, %s5788_s16  ;;  %v1693_v39 = vsel %vm6289_vm14, 0, %v1536_v41  ;;  %v1799_v6 = vor.u32 %v1797_v31, %v1795_v40  ;;  %v1805_v31 = vshrl.u32 %v6379_v50, 16 }
 0x2de   : > { %v7027_v12 = vpop.permute.xlu0 %2377  ;;  %v1791_v10 = vor.u32 %v1789_v51, %v1787_v21  ;;  %v1801_v21 = vshll.u32 %v6379_v50, 16 }
 0x2df   : > { %v7029_v30 = vpop.permute.xlu1 %2225 }
 0x2e0   : > { %2434 = vrot.lane.b32.xlu0 %v7032_v3, %s5786_s20  ;;  %5476 = vmatmul.mubr.msk.bf16.gmra.mrb[96].mxu0 %vm810_vm1, %v6233_v5 }
 0x2e1   : > { %2000 = vrot.lane.b32.xlu1 %v6961_v55, %s5788_s16  ;;  %5487 = vmatprep.mubr.msk.f32.mxu0 %vm5782_vm0, %v9069_v13  ;;  %v7059_v13 = vsel %vm1744_vm9, %v1791_v10, %v1795_v40 }
 0x2e2   : > { %v7044_v9 = vpop.permute.xlu0 %2379 }
 0x2e3   : > { %v7046_v46 = vpop.permute.xlu1 %2227 }
 0x2e4   : > { %2251 = vrot.lane.b32.xlu0 %v6551_v19, %s5786_s20 }
 0x2e5   : > { %2337 = vrot.lane.b32.xlu1 %v6657_v24, %s5788_s16  ;;  %v7067_v24 = vsel %vm6295_vm15, %v1693_v39, 0 }
 0x2e6   : > { %v7052_v8 = vpop.permute.xlu0 %2381  ;;  %v2127_v41 = vrot.slane %v7067_v24, 1 }
 0x2e7   : > { %9070 = vst [vmem:[#allocation37_spill] sm:$0xff] %v7052_v8  ;;  %v7056_v26 = vpop.permute.xlu1 %2229 }
 0x2e8   : > { %2436 = vrot.lane.b32.xlu0 %v7059_v13, %s5786_s20  ;;  %v2130_v40 = vsel %vm2093_vm13, %v2127_v41, %v9074_v27 }
 0x2e9   : > { %2189 = vrot.lane.b32.xlu1 %v6648_v38, %s5785_s19  ;;  %v1803_v38 = vrot.slane %v1801_v21, 1  ;;  %v1809_v21 = vshll.u32 %v9075_v36, 16 }
 0x2ea   : > { %v7071_v54 = vpop.permute.xlu0 %2383 }
 0x2eb   : > { %9071 = vst [vmem:[#allocation38_spill] sm:$0xff] %v7071_v54  ;;  %v7073_v51 = vpop.permute.xlu1 %2231  ;;  %v7085_v7 = vsel %vm1744_vm9, %v1799_v6, %v1803_v38  ;;  %v2128_v6 = vsel %vm2093_vm13, %v6233_v5, %v2127_v41  ;;  %v1807_v32 = vor.u32 %v1805_v31, %v1803_v38  ;;  %v1811_v27 = vrot.slane %v1809_v21, 1 }
 0x2ec   : > { %2253 = vrot.lane.b32.xlu0 %v6603_v25, %s5786_s20  ;;  %v2287_v41 = vshrl.u32 %v9075_v36, 16 }
 0x2ed   : > { %2002 = vrot.lane.b32.xlu1 %v6997_v23, %s5788_s16  ;;  %v7109_v50 = vsel %vm1744_vm9, %v1807_v32, %v1811_v27 }
 0x2ee   : > { %v7080_v39 = vpop.permute.xlu0 %2239  ;;  %9080 = vst [vmem:[#allocation44_spill] sm:$0xff] %v7109_v50  ;;  %v2289_v21 = vor.u32 %v2287_v41, %v1811_v27 }
 0x2ef   : > { %9072 = vst [vmem:[#allocation39_spill] sm:$0xff] %v7080_v39  ;;  %v7082_v10 = vpop.permute.xlu1 %2233 }
 0x2f0   : > { %9073 = vst [vmem:[#allocation40_spill] sm:$0xff] %v7082_v10  ;;  %2438 = vrot.lane.b32.xlu0 %v7085_v7, %s5786_s20 }
 0x2f1   : > { %2339 = vrot.lane.b32.xlu1 %v2130_v40, %s5788_s16 }
 0x2f2   : > { %v7095_v35 = vpop.permute.xlu0 %2241 }
 0x2f3   : > { %9076 = vst [vmem:[#allocation11_spill] sm:$0xff] %v7095_v35  ;;  %v7097_v39 = vpop.permute.xlu1 %2235 }
 0x2f4   : > { %9077 = vst [vmem:[#allocation41_spill] sm:$0xff] %v7097_v39  ;;  %2191 = vrot.lane.b32.xlu0 %v2128_v6, %s5785_s19  ;;  %v9090_v39 = vld [vmem:[#allocation13_spill] sm:$0xff] }
 0x2f5   : > { %2004 = vrot.lane.b32.xlu1 %v7032_v3, %s5788_s16  ;;  %v1830_v43 = vshll.u32 %v9090_v39, 16 }
 0x2f6   : > { %v7104_v44 = vpop.permute.xlu0 %2243 }
 0x2f7   : > { %9078 = vst [vmem:[#allocation42_spill] sm:$0xff] %v7104_v44  ;;  %v7106_v56 = vpop.permute.xlu1 %2237  ;;  %v7130_v44 = vsel %vm1744_vm9, %v2289_v21, %v6233_v5 }
 0x2f8   : > { %9079 = vst [vmem:[#allocation43_spill] sm:$0xff] %v7106_v56  ;;  %2440 = vrot.lane.b32.xlu0 %v7109_v50, %s5786_s20  ;;  %9085 = vst [vmem:[#allocation49_spill] sm:$0xff] %v7130_v44  ;;  %v1826_v56 = vshrl.u32 %v6447_v59, 16 }
 0x2f9   : > { %2401 = vrot.lane.b32.xlu1 %v6661_v61, %s5785_s19 }
 0x2fa   : > { %v7116_v38 = vpop.permute.xlu0 %2245 }
 0x2fb   : > { %9081 = vst [vmem:[#allocation45_spill] sm:$0xff] %v7116_v38  ;;  %v7118_v31 = vpop.permute.xlu1 %2387 }
 0x2fc   : > { %9082 = vst [vmem:[#allocation46_spill] sm:$0xff] %v7118_v31  ;;  %2255 = vrot.lane.b32.xlu0 %v7067_v24, %s5786_s20 }
 0x2fd   : > { %2006 = vrot.lane.b32.xlu1 %v7059_v13, %s5788_s16 }
 0x2fe   : > { %v7124_v32 = vpop.permute.xlu0 %2247 }
 0x2ff   : > { %9083 = vst [vmem:[#allocation47_spill] sm:$0xff] %v7124_v32  ;;  %v7126_v6 = vpop.permute.xlu1 %2389 }
 0x300   : > { %9084 = vst [vmem:[#allocation48_spill] sm:$0xff] %v7126_v6  ;;  %2442 = vrot.lane.b32.xlu0 %v7130_v44, %s5786_s20  ;;  %v1832_v44 = vrot.slane %v1830_v43, 1 }
 0x301   : > { %2341 = vrot.lane.b32.xlu1 %v6705_v11, %s5788_s16 }
 0x302   : > { %v7136_v36 = vpop.permute.xlu0 %2307 }
 0x303   : > { %v7138_v27 = vpop.permute.xlu1 %2391 }
 0x304   : > { %9086 = vst [vmem:[#allocation50_spill] sm:$0xff] %v7138_v27  ;;  %2193 = vrot.lane.b32.xlu0 %v2130_v40, %s5785_s19  ;;  %v1875_v27 = vshll.u32 %v7067_v24, 16  ;;  %v1822_v40 = vshll.u32 %v6447_v59, 16 }
 0x305   : > { %2008 = vrot.lane.b32.xlu1 %v7085_v7, %s5788_s16 }
 0x306   : > { %v7143_v41 = vpop.permute.xlu0 %2309  ;;  %v7165_v6 = vrot.slane %v1875_v27, 1 }
 0x307   : > { %v7145_v32 = vpop.permute.xlu1 %2393 }
 0x308   : > { %9087 = vst [vmem:[#allocation51_spill] sm:$0xff] %v7145_v32  ;;  %2257 = vrot.lane.b32.xlu0 %v6661_v61, %s5786_s20  ;;  %v1878_v27 = vsel %vm1744_vm9, %v6233_v5, %v7165_v6 }
 0x309   : > { %2403 = vrot.lane.b32.xlu1 %v6671_v53, %s5785_s19 }
 0x30a   : > { %v7151_v21 = vpop.permute.xlu0 %2311 }
 0x30b   : > { %v7153_v38 = vpop.permute.xlu1 %2395 }
 0x30c   : > { %9088 = vst [vmem:[#allocation52_spill] sm:$0xff] %v7153_v38  ;;  %2195 = vrot.lane.b32.xlu0 %v6705_v11, %s5785_s19  ;;  %v1824_v38 = vrot.slane %v1822_v40, 1  ;;  %v1818_v11 = vshrl.u32 %v6469_v63, 16 }
 0x30d   : > { %2010 = vrot.lane.b32.xlu1 %v7109_v50, %s5788_s16 }
 0x30e   : > { %v7161_v32 = vpop.permute.xlu0 %2313  ;;  %v1828_v40 = vor.u32 %v1826_v56, %v1824_v38  ;;  %v1834_v56 = vshrl.u32 %v9090_v39, 16 }
 0x30f   : > { %v7163_v35 = vpop.permute.xlu1 %2397 }
 0x310   : > { %9089 = vst [vmem:[#allocation53_spill] sm:$0xff] %v7163_v35  ;;  %2259 = vrot.lane.b32.xlu0 %v6671_v53, %s5786_s20  ;;  %v1820_v35 = vor.u32 %v1818_v11, %v6905_v33  ;;  %v7193_v10 = vsel %vm1744_vm9, %v1828_v40, %v1832_v44  ;;  %v9094_v11 = vld [vmem:[#allocation15_spill] sm:$0xff] }
 0x311   : > { %2343 = vrot.lane.b32.xlu1 %v6741_v17, %s5788_s16  ;;  %9092 = vst [vmem:[#allocation55_spill] sm:$0xff] %v7193_v10  ;;  %v1838_v43 = vshll.u32 %v9094_v11, 16 }
 0x312   : > { %v7172_v31 = vpop.permute.xlu0 %2315  ;;  %v7190_v54 = vsel %vm1744_vm9, %v1820_v35, %v1824_v38  ;;  %v1836_v35 = vor.u32 %v1834_v56, %v1832_v44  ;;  %v9098_v44 = vld [vmem:[#allocation16_spill] sm:$0xff] }
 0x313   : > { %v7176_v58 = vpop.permute.xlu1 %2159  ;;  %9091 = vst [vmem:[#allocation54_spill] sm:$0xff] %v7190_v54  ;;  %v1840_v40 = vrot.slane %v1838_v43, 1  ;;  %v1846_v56 = vshll.u32 %v9098_v44, 16 }
 0x314   : > { %2028 = vrot.lane.b32.xlu0 %v1878_v27, %s5788_s16 }
 0x315   : > { %2405 = vrot.lane.b32.xlu1 %v6709_v14, %s5785_s19  ;;  %v7214_v57 = vsel %vm1744_vm9, %v1836_v35, %v1840_v40  ;;  %v9099_v35 = vld [vmem:[#allocation19_spill] sm:$0xff] }
 0x316   : > { %v7185_v63 = vpop.permute.xlu0 %2317  ;;  %9096 = vst [vmem:[#allocation58_spill] sm:$0xff] %v7214_v57 }
 0x317   : > { %v7187_v59 = vpop.permute.xlu1 %2161 }
 0x318   : > { %2014 = vrot.lane.b32.xlu0 %v7190_v54, %s5788_s16 }
 0x319   : > { %2446 = vrot.lane.b32.xlu1 %v7193_v10, %s5786_s20 }
 0x31a   : > { %v7199_v33 = vpop.permute.xlu0 %2319 }
 0x31b   : > { %9093 = vst [vmem:[#allocation56_spill] sm:$0xff] %v7199_v33  ;;  %v7203_v27 = vpop.permute.xlu1 %2163 }
 0x31c   : > { %2197 = vrot.lane.b32.xlu0 %v6741_v17, %s5785_s19  ;;  %v1842_v17 = vshrl.u32 %v9094_v11, 16 }
 0x31d   : > { %2345 = vrot.lane.b32.xlu1 %v6753_v34, %s5788_s16 }
 0x31e   : > { %v7209_v38 = vpop.permute.xlu0 %2321  ;;  %v1844_v43 = vor.u32 %v1842_v17, %v1840_v40  ;;  %v1850_v40 = vshrl.u32 %v9098_v44, 16  ;;  %v1854_v17 = vshll.u32 %v6543_v22, 16 }
 0x31f   : > { %9095 = vst [vmem:[#allocation57_spill] sm:$0xff] %v7209_v38  ;;  %v7211_v54 = vpop.permute.xlu1 %2165 }
 0x320   : > { %2016 = vrot.lane.b32.xlu0 %v7193_v10, %s5788_s16  ;;  %v1848_v10 = vrot.slane %v1846_v56, 1 }
 0x321   : > { %2448 = vrot.lane.b32.xlu1 %v7214_v57, %s5786_s20 }
 0x322   : > { %v7220_v39 = vpop.permute.xlu0 %2323  ;;  %v1852_v56 = vor.u32 %v1850_v40, %v1848_v10 }
 0x323   : > { %9097 = vst [vmem:[#allocation59_spill] sm:$0xff] %v7220_v39  ;;  %v7224_v50 = vpop.permute.xlu1 %2167  ;;  %v7235_v39 = vsel %vm1744_vm9, %v1844_v43, %v1848_v10  ;;  %v1862_v10 = vshll.u32 %v6551_v19, 16 }
 0x324   : > { %2261 = vrot.lane.b32.xlu0 %v6709_v14, %s5786_s20  ;;  %9101 = vst [vmem:[#allocation60_spill] sm:$0xff] %v7235_v39 }
 0x325   : > { %2407 = vrot.lane.b32.xlu1 %v9099_v35, %s5785_s19 }
 0x326   : > { %v7230_v38 = vpop.permute.xlu0 %2175 }
 0x327   : > { %9100 = vst [vmem:[#allocation19_spill] sm:$0xff] %v7230_v38  ;;  %v7232_v33 = vpop.permute.xlu1 %2169 }
 0x328   : > { %2018 = vrot.lane.b32.xlu0 %v7214_v57, %s5788_s16  ;;  %v1856_v57 = vrot.slane %v1854_v17, 1 }
 0x329   : > { %2450 = vrot.lane.b32.xlu1 %v7235_v39, %s5786_s20 }
 0x32a   : > { %v7241_v11 = vpop.permute.xlu0 %2177 }
 0x32b   : > { %9102 = vst [vmem:[#allocation61_spill] sm:$0xff] %v7241_v11  ;;  %v7245_v8 = vpop.permute.xlu1 %2171  ;;  %v7256_v11 = vsel %vm1744_vm9, %v1852_v56, %v1856_v57 }
 0x32c   : > { %2199 = vrot.lane.b32.xlu0 %v6753_v34, %s5785_s19  ;;  %9105 = vst [vmem:[#allocation64_spill] sm:$0xff] %v7256_v11  ;;  %v1858_v34 = vshrl.u32 %v6543_v22, 16 }
 0x32d   : > { %2347 = vrot.lane.b32.xlu1 %v6793_v29, %s5788_s16 }
 0x32e   : > { %v7251_v43 = vpop.permute.xlu0 %2179  ;;  %v1860_v17 = vor.u32 %v1858_v34, %v1856_v57  ;;  %v1866_v57 = vshrl.u32 %v6551_v19, 16  ;;  %v1870_v34 = vshll.u32 %v6603_v25, 16 }
 0x32f   : > { %9103 = vst [vmem:[#allocation62_spill] sm:$0xff] %v7251_v43  ;;  %v7253_v38 = vpop.permute.xlu1 %2173 }
 0x330   : > { %9104 = vst [vmem:[#allocation63_spill] sm:$0xff] %v7253_v38  ;;  %2020 = vrot.lane.b32.xlu0 %v7235_v39, %s5788_s16  ;;  %v1864_v39 = vrot.slane %v1862_v10, 1  ;;  %v1872_v19 = vrot.slane %v1870_v34, 1 }
 0x331   : > { %2452 = vrot.lane.b32.xlu1 %v7256_v11, %s5786_s20 }
 0x332   : > { %v7262_v44 = vpop.permute.xlu0 %2181 }
 0x333   : > { %9106 = vst [vmem:[#allocation65_spill] sm:$0xff] %v7262_v44  ;;  %v7266_v40 = vpop.permute.xlu1 %2325  ;;  %v7277_v44 = vsel %vm1744_vm9, %v1860_v17, %v1864_v39 }
 0x334   : > { %9107 = vst [vmem:[#allocation66_spill] sm:$0xff] %v7266_v40  ;;  %2263 = vrot.lane.b32.xlu0 %v9099_v35, %s5786_s20 }
 0x335   : > { %2409 = vrot.lane.b32.xlu1 %v6757_v48, %s5785_s19 }
 0x336   : > { %v7272_v56 = vpop.permute.xlu0 %2183 }
 0x337   : > { %9108 = vst [vmem:[#allocation67_spill] sm:$0xff] %v7272_v56  ;;  %v7274_v43 = vpop.permute.xlu1 %2327  ;;  %v1868_v56 = vor.u32 %v1866_v57, %v1864_v39 }
 0x338   : > { %9109 = vst [vmem:[#allocation68_spill] sm:$0xff] %v7274_v43  ;;  %2022 = vrot.lane.b32.xlu0 %v7256_v11, %s5788_s16 }
 0x339   : > { %2454 = vrot.lane.b32.xlu1 %v7277_v44, %s5786_s20 }
 0x33a   : > { %v7283_v22 = vpop.permute.xlu0 %2185 }
 0x33b   : > { %9110 = vst [vmem:[#allocation69_spill] sm:$0xff] %v7283_v22  ;;  %v7287_v40 = vpop.permute.xlu1 %2329  ;;  %v7289_v10 = vpop.f32.mrb[36].mxu0 }
 0x33c   : > { %9111 = vst [vmem:[#allocation70_spill] sm:$0xff] %v7287_v40  ;;  %9112 = vst [vmem:[#allocation71_spill] sm:$0xff] %v7289_v10  ;;  %2201 = vrot.lane.b32.xlu0 %v6793_v29, %s5785_s19  ;;  %v7293_v17 = vpop.f32.mrb[37].mxu0  ;;  %v2717_v40 = vsel %vm810_vm1, %v7021_v2, %v7136_v36  ;;  %v7306_v29 = vsel %vm1744_vm9, %v1868_v56, %v1872_v19  ;;  %v2291_v56 = vshrl.u32 %v6603_v25, 16 }
 0x33d   : > { %9113 = vst [vmem:[#allocation72_spill] sm:$0xff] %v7293_v17  ;;  %2349 = vrot.lane.b32.xlu1 %v6802_v62, %s5788_s16  ;;  %v5418_v11 = vpop.f32.mrb[38].mxu0  ;;  %v2812_v2 = vsel %vm2553_vm10, %v2717_v40, %v6993_v16 }
 0x33e   : > { %v7297_v43 = vpop.permute.xlu0 %5647  ;;  %v3490_v22 = vpop.f32.mrb[39].mxu0  ;;  %v2293_v16 = vor.u32 %v2291_v56, %v1872_v19 }
 0x33f   : > { %v7302_v38 = vpop.permute.xlu1 %2331  ;;  %v5649_v10 = vunpack.i.l.bf16 %v7297_v43  ;;  %v1314_v22 = vmax.f32 %v6952_v45, 0.0 }
 0x340   : > { %2024 = vrot.lane.b32.xlu0 %v7277_v44, %s5788_s16 }
 0x341   : > { %v2490_v39 = vsel %vm810_vm1, 0, %v5649_v10  ;;  %2456 = vrot.lane.b32.xlu1 %v7306_v29, %s5786_s20  ;;  %v5239_v40 = vpack.c.bf16 %v1314_v22, %v1314_v22 }
 0x342   : > { %v2431_v11 = vpop.permute.xlu0 %2430  ;;  %v2555_v36 = vsel %vm2553_vm10, %v2490_v39, %v7176_v58  ;;  %v9116_v58 = vld [vmem:[#allocation20_spill] sm:$0xff] }
 0x343   : > { %v7319_v57 = vpop.permute.xlu1 %2333  ;;  %v7321_v34 = vpop.f32.mrb[40].mxu0  ;;  %v2873_v10 = vsel %vm2618_vm11, %v2812_v2, %v2431_v11  ;;  %v2620_v17 = vsel %vm2618_vm11, %v2555_v36, %v7018_v49  ;;  %v2720_v49 = vsel %vm810_vm1, %v6961_v55, %v7143_v41  ;;  %v7341_v2 = vsel %vm1744_vm9, %v2293_v16, %v6233_v5 }
 0x344   : > { %9114 = vst [vmem:[#allocation73_spill] sm:$0xff] %v7321_v34  ;;  %2265 = vrot.lane.b32.xlu0 %v6757_v48, %s5786_s20  ;;  %3228 = vmatprep.mubr.bf16.mxu1 %v2873_v10  ;;  %v7328_v45 = vpop.f32.mrb[41].mxu0  ;;  %v1587_v19 = vshrl.u32 %v5239_v40, 16  ;;  %v2814_v22 = vsel %vm2553_vm10, %v2720_v49, %v6991_v20  ;;  %v2723_v49 = vsel %vm810_vm1, %v6997_v23, %v7151_v21  ;;  %v1887_v21 = vshrl.u32 %v6661_v61, 16 }
 0x345   : > { %9115 = vst [vmem:[#allocation74_spill] sm:$0xff] %v7328_v45  ;;  %2411 = vrot.lane.b32.xlu1 %v9116_v58, %s5785_s19  ;;  %3229 = vmatmul.mubr.bf16.vlgmr.msra.gmra.mrb[0].mxu1 %v2620_v17  ;;  %v5422_v25 = vpop.f32.mrb[42].mxu0 }
 0x346   : > { %v7332_v39 = vpop.permute.xlu0 %2249  ;;  %v3504_v34 = vpop.f32.mrb[43].mxu0  ;;  %v1589_v16 = vrot.slane %v1587_v19, 7 }
 0x347   : > { %v7337_v11 = vpop.permute.xlu1 %2335  ;;  %v1883_v34 = vshll.u32 %v6661_v61, 16 }
 0x348   : > { %2026 = vrot.lane.b32.xlu0 %v7306_v29, %s5788_s16 }
 0x349   : > { %2458 = vrot.lane.b32.xlu1 %v7341_v2, %s5786_s20 }
 0x34a   : > { %v2433_v17 = vpop.permute.xlu0 %2432 }
 0x34b   : > { %v7349_v36 = vpop.permute.xlu1 %2399  ;;  %v7351_v55 = vpop.f32.mrb[44].mxu0  ;;  %v2876_v41 = vsel %vm2618_vm11, %v2814_v22, %v2433_v17  ;;  %v1590_v22 = vshll.u32 %v5239_v40, 16  ;;  %v1891_v40 = vshll.u32 %v6671_v53, 16 }
 0x34c   : > { %9117 = vst [vmem:[#allocation75_spill] sm:$0xff] %v7351_v55  ;;  %2203 = vrot.lane.b32.xlu0 %v6802_v62, %s5785_s19  ;;  %3235 = vmatprep.mubr.bf16.mxu1 %v2876_v41  ;;  %v7356_v56 = vpop.f32.mrb[45].mxu0  ;;  %v1885_v41 = vrot.slane %v1883_v34, 1 }
 0x34d   : > { %9118 = vst [vmem:[#allocation76_spill] sm:$0xff] %v7356_v56  ;;  %2351 = vrot.lane.b32.xlu1 %v6837_v42, %s5788_s16  ;;  %v5426_v10 = vpop.f32.mrb[46].mxu0 }
 0x34e   : > { %v7361_v20 = vpop.permute.xlu0 %2187  ;;  %v3518_v25 = vpop.f32.mrb[47].mxu0  ;;  %v1879_v10 = vshrl.u32 %v7067_v24, 16 }
 0x34f   : > { %v1999_v17 = vpop.permute.xlu1 %1998  ;;  %v1592_v25 = vor.u32 %v1590_v22, %v1589_v16 }
 0x350   : > { %v2492_v62 = vsel %vm810_vm1, %v6327_v52, %v1999_v17  ;;  %2267 = vrot.lane.b32.xlu0 %v9116_v58, %s5786_s20  ;;  %v2816_v52 = vsel %vm2553_vm10, %v2723_v49, %v7016_v1 }
 0x351   : > { %2413 = vrot.lane.b32.xlu1 %v6806_v0, %s5785_s19  ;;  %v2557_v19 = vsel %vm2553_vm10, %v2492_v62, %v7187_v59  ;;  %v1881_v59 = vor.u32 %v1879_v10, %v7165_v6  ;;  %v1893_v6 = vrot.slane %v1891_v40, 1 }
 0x352   : > { %v2435_v55 = vpop.permute.xlu0 %2434  ;;  %v2623_v23 = vsel %vm2618_vm11, %v2557_v19, %v7029_v30  ;;  %v1889_v30 = vor.u32 %v1887_v21, %v1885_v41 }
 0x353   : > { %v2001_v34 = vpop.permute.xlu1 %2000  ;;  %3236 = vmatmul.mubr.bf16.gmra.mrb[4].mxu1 %v2623_v23  ;;  %v2879_v17 = vsel %vm2618_vm11, %v2816_v52, %v2435_v55  ;;  %v7382_v56 = vpop.f32.mrb[48].mxu0  ;;  %v1701_v55 = vsel %vm6289_vm14, 0, %v1592_v25  ;;  %v7403_v10 = vsel %vm1744_vm9, %v1881_v59, %v1885_v41  ;;  %v1895_v41 = vshrl.u32 %v6671_v53, 16 }
 0x354   : > { %9119 = vst [vmem:[#allocation77_spill] sm:$0xff] %v7382_v56  ;;  %v2494_v16 = vsel %vm810_vm1, %v6309_v4, %v2001_v34  ;;  %2269 = vrot.lane.b32.xlu0 %v6806_v0, %s5786_s20  ;;  %3242 = vmatprep.mubr.bf16.mxu1 %v2879_v17  ;;  %v7389_v1 = vpop.f32.mrb[49].mxu0  ;;  %v2726_v4 = vsel %vm810_vm1, %v7032_v3, %v7161_v32  ;;  %v7414_v18 = vsel %vm6295_vm15, %v1701_v55, 0  ;;  %v1899_v25 = vshll.u32 %v6709_v14, 16 }
 0x355   : > { %9120 = vst [vmem:[#allocation78_spill] sm:$0xff] %v7389_v1  ;;  %2353 = vrot.lane.b32.xlu1 %v6844_v37, %s5788_s16  ;;  %v5430_v49 = vpop.f32.mrb[50].mxu0  ;;  %v2559_v37 = vsel %vm2553_vm10, %v2494_v16, %v7203_v27  ;;  %v7408_v23 = vsel %vm1744_vm9, %v1889_v30, %v1893_v6  ;;  %9121 = vst [vmem:[#allocation79_spill] sm:$0xff] %v7414_v18  ;;  %v2818_v27 = vsel %vm2553_vm10, %v2726_v4, %v7027_v12 }
 0x356   : > { %v7395_v22 = vpop.permute.xlu0 %2251  ;;  %v3532_v62 = vpop.f32.mrb[51].mxu0  ;;  %v2626_v32 = vsel %vm2618_vm11, %v2559_v37, %v7046_v46  ;;  %v2143_v40 = vrot.slane %v7414_v18, 1  ;;  %v1897_v12 = vor.u32 %v1895_v41, %v1893_v6  ;;  %v1901_v16 = vrot.slane %v1899_v25, 1 }
 0x357   : > { %v7400_v19 = vpop.permute.xlu1 %2337  ;;  %v2729_v30 = vsel %vm810_vm1, %v7059_v13, %v7172_v31  ;;  %v1907_v37 = vshll.u32 %v9099_v35, 16 }
 0x358   : > { %2030 = vrot.lane.b32.xlu0 %v7403_v10, %s5788_s16  ;;  %v2144_v55 = vsel %vm2093_vm13, %v6233_v5, %v2143_v40  ;;  %v7446_v6 = vsel %vm1744_vm9, %v1897_v12, %v1901_v16  ;;  %v2820_v31 = vsel %vm2553_vm10, %v2729_v30, %v7044_v9 }
 0x359   : > { %2460 = vrot.lane.b32.xlu1 %v7408_v23, %s5786_s20 }
 0x35a   : > { %v2437_v3 = vpop.permute.xlu0 %2436 }
 0x35b   : > { %v7424_v52 = vpop.permute.xlu1 %2189  ;;  %3243 = vmatmul.mubr.bf16.gmra.mrb[8].mxu1 %v2626_v32  ;;  %v7426_v60 = vpop.f32.mrb[52].mxu0  ;;  %v2882_v21 = vsel %vm2618_vm11, %v2818_v27, %v2437_v3 }
 0x35c   : > { %9122 = vst [vmem:[#allocation80_spill] sm:$0xff] %v7426_v60  ;;  %2032 = vrot.lane.b32.xlu0 %v7408_v23, %s5788_s16  ;;  %3249 = vmatprep.mubr.bf16.mxu1 %v2882_v21  ;;  %v7432_v46 = vpop.f32.mrb[53].mxu0  ;;  %v1944_v60 = vshll.u32 %v6852_v15, 16 }
 0x35d   : > { %9123 = vst [vmem:[#allocation81_spill] sm:$0xff] %v7432_v46  ;;  %2205 = vrot.lane.b32.xlu1 %v6837_v42, %s5785_s19  ;;  %v5434_v34 = vpop.f32.mrb[54].mxu0  ;;  %v9161_v46 = vld [vmem:[#allocation24_spill] sm:$0xff] }
 0x35e   : > { %v7436_v17 = vpop.permute.xlu0 %2253  ;;  %v3546_v59 = vpop.f32.mrb[55].mxu0  ;;  %v1909_v34 = vrot.slane %v1907_v37, 1 }
 0x35f   : > { %v2003_v49 = vpop.permute.xlu1 %2002  ;;  %v2732_v59 = vsel %vm810_vm1, %v7085_v7, %v7185_v63  ;;  %v9127_v7 = vld [vmem:[#allocation37_spill] sm:$0xff] }
 0x360   : > { %v2496_v62 = vsel %vm810_vm1, %v6305_v47, %v2003_v49  ;;  %2207 = vrot.lane.b32.xlu0 %v2144_v55, %s5785_s19  ;;  %v1903_v47 = vshrl.u32 %v6709_v14, 16 }
 0x361   : > { %2462 = vrot.lane.b32.xlu1 %v7446_v6, %s5786_s20  ;;  %v2561_v42 = vsel %vm2553_vm10, %v2496_v62, %v7211_v54  ;;  %v9125_v54 = vrot.slane %v6852_v15, 1  ;;  %v2822_v62 = vsel %vm2553_vm10, %v2732_v59, %v9127_v7 }
 0x362   : > { %v2439_v4 = vpop.permute.xlu0 %2438  ;;  %v2629_v13 = vsel %vm2618_vm11, %v2561_v42, %v7056_v26  ;;  %v1905_v9 = vor.u32 %v1903_v47, %v1901_v16  ;;  %v1915_v42 = vshll.u32 %v6757_v48, 16 }
 0x363   : > { %v7459_v3 = vpop.permute.xlu1 %2339  ;;  %3250 = vmatmul.mubr.bf16.gmra.mrb[12].mxu1 %v2629_v13  ;;  %v7461_v32 = vpop.f32.mrb[56].mxu0  ;;  %v2885_v27 = vsel %vm2618_vm11, %v2820_v31, %v2439_v4  ;;  %v2146_v41 = vsel %vm2093_vm13, %v2143_v40, %v9125_v54 }
 0x364   : > { %9124 = vst [vmem:[#allocation82_spill] sm:$0xff] %v7461_v32  ;;  %3256 = vmatprep.mubr.bf16.mxu1 %v2885_v27  ;;  %2271 = vrot.lane.b32.xlu0 %v7414_v18, %s5786_s20  ;;  %v7469_v26 = vpop.f32.mrb[57].mxu0  ;;  %v7480_v49 = vsel %vm1744_vm9, %v1905_v9, %v1909_v34  ;;  %v1917_v54 = vrot.slane %v1915_v42, 1  ;;  %v9130_v9 = vld [vmem:[#allocation56_spill] sm:$0xff]  ;;  %v1919_v42 = vshrl.u32 %v6757_v48, 16  ;;  %v9154_v32 = vld [vmem:[#allocation59_spill] sm:$0xff] }
 0x365   : > { %9126 = vst [vmem:[#allocation83_spill] sm:$0xff] %v7469_v26  ;;  %2355 = vrot.lane.b32.xlu1 %v2146_v41, %s5788_s16  ;;  %v5438_v25 = vpop.f32.mrb[58].mxu0 }
 0x366   : > { %v7472_v21 = vpop.permute.xlu0 %2191  ;;  %v3560_v12 = vpop.f32.mrb[59].mxu0  ;;  %v9131_v25 = vld [vmem:[#allocation44_spill] sm:$0xff] }
 0x367   : > { %v2005_v30 = vpop.permute.xlu1 %2004  ;;  %v2735_v12 = vsel %vm810_vm1, %v9131_v25, %v9130_v9  ;;  %v9137_v9 = vld [vmem:[#allocation57_spill] sm:$0xff] }
 0x368   : > { %v2498_v40 = vsel %vm810_vm1, %v6323_v28, %v2005_v30  ;;  %2034 = vrot.lane.b32.xlu0 %v7446_v6, %s5788_s16  ;;  %v1911_v28 = vshrl.u32 %v9099_v35, 16  ;;  %v9132_v30 = vld [vmem:[#allocation8_spill] sm:$0xff]  ;;  %v9138_v25 = vld [vmem:[#allocation49_spill] sm:$0xff] }
 0x369   : > { %2464 = vrot.lane.b32.xlu1 %v7480_v49, %s5786_s20  ;;  %v2563_v16 = vsel %vm2553_vm10, %v2498_v40, %v7224_v50 }
 0x36a   : > { %v2441_v55 = vpop.permute.xlu0 %2440  ;;  %v2632_v63 = vsel %vm2618_vm11, %v2563_v16, %v7073_v51  ;;  %v1913_v51 = vor.u32 %v1911_v28, %v1909_v34 }
 0x36b   : > { %v7494_v4 = vpop.permute.xlu1 %2401  ;;  %3257 = vmatmul.mubr.bf16.gmra.mrb[16].mxu1 %v2632_v63  ;;  %v7496_v13 = vpop.f32.mrb[60].mxu0  ;;  %v2888_v31 = vsel %vm2618_vm11, %v2822_v62, %v2441_v55  ;;  %v9133_v63 = vld [vmem:[#allocation40_spill] sm:$0xff]  ;;  %v9134_v62 = vld [vmem:[#allocation38_spill] sm:$0xff] }
 0x36c   : > { %9128 = vst [vmem:[#allocation37_spill] sm:$0xff] %v7496_v13  ;;  %3263 = vmatprep.mubr.bf16.mxu1 %v2888_v31  ;;  %2036 = vrot.lane.b32.xlu0 %v7480_v49, %s5788_s16  ;;  %v7501_v50 = vpop.f32.mrb[61].mxu0  ;;  %v7513_v16 = vsel %vm1744_vm9, %v1913_v51, %v1917_v54  ;;  %v2824_v28 = vsel %vm2553_vm10, %v2735_v12, %v9134_v62  ;;  %v1923_v31 = vshll.u32 %v9116_v58, 16 }
 0x36d   : > { %9129 = vst [vmem:[#allocation84_spill] sm:$0xff] %v7501_v50  ;;  %2415 = vrot.lane.b32.xlu1 %v6852_v15, %s5785_s19  ;;  %v5442_v47 = vpop.f32.mrb[62].mxu0  ;;  %v2738_v12 = vsel %vm810_vm1, %v9138_v25, %v9137_v9  ;;  %v9142_v9 = vld [vmem:[#allocation41_spill] sm:$0xff]  ;;  %v9147_v50 = vld [vmem:[#allocation10_spill] sm:$0xff] }
 0x36e   : > { %v7505_v37 = vpop.permute.xlu0 %2255  ;;  %v3574_v27 = vpop.f32.mrb[63].mxu0 }
 0x36f   : > { %v2007_v59 = vpop.permute.xlu1 %2006 }
 0x370   : > { %v2500_v40 = vsel %vm810_vm1, %v9132_v30, %v2007_v59  ;;  %2209 = vrot.lane.b32.xlu0 %v2146_v41, %s5785_s19  ;;  %v9139_v59 = vld [vmem:[#allocation23_spill] sm:$0xff] }
 0x371   : > { %2466 = vrot.lane.b32.xlu1 %v7513_v16, %s5786_s20  ;;  %v2565_v34 = vsel %vm2553_vm10, %v2500_v40, %v7232_v33  ;;  %v1921_v33 = vor.u32 %v1919_v42, %v1917_v54 }
 0x372   : > { %v2443_v55 = vpop.permute.xlu0 %2442  ;;  %v2635_v7 = vsel %vm2618_vm11, %v2565_v34, %v9133_v63  ;;  %v1925_v34 = vrot.slane %v1923_v31, 1 }
 0x373   : > { %v7526_v51 = vpop.permute.xlu1 %2341  ;;  %3264 = vmatmul.mubr.bf16.gmra.mrb[20].mxu1 %v2635_v7  ;;  %v2891_v41 = vsel %vm2618_vm11, %v2824_v28, %v2443_v55  ;;  %v7529_v47 = vpop.f32.mrb[64].mxu0  ;;  %v9140_v7 = vld [vmem:[#allocation9_spill] sm:$0xff]  ;;  %v9141_v28 = vld [vmem:[#allocation30_spill] sm:$0xff] }
 0x374   : > { %9135 = vst [vmem:[#allocation56_spill] sm:$0xff] %v7529_v47  ;;  %3270 = vmatprep.mubr.bf16.mxu1 %v2891_v41  ;;  %2273 = vrot.lane.b32.xlu0 %v6852_v15, %s5786_s20  ;;  %v7533_v27 = vpop.f32.mrb[65].mxu0  ;;  %v7545_v54 = vsel %vm1744_vm9, %v1921_v33, %v1925_v34  ;;  %v2826_v42 = vsel %vm2553_vm10, %v2738_v12, %v9141_v28  ;;  %v1927_v33 = vshrl.u32 %v9116_v58, 16 }
 0x375   : > { %9136 = vst [vmem:[#allocation44_spill] sm:$0xff] %v7533_v27  ;;  %2357 = vrot.lane.b32.xlu1 %v9139_v59, %s5788_s16  ;;  %v5446_v30 = vpop.f32.mrb[66].mxu0 }
 0x376   : > { %v7540_v40 = vpop.permute.xlu0 %2193  ;;  %v3588_v55 = vpop.f32.mrb[67].mxu0  ;;  %v1931_v30 = vshll.u32 %v6806_v0, 16 }
 0x377   : > { %v2009_v63 = vpop.permute.xlu1 %2008 }
 0x378   : > { %v2502_v62 = vsel %vm810_vm1, %v9140_v7, %v2009_v63  ;;  %2038 = vrot.lane.b32.xlu0 %v7513_v16, %s5788_s16  ;;  %v9143_v63 = vld [vmem:[#allocation33_spill] sm:$0xff] }
 0x379   : > { %2468 = vrot.lane.b32.xlu1 %v7545_v54, %s5786_s20  ;;  %v2567_v31 = vsel %vm2553_vm10, %v2502_v62, %v7245_v8  ;;  %v2894_v12 = vsel %vm2618_vm11, %v2826_v42, %v9143_v63  ;;  %v1929_v62 = vor.u32 %v1927_v33, %v1925_v34  ;;  %v9149_v34 = vld [vmem:[#allocation63_spill] sm:$0xff] }
 0x37a   : > { %v7555_v41 = vpop.permute.xlu0 %2257  ;;  %v2638_v25 = vsel %vm2618_vm11, %v2567_v31, %v9142_v9  ;;  %v9146_v31 = vld [vmem:[#allocation22_spill] sm:$0xff] }
 0x37b   : > { %v7561_v55 = vpop.permute.xlu1 %2403  ;;  %3271 = vmatmul.mubr.bf16.gmra.mrb[24].mxu1 %v2638_v25  ;;  %v7565_v7 = vpop.f32.mrb[68].mxu0  ;;  %v1933_v25 = vrot.slane %v1931_v30, 1  ;;  %v1952_v45 = vshll.u32 %v9146_v31, 16 }
 0x37c   : > { %9144 = vst [vmem:[#allocation8_spill] sm:$0xff] %v7565_v7  ;;  %3277 = vmatprep.mubr.bf16.mxu1 %v2894_v12  ;;  %2040 = vrot.lane.b32.xlu0 %v7545_v54, %s5788_s16  ;;  %v7569_v8 = vpop.f32.mrb[69].mxu0  ;;  %v2295_v7 = vshrl.u32 %v6806_v0, 16 }
 0x37d   : > { %9145 = vst [vmem:[#allocation40_spill] sm:$0xff] %v7569_v8  ;;  %2417 = vrot.lane.b32.xlu1 %v9146_v31, %s5785_s19  ;;  %v5450_v9 = vpop.f32.mrb[70].mxu0  ;;  %v7578_v12 = vsel %vm1744_vm9, %v1929_v62, %v1933_v25  ;;  %v9153_v8 = vld [vmem:[#allocation26_spill] sm:$0xff] }
 0x37e   : > { %v7573_v47 = vpop.permute.xlu0 %2195  ;;  %v3602_v27 = vpop.f32.mrb[71].mxu0  ;;  %9148 = vst [vmem:[#allocation38_spill] sm:$0xff] %v7578_v12 }
 0x37f   : > { %v2011_v13 = vpop.permute.xlu1 %2010  ;;  %v9150_v27 = vld [vmem:[#allocation43_spill] sm:$0xff] }
 0x380   : > { %v2504_v42 = vsel %vm810_vm1, %v9147_v50, %v2011_v13  ;;  %2211 = vrot.lane.b32.xlu0 %v9139_v59, %s5785_s19  ;;  %v5650_v13 = vunpack.i.h.bf16 %v7297_v43 }
 0x381   : > { %2470 = vrot.lane.b32.xlu1 %v7578_v12, %s5786_s20  ;;  %v2569_v33 = vsel %vm2553_vm10, %v2504_v42, %v9149_v34  ;;  %v2297_v34 = vor.u32 %v2295_v7, %v1933_v25 }
 0x382   : > { %v7586_v9 = vpop.permute.xlu0 %2259  ;;  %v2641_v30 = vsel %vm2618_vm11, %v2569_v33, %v9150_v27  ;;  %v2506_v27 = vsel %vm810_vm1, 0, %v5650_v13  ;;  %v9157_v13 = vld [vmem:[#allocation19_spill] sm:$0xff] }
 0x383   : > { %v2344_v50 = vpop.permute.xlu1 %2343  ;;  %3278 = vmatmul.mubr.bf16.gmra.mrb[28].mxu1 %v2641_v30  ;;  %v7592_v62 = vpop.f32.mrb[72].mxu0  ;;  %v7614_v7 = vsel %vm1744_vm9, %v2297_v34, %v6233_v5 }
 0x384   : > { %9151 = vst [vmem:[#allocation57_spill] sm:$0xff] %v7592_v62  ;;  %v2771_v59 = vsel %vm810_vm1, %v7446_v6, %v2344_v50  ;;  %2275 = vrot.lane.b32.xlu0 %v9146_v31, %s5786_s20  ;;  %v7598_v42 = vpop.f32.mrb[73].mxu0  ;;  %v1936_v62 = vshll.u32 %v7414_v18, 16  ;;  %v9155_v6 = vld [vmem:[#allocation54_spill] sm:$0xff]  ;;  %9156 = vst [vmem:[#allocation23_spill] sm:$0xff] %v7614_v7 }
 0x385   : > { %9152 = vst [vmem:[#allocation49_spill] sm:$0xff] %v7598_v42  ;;  %2359 = vrot.lane.b32.xlu1 %v9153_v8, %s5788_s16  ;;  %v5454_v33 = vpop.f32.mrb[74].mxu0  ;;  %v2741_v50 = vsel %vm810_vm1, %v9155_v6, %v9154_v32  ;;  %v9159_v32 = vld [vmem:[#allocation46_spill] sm:$0xff] }
 0x386   : > { %v7602_v0 = vpop.permute.xlu0 %2028  ;;  %v3616_v43 = vpop.f32.mrb[75].mxu0  ;;  %v2571_v33 = vsel %vm2553_vm10, %v2506_v27, %v9157_v13  ;;  %v9162_v27 = vld [vmem:[#allocation39_spill] sm:$0xff] }
 0x387   : > { %v2406_v30 = vpop.permute.xlu1 %2405  ;;  %v2644_v13 = vsel %vm2618_vm11, %v2571_v33, %v9162_v27  ;;  %v9166_v33 = vld [vmem:[#allocation27_spill] sm:$0xff]  ;;  %v1940_v27 = vshrl.u32 %v7414_v18, 16 }
 0x388   : > { %v7610_v26 = vsel %vm2553_vm10, %v2771_v59, %v2406_v30  ;;  %2042 = vrot.lane.b32.xlu0 %v7578_v12, %s5788_s16  ;;  %v2828_v59 = vsel %vm2553_vm10, %v2741_v50, %v9159_v32  ;;  %v1938_v30 = vrot.slane %v1936_v62, 1 }
 0x389   : > { %2472 = vrot.lane.b32.xlu1 %v7614_v7, %s5786_s20 }
 0x38a   : > { %v2015_v25 = vpop.permute.xlu0 %2014 }
 0x38b   : > { %v2447_v43 = vpop.permute.xlu1 %2446  ;;  %v7622_v42 = vpop.f32.mrb[76].mxu0 }
 0x38c   : > { %9158 = vst [vmem:[#allocation9_spill] sm:$0xff] %v7622_v42  ;;  %v2897_v34 = vsel %vm2618_vm11, %v2828_v59, %v2447_v43  ;;  %2213 = vrot.lane.b32.xlu0 %v9153_v8, %s5785_s19  ;;  %v7629_v6 = vpop.f32.mrb[77].mxu0  ;;  %v9163_v43 = vld [vmem:[#allocation14_spill] sm:$0xff]  ;;  %v1939_v59 = vsel %vm1744_vm9, %v6233_v5, %v1938_v30 }
 0x38d   : > { %9160 = vst [vmem:[#allocation30_spill] sm:$0xff] %v7629_v6  ;;  %3284 = vmatprep.mubr.bf16.mxu1 %v2897_v34  ;;  %2419 = vrot.lane.b32.xlu1 %v9161_v46, %s5785_s19  ;;  %v5458_v42 = vpop.f32.mrb[78].mxu0  ;;  %v2508_v32 = vsel %vm810_vm1, %v9163_v43, %v2015_v25  ;;  %v9164_v6 = vld [vmem:[#allocation66_spill] sm:$0xff]  ;;  %v9165_v34 = vld [vmem:[#allocation55_spill] sm:$0xff]  ;;  %v1948_v43 = vshrl.u32 %v6852_v15, 16 }
 0x38e   : > { %3285 = vmatmul.mubr.bf16.gmra.mrb[32].mxu1 %v2644_v13  ;;  %v7636_v50 = vpop.permute.xlu0 %2197  ;;  %v3630_v62 = vpop.f32.mrb[79].mxu0  ;;  %v2744_v56 = vsel %vm810_vm1, %v9165_v34, %v9164_v6  ;;  %v1946_v42 = vrot.slane %v1944_v60, 1  ;;  %v9167_v13 = vld [vmem:[#allocation61_spill] sm:$0xff]  ;;  %v9168_v34 = vld [vmem:[#allocation48_spill] sm:$0xff]  ;;  %v1942_v60 = vor.u32 %v1940_v27, %v1938_v30  ;;  %v1954_v30 = vrot.slane %v1952_v45, 1 }
 0x38f   : > { %v2346_v8 = vpop.permute.xlu1 %2345  ;;  %v2573_v62 = vsel %vm2553_vm10, %v2508_v32, %v9167_v13  ;;  %v9171_v32 = vld [vmem:[#allocation25_spill] sm:$0xff]  ;;  %v9172_v13 = vld [vmem:[#allocation11_spill] sm:$0xff] }
 0x390   : > { %v2774_v1 = vsel %vm810_vm1, %v7480_v49, %v2346_v8  ;;  %2044 = vrot.lane.b32.xlu0 %v1939_v59, %s5788_s16  ;;  %v2830_v49 = vsel %vm2553_vm10, %v2744_v56, %v9168_v34  ;;  %v1950_v18 = vor.u32 %v1948_v43, %v1946_v42  ;;  %v2647_v15 = vsel %vm2618_vm11, %v2573_v62, %v9172_v13 }
 0x391   : > { %2361 = vrot.lane.b32.xlu1 %v9166_v33, %s5788_s16  ;;  %v7673_v43 = vsel %vm1744_vm9, %v1942_v60, %v1946_v42  ;;  %v1960_v62 = vshll.u32 %v9161_v46, 16  ;;  %v9179_v60 = vld [vmem:[#allocation50_spill] sm:$0xff] }
 0x392   : > { %v2017_v25 = vpop.permute.xlu0 %2016 }
 0x393   : > { %v2449_v6 = vpop.permute.xlu1 %2448  ;;  %v7657_v8 = vpop.f32.mrb[80].mxu0 }
 0x394   : > { %9169 = vst [vmem:[#allocation41_spill] sm:$0xff] %v7657_v8  ;;  %v2900_v59 = vsel %vm2618_vm11, %v2830_v49, %v2449_v6  ;;  %2277 = vrot.lane.b32.xlu0 %v9161_v46, %s5786_s20  ;;  %v7662_v58 = vpop.f32.mrb[81].mxu0  ;;  %v9173_v6 = vld [vmem:[#allocation12_spill] sm:$0xff]  ;;  %v9175_v8 = vld [vmem:[#allocation58_spill] sm:$0xff] }
 0x395   : > { %9170 = vst [vmem:[#allocation33_spill] sm:$0xff] %v7662_v58  ;;  %3291 = vmatprep.mubr.bf16.mxu1 %v2900_v59  ;;  %2421 = vrot.lane.b32.xlu1 %v9171_v32, %s5785_s19  ;;  %v5462_v12 = vpop.f32.mrb[82].mxu0  ;;  %v2510_v34 = vsel %vm810_vm1, %v9173_v6, %v2017_v25  ;;  %v9174_v59 = vld [vmem:[#allocation68_spill] sm:$0xff]  ;;  %v1956_v25 = vshrl.u32 %v9146_v31, 16  ;;  %v9184_v31 = vld [vmem:[#allocation70_spill] sm:$0xff] }
 0x396   : > { %3292 = vmatmul.mubr.bf16.gmra.mrb[36].mxu1 %v2647_v15  ;;  %v7668_v56 = vpop.permute.xlu0 %2261  ;;  %v3644_v27 = vpop.f32.mrb[83].mxu0  ;;  %v2747_v58 = vsel %vm810_vm1, %v9175_v8, %v9174_v59  ;;  %v7682_v15 = vsel %vm1744_vm9, %v1950_v18, %v1954_v30  ;;  %v9177_v12 = vld [vmem:[#allocation62_spill] sm:$0xff] }
 0x397   : > { %v2408_v49 = vpop.permute.xlu1 %2407  ;;  %9176 = vst [vmem:[#allocation10_spill] sm:$0xff] %v7682_v15  ;;  %v2575_v42 = vsel %vm2553_vm10, %v2510_v34, %v9177_v12  ;;  %v2832_v18 = vsel %vm2553_vm10, %v2747_v58, %v9179_v60  ;;  %v1958_v6 = vor.u32 %v1956_v25, %v1954_v30  ;;  %v9181_v34 = vld [vmem:[#allocation31_spill] sm:$0xff]  ;;  %v1962_v60 = vrot.slane %v1960_v62, 1  ;;  %v9186_v62 = vld [vmem:[#allocation65_spill] sm:$0xff] }
 0x398   : > { %v7679_v7 = vsel %vm2553_vm10, %v2774_v1, %v2408_v49  ;;  %2046 = vrot.lane.b32.xlu0 %v7673_v43, %s5788_s16  ;;  %v9182_v49 = vld [vmem:[#allocation42_spill] sm:$0xff] }
 0x399   : > { %2474 = vrot.lane.b32.xlu1 %v7682_v15, %s5786_s20  ;;  %v2650_v59 = vsel %vm2618_vm11, %v2575_v42, %v9182_v49  ;;  %v1964_v49 = vshrl.u32 %v9161_v46, 16 }
 0x39a   : > { %v2019_v45 = vpop.permute.xlu0 %2018 }
 0x39b   : > { %v2451_v8 = vpop.permute.xlu1 %2450  ;;  %v7692_v1 = vpop.f32.mrb[84].mxu0 }
 0x39c   : > { %9178 = vst [vmem:[#allocation63_spill] sm:$0xff] %v7692_v1  ;;  %v2903_v13 = vsel %vm2618_vm11, %v2832_v18, %v2451_v8  ;;  %2215 = vrot.lane.b32.xlu0 %v9166_v33, %s5785_s19  ;;  %v7699_v27 = vpop.f32.mrb[85].mxu0  ;;  %v9183_v8 = vld [vmem:[#allocation13_spill] sm:$0xff] }
 0x39d   : > { %9180 = vst [vmem:[#allocation43_spill] sm:$0xff] %v7699_v27  ;;  %3298 = vmatprep.mubr.bf16.mxu1 %v2903_v13  ;;  %2363 = vrot.lane.b32.xlu1 %v9181_v34, %s5788_s16  ;;  %v5466_v12 = vpop.f32.mrb[86].mxu0  ;;  %v2512_v18 = vsel %vm810_vm1, %v9183_v8, %v2019_v45  ;;  %v9185_v27 = vld [vmem:[#allocation60_spill] sm:$0xff]  ;;  %v7715_v13 = vsel %vm1744_vm9, %v1958_v6, %v1962_v60 }
 0x39e   : > { %3299 = vmatmul.mubr.bf16.gmra.mrb[40].mxu1 %v2650_v59  ;;  %v7705_v1 = vpop.permute.xlu0 %2199  ;;  %v3658_v58 = vpop.f32.mrb[87].mxu0  ;;  %v2750_v30 = vsel %vm810_vm1, %v9185_v27, %v9184_v31  ;;  %v2577_v45 = vsel %vm2553_vm10, %v2512_v18, %v9186_v62  ;;  %v1968_v31 = vshll.u32 %v9171_v32, 16  ;;  %v1966_v8 = vor.u32 %v1964_v49, %v1962_v60  ;;  %v9190_v18 = vld [vmem:[#allocation28_spill] sm:$0xff] }
 0x39f   : > { %v2348_v33 = vpop.permute.xlu1 %2347 }
 0x3a0   : > { %v2777_v25 = vsel %vm810_vm1, %v7513_v16, %v2348_v33  ;;  %2048 = vrot.lane.b32.xlu0 %v7682_v15, %s5788_s16  ;;  %v9188_v16 = vld [vmem:[#allocation51_spill] sm:$0xff]  ;;  %v9191_v33 = vld [vmem:[#allocation45_spill] sm:$0xff] }
 0x3a1   : > { %2476 = vrot.lane.b32.xlu1 %v7715_v13, %s5786_s20  ;;  %v2834_v6 = vsel %vm2553_vm10, %v2750_v30, %v9188_v16  ;;  %v2653_v62 = vsel %vm2618_vm11, %v2577_v45, %v9191_v33  ;;  %v1970_v16 = vrot.slane %v1968_v31, 1  ;;  %v9194_v45 = vld [vmem:[#allocation67_spill] sm:$0xff]  ;;  %v1972_v31 = vshrl.u32 %v9171_v32, 16 }
 0x3a2   : > { %v2021_v42 = vpop.permute.xlu0 %2020 }
 0x3a3   : > { %v2453_v27 = vpop.permute.xlu1 %2452  ;;  %v7725_v59 = vpop.f32.mrb[88].mxu0 }
 0x3a4   : > { %9187 = vst [vmem:[#allocation26_spill] sm:$0xff] %v7725_v59  ;;  %v2906_v12 = vsel %vm2618_vm11, %v2834_v6, %v2453_v27  ;;  %2279 = vrot.lane.b32.xlu0 %v9171_v32, %s5786_s20  ;;  %v7732_v58 = vpop.f32.mrb[89].mxu0  ;;  %v9192_v27 = vld [vmem:[#allocation15_spill] sm:$0xff] }
 0x3a5   : > { %9189 = vst [vmem:[#allocation59_spill] sm:$0xff] %v7732_v58  ;;  %3305 = vmatprep.mubr.bf16.mxu1 %v2906_v12  ;;  %2423 = vrot.lane.b32.xlu1 %v9190_v18, %s5785_s19  ;;  %v5470_v46 = vpop.f32.mrb[90].mxu0  ;;  %v2514_v6 = vsel %vm810_vm1, %v9192_v27, %v2021_v42  ;;  %v9193_v58 = vld [vmem:[#allocation64_spill] sm:$0xff]  ;;  %v7749_v12 = vsel %vm1744_vm9, %v1966_v8, %v1970_v16 }
 0x3a6   : > { %3306 = vmatmul.mubr.bf16.gmra.mrb[44].mxu1 %v2653_v62  ;;  %v7738_v59 = vpop.permute.xlu0 %2263  ;;  %v3672_v30 = vpop.f32.mrb[91].mxu0  ;;  %v2753_v60 = vsel %vm810_vm1, %v9193_v58, %v7302_v38  ;;  %v2579_v42 = vsel %vm2553_vm10, %v2514_v6, %v9194_v45  ;;  %v1976_v38 = vshll.u32 %v9190_v18, 16  ;;  %v9197_v27 = vld [vmem:[#allocation32_spill] sm:$0xff]  ;;  %v9198_v6 = vld [vmem:[#allocation47_spill] sm:$0xff] }
 0x3a7   : > { %v2410_v15 = vpop.permute.xlu1 %2409  ;;  %v1974_v30 = vor.u32 %v1972_v31, %v1970_v16  ;;  %v2656_v45 = vsel %vm2618_vm11, %v2579_v42, %v9198_v6  ;;  %v2756_v16 = vsel %vm810_vm1, %v7277_v44, %v7319_v57  ;;  %v9201_v44 = vld [vmem:[#allocation29_spill] sm:$0xff] }
 0x3a8   : > { %v7746_v49 = vsel %vm2553_vm10, %v2777_v25, %v2410_v15  ;;  %2050 = vrot.lane.b32.xlu0 %v7715_v13, %s5788_s16  ;;  %v9196_v25 = vld [vmem:[#allocation52_spill] sm:$0xff]  ;;  %v1984_v57 = vshll.u32 %v9201_v44, 16 }
 0x3a9   : > { %2478 = vrot.lane.b32.xlu1 %v7749_v12, %s5786_s20  ;;  %v2836_v8 = vsel %vm2553_vm10, %v2753_v60, %v9196_v25  ;;  %v1978_v25 = vrot.slane %v1976_v38, 1 }
 0x3aa   : > { %v2023_v46 = vpop.permute.xlu0 %2022 }
 0x3ab   : > { %v2455_v58 = vpop.permute.xlu1 %2454  ;;  %v7759_v15 = vpop.f32.mrb[92].mxu0  ;;  %v7784_v42 = vsel %vm1744_vm9, %v1974_v30, %v1978_v25 }
 0x3ac   : > { %9195 = vst [vmem:[#allocation54_spill] sm:$0xff] %v7759_v15  ;;  %v2909_v33 = vsel %vm2618_vm11, %v2836_v8, %v2455_v58  ;;  %2217 = vrot.lane.b32.xlu0 %v9181_v34, %s5785_s19  ;;  %v7766_v62 = vpop.f32.mrb[93].mxu0  ;;  %v9199_v58 = vld [vmem:[#allocation16_spill] sm:$0xff] }
 0x3ad   : > { %3312 = vmatprep.mubr.bf16.mxu1 %v2909_v33  ;;  %2365 = vrot.lane.b32.xlu1 %v9197_v27, %s5788_s16  ;;  %v5474_v32 = vpop.f32.mrb[94].mxu0  ;;  %v2516_v8 = vsel %vm810_vm1, %v9199_v58, %v2023_v46  ;;  %v9200_v46 = vld [vmem:[#allocation69_spill] sm:$0xff]  ;;  %v1980_v33 = vshrl.u32 %v9190_v18, 16 }
 0x3ae   : > { %3313 = vmatmul.mubr.bf16.gmra.mrb[48].mxu1 %v2656_v45  ;;  %v7772_v15 = vpop.permute.xlu0 %2201  ;;  %v3686_v60 = vpop.f32.mrb[95].mxu0  ;;  %v2581_v38 = vsel %vm2553_vm10, %v2516_v8, %v9200_v46  ;;  %v9203_v46 = vld [vmem:[#allocation17_spill] sm:$0xff] }
 0x3af   : > { %v2350_v34 = vpop.permute.xlu1 %2349  ;;  %v1982_v60 = vor.u32 %v1980_v33, %v1978_v25  ;;  %v2659_v58 = vsel %vm2618_vm11, %v2581_v38, %v7332_v39  ;;  %v2762_v25 = vsel %vm810_vm1, %v7341_v2, %v7400_v19  ;;  %v2759_v39 = vsel %vm810_vm1, %v7306_v29, %v7337_v11  ;;  %v9204_v2 = vld [vmem:[#allocation34_spill] sm:$0xff]  ;;  %v9205_v11 = vld [vmem:[#allocation35_spill] sm:$0xff] }
 0x3b0   : > { %v7781_v31 = vsel %vm810_vm1, %v7545_v54, %v2350_v34  ;;  %2052 = vrot.lane.b32.xlu0 %v7749_v12, %s5788_s16  ;;  %v9202_v54 = vld [vmem:[#allocation53_spill] sm:$0xff]  ;;  %v1986_v34 = vrot.slane %v1984_v57, 1  ;;  %v1988_v57 = vshrl.u32 %v9201_v44, 16  ;;  %v1992_v19 = vshll.u32 %v9204_v2, 16 }
 0x3b1   : > { %2480 = vrot.lane.b32.xlu1 %v7784_v42, %s5786_s20  ;;  %v2838_v45 = vsel %vm2553_vm10, %v2756_v16, %v9202_v54 }
 0x3b2   : > { %v2025_v32 = vpop.permute.xlu0 %2024  ;;  %v7813_v33 = vsel %vm1744_vm9, %v1982_v60, %v1986_v34  ;;  %v1990_v29 = vor.u32 %v1988_v57, %v1986_v34 }
 0x3b3   : > { %v2457_v6 = vpop.permute.xlu1 %2456  ;;  %v2518_v16 = vsel %vm810_vm1, %v9203_v46, %v2025_v32  ;;  %v1994_v46 = vrot.slane %v1992_v19, 1 }
 0x3b4   : > { %v2912_v30 = vsel %vm2618_vm11, %v2838_v45, %v2457_v6  ;;  %2281 = vrot.lane.b32.xlu0 %v9190_v18, %s5786_s20  ;;  %v2583_v38 = vsel %vm2553_vm10, %v2518_v16, %v7361_v20  ;;  %v2840_v6 = vsel %vm2553_vm10, %v2759_v39, %v7349_v36  ;;  %v9206_v16 = vld [vmem:[#allocation18_spill] sm:$0xff] }
 0x3b5   : > { %3319 = vmatprep.mubr.bf16.mxu1 %v2912_v30  ;;  %2425 = vrot.lane.b32.xlu1 %v9201_v44, %s5785_s19  ;;  %v2841_v30 = vsel %vm2553_vm10, %v2762_v25, %v9141_v28  ;;  %v2662_v20 = vsel %vm2618_vm11, %v2583_v38, %v7395_v22  ;;  %v2299_v38 = vshrl.u32 %v9204_v2, 16 }
 0x3b6   : > { %3320 = vmatmul.mubr.bf16.gmra.mrb[52].mxu1 %v2659_v58  ;;  %v7803_v8 = vpop.permute.xlu0 %2265  ;;  %v2917_v36 = vsel %vm2618_vm11, %v2841_v30, %v9143_v63 }
 0x3b7   : > { %v7807_v54 = vpop.permute.xlu1 %2411  ;;  %v2301_v57 = vor.u32 %v2299_v38, %v1994_v46 }
 0x3b8   : > { %2054 = vrot.lane.b32.xlu0 %v7784_v42, %s5788_s16 }
 0x3b9   : > { %2482 = vrot.lane.b32.xlu1 %v7813_v33, %s5786_s20  ;;  %v7873_v30 = vsel %vm1744_vm9, %v2301_v57, %v6233_v5 }
 0x3ba   : > { %v2027_v32 = vpop.permute.xlu0 %2026 }
 0x3bb   : > { %v2459_v45 = vpop.permute.xlu1 %2458  ;;  %v2520_v25 = vsel %vm810_vm1, %v9206_v16, %v2027_v32 }
 0x3bc   : > { %v2915_v60 = vsel %vm2618_vm11, %v2840_v6, %v2459_v45  ;;  %2219 = vrot.lane.b32.xlu0 %v9197_v27, %s5785_s19  ;;  %v7846_v27 = vsel %vm1744_vm9, %v1990_v29, %v1994_v46  ;;  %v2585_v34 = vsel %vm2553_vm10, %v2520_v25, %v7424_v52  ;;  %v2522_v52 = vsel %vm810_vm1, 0, %v7602_v0 }
 0x3bd   : > { %3326 = vmatprep.mubr.bf16.mxu1 %v2915_v60  ;;  %2367 = vrot.lane.b32.xlu1 %v9205_v11, %s5788_s16  ;;  %v2665_v19 = vsel %vm2618_vm11, %v2585_v34, %v7436_v17  ;;  %v2765_v17 = vsel %vm810_vm1, %v7403_v10, %v7459_v3  ;;  %v2587_v60 = vsel %vm2553_vm10, %v2522_v52, %v7472_v21 }
 0x3be   : > { %3327 = vmatmul.mubr.bf16.gmra.mrb[56].mxu1 %v2662_v20  ;;  %v7837_v58 = vpop.permute.xlu0 %2203  ;;  %v2843_v29 = vsel %vm2553_vm10, %v2765_v17, %v7494_v4  ;;  %v2668_v10 = vsel %vm2618_vm11, %v2587_v60, %v7505_v37  ;;  %v2768_v4 = vsel %vm810_vm1, %v7408_v23, %v7526_v51 }
 0x3bf   : > { %v7843_v39 = vpop.permute.xlu1 %2351  ;;  %3333 = vmatprep.mubr.bf16.mxu1 %v2917_v36  ;;  %v9207_v36 = vld [vmem:[#allocation36_spill] sm:$0xff]  ;;  %v2845_v37 = vsel %vm2553_vm10, %v2768_v4, %v7561_v55 }
 0x3c0   : > { %2056 = vrot.lane.b32.xlu0 %v7813_v33, %s5788_s16 }
 0x3c1   : > { %2484 = vrot.lane.b32.xlu1 %v7846_v27, %s5786_s20 }
 0x3c2   : > { %v7852_v22 = vpop.permute.xlu0 %2267 }
 0x3c3   : > { %v7857_v32 = vpop.permute.xlu1 %2413 }
 0x3c4   : > { %2283 = vrot.lane.b32.xlu0 %v9201_v44, %s5786_s20 }
 0x3c5   : > { %2427 = vrot.lane.b32.xlu1 %v9204_v2, %s5785_s19 }
 0x3c6   : > { %3334 = vmatmul.mubr.bf16.gmra.mrb[60].mxu1 %v2665_v19  ;;  %v7865_v6 = vpop.permute.xlu0 %2269 }
 0x3c7   : > { %v7869_v45 = vpop.permute.xlu1 %2353 }
 0x3c8   : > { %2058 = vrot.lane.b32.xlu0 %v7846_v27, %s5788_s16 }
 0x3c9   : > { %2486 = vrot.lane.b32.xlu1 %v7873_v30, %s5786_s20 }
 0x3ca   : > { %v2031_v0 = vpop.permute.xlu0 %2030 }
 0x3cb   : > { %v2461_v20 = vpop.permute.xlu1 %2460  ;;  %v2524_v21 = vsel %vm810_vm1, %v7067_v24, %v2031_v0 }
 0x3cc   : > { %v2920_v5 = vsel %vm2618_vm11, %v2843_v29, %v2461_v20  ;;  %2285 = vrot.lane.b32.xlu0 %v9204_v2, %s5786_s20  ;;  %v2589_v16 = vsel %vm2553_vm10, %v2524_v21, %v7540_v40  ;;  %s5248_s20 = sshll.u32 %s5878_s25, 12 }
 0x3cd   : > { %3340 = vmatprep.mubr.bf16.mxu1 %v2920_v5  ;;  %2369 = vrot.lane.b32.xlu1 %v9207_v36, %s5788_s16  ;;  %v2671_v34 = vsel %vm2618_vm11, %v2589_v16, %v7555_v41  ;;  %s8867_s26 = scalar_lea.hbm %s8942_s12, %s5248_s20 }
 0x3ce   : > { %3341 = vmatmul.mubr.bf16.gmra.mrb[64].mxu1 %v2668_v10  ;;  %v2033_v3 = vpop.permute.xlu0 %2032 }
 0x3cf   : > { %v7895_v46 = vpop.permute.xlu1 %2205  ;;  %v2526_v23 = vsel %vm810_vm1, %v6661_v61, %v2033_v3  ;;  %v2853_v3 = vsel %vm2553_vm10, %v7781_v31, %v7807_v54  ;;  %v9209_v31 = vld [vmem:[#allocation38_spill] sm:$0xff] }
 0x3d0   : > { %v2591_v40 = vsel %vm2553_vm10, %v2526_v23, %v7573_v47  ;;  %v2783_v54 = vsel %vm810_vm1, %v9209_v31, %v7843_v39 }
 0x3d1   : > { %2221 = vrot.lane.b32.xlu1 %v9205_v11, %s5785_s19  ;;  %v2674_v41 = vsel %vm2618_vm11, %v2591_v40, %v7586_v9  ;;  %s8757_s19 = sshll.u32 %s407_s30, 8 }
 0x3d2   : > { %v7902_v2 = vpop.permute.xlu0 %2207 }
 0x3d3   : > { %v2463_v25 = vpop.permute.xlu1 %2462 }
 0x3d4   : > { %v2923_v24 = vsel %vm2618_vm11, %v2845_v37, %v2463_v25 }
 0x3d5   : > { %3347 = vmatprep.mubr.bf16.mxu1 %v2923_v24 }
 0x3d6   : > { %3348 = vmatmul.mubr.bf16.gmra.mrb[68].mxu1 %v2671_v34  ;;  %v7911_v11 = vpop.permute.xlu0 %2271 }
 0x3d7   : > { %v7915_v51 = vpop.permute.xlu1 %2355 }
 0x3da   : > { %v2035_v38 = vpop.permute.xlu0 %2034 }
 0x3db   : > { %v2465_v55 = vpop.permute.xlu1 %2464  ;;  %v2528_v52 = vsel %vm810_vm1, %v6671_v53, %v2035_v38 }
 0x3dc   : > { %v2926_v57 = vsel %vm2618_vm11, %v7610_v26, %v2465_v55  ;;  %v2593_v9 = vsel %vm2553_vm10, %v2528_v52, %v7636_v50  ;;  %v9210_v55 = vld [vmem:[#allocation20_spill] sm:$0xff] }
 0x3dd   : > { %3354 = vmatprep.mubr.bf16.mxu1 %v2926_v57  ;;  %v2677_v53 = vsel %vm2618_vm11, %v2593_v9, %v7668_v56 }
 0x3de   : > { %3355 = vmatmul.mubr.bf16.gmra.mrb[72].mxu1 %v2674_v41  ;;  %v2037_v19 = vpop.permute.xlu0 %2036 }
 0x3df   : > { %v2416_v61 = vpop.permute.xlu1 %2415  ;;  %v2530_v17 = vsel %vm810_vm1, %v6709_v14, %v2037_v19 }
 0x3e0   : > { %v2595_v47 = vsel %vm2553_vm10, %v2530_v17, %v7705_v1 }
 0x3e1   : > { %v2680_v60 = vsel %vm2618_vm11, %v2595_v47, %v7738_v59 }
 0x3e2   : > { %v7931_v26 = vpop.permute.xlu0 %2209 }
 0x3e3   : > { %v2467_v0 = vpop.permute.xlu1 %2466 }
 0x3e4   : > { %v2929_v29 = vsel %vm2618_vm11, %v7679_v7, %v2467_v0 }
 0x3e5   : > { %3361 = vmatprep.mubr.bf16.mxu1 %v2929_v29 }
 0x3e6   : > { %3362 = vmatmul.mubr.bf16.gmra.mrb[76].mxu1 %v2677_v53  ;;  %v7939_v14 = vpop.permute.xlu0 %2273 }
 0x3e7   : > { %v2358_v1 = vpop.permute.xlu1 %2357 }
 0x3ea   : > { %v2039_v20 = vpop.permute.xlu0 %2038 }
 0x3eb   : > { %v2469_v5 = vpop.permute.xlu1 %2468  ;;  %v2532_v36 = vsel %vm810_vm1, %v9099_v35, %v2039_v20 }
 0x3ec   : > { %v2932_v59 = vsel %vm2618_vm11, %v7746_v49, %v2469_v5  ;;  %v2597_v56 = vsel %vm2553_vm10, %v2532_v36, %v7772_v15  ;;  %v9208_v15 = vld [vmem:[#allocation23_spill] sm:$0xff] }
 0x3ed   : > { %3368 = vmatprep.mubr.bf16.mxu1 %v2932_v59  ;;  %v2683_v49 = vsel %vm2618_vm11, %v2597_v56, %v7803_v8  ;;  %v2786_v25 = vsel %vm810_vm1, %v9208_v15, %v7869_v45  ;;  %v2855_v8 = vsel %vm2553_vm10, %v2783_v54, %v7857_v32  ;;  %v9211_v5 = vld [vmem:[#allocation79_spill] sm:$0xff]  ;;  %v9214_v15 = vld [vmem:[#allocation72_spill] sm:$0xff] }
 0x3ee   : > { %3369 = vmatmul.mubr.bf16.gmra.mrb[80].mxu1 %v2680_v60  ;;  %v2041_v50 = vpop.permute.xlu0 %2040  ;;  %v2789_v60 = vsel %vm810_vm1, %v7673_v43, %v7915_v51  ;;  %v9212_v43 = vld [vmem:[#allocation10_spill] sm:$0xff] }
 0x3ef   : > { %v2418_v7 = vpop.permute.xlu1 %2417  ;;  %v2534_v35 = vsel %vm810_vm1, %v6757_v48, %v2041_v50  ;;  %v2856_v48 = vsel %vm2553_vm10, %v2786_v25, %v9141_v28  ;;  %v2858_v29 = vsel %vm2553_vm10, %v2789_v60, %v2416_v61  ;;  %v2792_v51 = vsel %vm810_vm1, %v9212_v43, %v2358_v1 }
 0x3f0   : > { %v2599_v34 = vsel %vm2553_vm10, %v2534_v35, %v7837_v58  ;;  %v2940_v39 = vsel %vm2618_vm11, %v2856_v48, %v9143_v63  ;;  %v2860_v36 = vsel %vm2553_vm10, %v2792_v51, %v2418_v7 }
 0x3f1   : > { %v2686_v45 = vsel %vm2618_vm11, %v2599_v34, %v7852_v22 }
 0x3f2   : > { %v7945_v10 = vpop.permute.xlu0 %2211 }
 0x3f3   : > { %v2471_v21 = vpop.permute.xlu1 %2470 }
 0x3f4   : > { %v2935_v4 = vsel %vm2618_vm11, %v2853_v3, %v2471_v21 }
 0x3f5   : > { %3375 = vmatprep.mubr.bf16.mxu1 %v2935_v4  ;;  %v9213_v4 = vld [vmem:[#allocation21_spill] sm:$0xff] }
 0x3f6   : > { %3376 = vmatmul.mubr.bf16.gmra.mrb[84].mxu1 %v2683_v49  ;;  %v7955_v16 = vpop.permute.xlu0 %2275 }
 0x3f7   : > { %v2360_v37 = vpop.permute.xlu1 %2359 }
 0x3f8   : > { %v2795_v7 = vsel %vm810_vm1, %v7715_v13, %v2360_v37 }
 0x3fa   : > { %v2043_v24 = vpop.permute.xlu0 %2042 }
 0x3fb   : > { %v2473_v23 = vpop.permute.xlu1 %2472  ;;  %v2536_v58 = vsel %vm810_vm1, %v9210_v55, %v2043_v24 }
 0x3fc   : > { %v2938_v38 = vsel %vm2618_vm11, %v2855_v8, %v2473_v23  ;;  %v2601_v41 = vsel %vm2553_vm10, %v2536_v58, %v7895_v46 }
 0x3fd   : > { %3382 = vmatprep.mubr.bf16.mxu1 %v2938_v38  ;;  %v2689_v52 = vsel %vm2618_vm11, %v2601_v41, %v7865_v6 }
 0x3fe   : > { %3383 = vmatmul.mubr.bf16.gmra.mrb[88].mxu1 %v2686_v45  ;;  %v2214_v40 = vpop.permute.xlu0 %2213  ;;  %v9215_v45 = vld [vmem:[#allocation22_spill] sm:$0xff] }
 0x3ff   : > { %v2420_v57 = vpop.permute.xlu1 %2419  ;;  %3389 = vmatprep.mubr.bf16.mxu1 %v2940_v39 }
 0x402   : > { %v2045_v32 = vpop.permute.xlu0 %2044 }
 0x403   : > { %v2362_v19 = vpop.permute.xlu1 %2361  ;;  %v2538_v17 = vsel %vm810_vm1, 0, %v2045_v32 }
 0x404   : > { %v2603_v9 = vsel %vm2553_vm10, %v2538_v17, %v7902_v2  ;;  %v2798_v39 = vsel %vm810_vm1, %v7749_v12, %v2362_v19  ;;  %v9216_v17 = vld [vmem:[#allocation24_spill] sm:$0xff] }
 0x405   : > { %v2692_v6 = vsel %vm2618_vm11, %v2603_v9, %v7911_v11  ;;  %v9217_v9 = vld [vmem:[#allocation71_spill] sm:$0xff] }
 0x406   : > { %3390 = vmatmul.mubr.bf16.gmra.mrb[92].mxu1 %v2689_v52  ;;  %v2278_v22 = vpop.permute.xlu0 %2277 }
 0x407   : > { %v2422_v47 = vpop.permute.xlu1 %2421 }
 0x408   : > { %v2864_v58 = vsel %vm2553_vm10, %v2798_v39, %v2422_v47 }
 0x40a   : > { %v2047_v0 = vpop.permute.xlu0 %2046 }
 0x40b   : > { %v2475_v46 = vpop.permute.xlu1 %2474  ;;  %v2540_v59 = vsel %vm810_vm1, %v9211_v5, %v2047_v0 }
 0x40c   : > { %v2943_v53 = vsel %vm2618_vm11, %v2858_v29, %v2475_v46  ;;  %v2605_v61 = vsel %vm2553_vm10, %v2540_v59, %v7931_v26 }
 0x40d   : > { %3396 = vmatprep.mubr.bf16.mxu1 %v2943_v53  ;;  %v2695_v11 = vsel %vm2618_vm11, %v2605_v61, %v7939_v14  ;;  %v2862_v14 = vsel %vm2553_vm10, %v2795_v7, %v2420_v57  ;;  %v9220_v7 = vld [vmem:[#allocation73_spill] sm:$0xff] }
 0x40e   : > { %3397 = vmatmul.mubr.bf16.gmra.mrb[96].mxu1 %v2692_v6  ;;  %v2216_v20 = vpop.permute.xlu0 %2215 }
 0x40f   : > { %v2364_v50 = vpop.permute.xlu1 %2363 }
 0x410   : > { %v2801_v47 = vsel %vm810_vm1, %v7784_v42, %v2364_v50 }
 0x412   : > { %v2049_v2 = vpop.permute.xlu0 %2048 }
 0x413   : > { %v2477_v56 = vpop.permute.xlu1 %2476  ;;  %v2542_v49 = vsel %vm810_vm1, %v9213_v4, %v2049_v2  ;;  %v9218_v2 = vld [vmem:[#allocation25_spill] sm:$0xff] }
 0x414   : > { %v2946_v3 = vsel %vm2618_vm11, %v2860_v36, %v2477_v56  ;;  %v2607_v24 = vsel %vm2553_vm10, %v2542_v49, %v7945_v10  ;;  %v9219_v36 = vld [vmem:[#allocation74_spill] sm:$0xff] }
 0x415   : > { %3403 = vmatprep.mubr.bf16.mxu1 %v2946_v3  ;;  %v2698_v48 = vsel %vm2618_vm11, %v2607_v24, %v7955_v16 }
 0x416   : > { %3404 = vmatmul.mubr.bf16.gmra.mrb[100].mxu1 %v2695_v11  ;;  %v2280_v21 = vpop.permute.xlu0 %2279 }
 0x417   : > { %v2424_v35 = vpop.permute.xlu1 %2423 }
 0x418   : > { %v3230_v1 = vpop.f32.mrb[0].mxu1 }
 0x419   : > { %v8005_v25 = vadd.f32 %v9214_v15, %v3230_v1  ;;  %v3232_v26 = vpop.f32.mrb[1].mxu1 }
 0x41a   : > { %v3233_v31 = vpop.f32.mrb[2].mxu1  ;;  %v2051_v54 = vpop.permute.xlu0 %2050 }
 0x41b   : > { %v2479_v34 = vpop.permute.xlu1 %2478  ;;  %v3234_v8 = vpop.f32.mrb[3].mxu1  ;;  %v2544_v13 = vsel %vm810_vm1, %v9215_v45, %v2051_v54 }
 0x41c   : > { %v2949_v23 = vsel %vm2618_vm11, %v2862_v14, %v2479_v34  ;;  %v2609_v55 = vsel %vm2553_vm10, %v2544_v13, %v2214_v40 }
 0x41d   : > { %3410 = vmatprep.mubr.bf16.mxu1 %v2949_v23  ;;  %v2701_v16 = vsel %vm2618_vm11, %v2609_v55, %v2278_v22  ;;  %v2866_v22 = vsel %vm2553_vm10, %v2801_v47, %v2424_v35  ;;  %v9221_v55 = vld [vmem:[#allocation76_spill] sm:$0xff] }
 0x41e   : > { %3411 = vmatmul.mubr.bf16.gmra.mrb[104].mxu1 %v2698_v48  ;;  %v2218_v38 = vpop.permute.xlu0 %2217 }
 0x41f   : > { %v2366_v37 = vpop.permute.xlu1 %2365 }
 0x420   : > { %v2804_v11 = vsel %vm810_vm1, %v7813_v33, %v2366_v37 }
 0x422   : > { %v2053_v10 = vpop.permute.xlu0 %2052 }
 0x423   : > { %v2481_v57 = vpop.permute.xlu1 %2480  ;;  %v2546_v60 = vsel %vm810_vm1, %v9216_v17, %v2053_v10 }
 0x424   : > { %v2952_v32 = vsel %vm2618_vm11, %v2864_v58, %v2481_v57  ;;  %v2611_v53 = vsel %vm2553_vm10, %v2546_v60, %v2216_v20 }
 0x425   : > { %3417 = vmatprep.mubr.bf16.mxu1 %v2952_v32  ;;  %v2704_v59 = vsel %vm2618_vm11, %v2611_v53, %v2280_v21 }
 0x426   : > { %v3237_v41 = vpop.f32.mrb[4].mxu1  ;;  %3418 = vmatmul.mubr.bf16.gmra.mrb[108].mxu1 %v2701_v16  ;;  %v2282_v52 = vpop.permute.xlu0 %2281 }
 0x427   : > { %v8026_v0 = vadd.f32 %v9217_v9, %v3237_v41  ;;  %v3239_v12 = vpop.f32.mrb[5].mxu1  ;;  %v2426_v19 = vpop.permute.xlu1 %2425 }
 0x428   : > { %v3240_v40 = vpop.f32.mrb[6].mxu1  ;;  %v2868_v21 = vsel %vm2553_vm10, %v2804_v11, %v2426_v19 }
 0x429   : > { %v3241_v29 = vpop.f32.mrb[7].mxu1 }
 0x42a   : > { %v2055_v46 = vpop.permute.xlu0 %2054 }
 0x42b   : > { %v2483_v6 = vpop.permute.xlu1 %2482  ;;  %v2548_v61 = vsel %vm810_vm1, %v9218_v2, %v2055_v46 }
 0x42c   : > { %v2955_v5 = vsel %vm2618_vm11, %v2866_v22, %v2483_v6  ;;  %v2613_v49 = vsel %vm2553_vm10, %v2548_v61, %v2218_v38 }
 0x42d   : > { %3424 = vmatprep.mubr.bf16.mxu1 %v2955_v5  ;;  %v2707_v15 = vsel %vm2618_vm11, %v2613_v49, %v2282_v52 }
 0x42e   : > { %v3244_v43 = vpop.f32.mrb[8].mxu1  ;;  %3425 = vmatmul.mubr.bf16.gmra.mrb[112].mxu1 %v2704_v59  ;;  %v2220_v51 = vpop.permute.xlu0 %2219 }
 0x42f   : > { %v8037_v56 = vadd.f32 %v9219_v36, %v3244_v43  ;;  %v3246_v42 = vpop.f32.mrb[9].mxu1  ;;  %v2368_v50 = vpop.permute.xlu1 %2367  ;;  %v9224_v43 = vld [vmem:[#allocation77_spill] sm:$0xff] }
 0x430   : > { %v3247_v20 = vpop.f32.mrb[10].mxu1  ;;  %v2807_v23 = vsel %vm810_vm1, %v7846_v27, %v2368_v50  ;;  %v9225_v50 = vld [vmem:[#allocation81_spill] sm:$0xff] }
 0x431   : > { %v3248_v3 = vpop.f32.mrb[11].mxu1 }
 0x432   : > { %v2057_v4 = vpop.permute.xlu0 %2056 }
 0x433   : > { %v2485_v35 = vpop.permute.xlu1 %2484  ;;  %v2550_v34 = vsel %vm810_vm1, %v9190_v18, %v2057_v4 }
 0x434   : > { %v2958_v1 = vsel %vm2618_vm11, %v2868_v21, %v2485_v35  ;;  %v2615_v13 = vsel %vm2553_vm10, %v2550_v34, %v2220_v51  ;;  %v9226_v21 = vld [vmem:[#allocation80_spill] sm:$0xff] }
 0x435   : > { %3431 = vmatprep.mubr.bf16.mxu1 %v2958_v1 }
 0x436   : > { %v3251_v26 = vpop.f32.mrb[12].mxu1  ;;  %3432 = vmatmul.mubr.bf16.gmra.mrb[116].mxu1 %v2707_v15  ;;  %v2284_v14 = vpop.permute.xlu0 %2283 }
 0x437   : > { %v8046_v31 = vadd.f32 %v9220_v7, %v3251_v26  ;;  %v3253_v54 = vpop.f32.mrb[13].mxu1  ;;  %v2428_v24 = vpop.permute.xlu1 %2427  ;;  %v2710_v37 = vsel %vm2618_vm11, %v2615_v13, %v2284_v14 }
 0x438   : > { %v3254_v33 = vpop.f32.mrb[14].mxu1  ;;  %v2870_v48 = vsel %vm2553_vm10, %v2807_v23, %v2428_v24  ;;  %v9227_v54 = vld [vmem:[#allocation83_spill] sm:$0xff]  ;;  %v9228_v23 = vld [vmem:[#allocation82_spill] sm:$0xff] }
 0x439   : > { %v3255_v8 = vpop.f32.mrb[15].mxu1 }
 0x43a   : > { %v2059_v39 = vpop.permute.xlu0 %2058 }
 0x43b   : > { %v2487_v38 = vpop.permute.xlu1 %2486  ;;  %v2552_v17 = vsel %vm810_vm1, %v9201_v44, %v2059_v39  ;;  %v9229_v39 = vld [vmem:[#allocation84_spill] sm:$0xff] }
 0x43c   : > { %v2961_v45 = vsel %vm2618_vm11, %v2870_v48, %v2487_v38 }
 0x43d   : > { %3438 = vmatprep.mubr.bf16.mxu1 %v2961_v45 }
 0x43e   : > { %v3258_v10 = vpop.f32.mrb[16].mxu1  ;;  %3439 = vmatmul.mubr.bf16.gmra.mrb[120].mxu1 %v2710_v37  ;;  %v2286_v9 = vpop.permute.xlu0 %2285 }
 0x43f   : > { %v8057_v58 = vadd.f32 %v9221_v55, %v3258_v10  ;;  %v3260_v18 = vpop.f32.mrb[17].mxu1  ;;  %v2370_v57 = vpop.permute.xlu1 %2369 }
 0x440   : > { %v2810_v27 = vsel %vm810_vm1, %v7873_v30, %v2370_v57  ;;  %v3261_v32 = vpop.f32.mrb[18].mxu1  ;;  %v9222_v30 = vld [vmem:[#allocation75_spill] sm:$0xff] }
 0x441   : > { %v3262_v16 = vpop.f32.mrb[19].mxu1  ;;  %v2871_v41 = vsel %vm2553_vm10, %v2810_v27, %v9141_v28  ;;  %v9230_v32 = vld [vmem:[#allocation37_spill] sm:$0xff] }
 0x442   : > { %v2963_v52 = vsel %vm2618_vm11, %v2871_v41, %v9143_v63  ;;  %v9223_v63 = vld [vmem:[#allocation78_spill] sm:$0xff] }
 0x443   : > { %v2222_v60 = vpop.permute.xlu1 %2221  ;;  %3445 = vmatprep.mubr.bf16.mxu1 %v2963_v52 }
 0x444   : > { %v2617_v12 = vsel %vm2553_vm10, %v2552_v17, %v2222_v60  ;;  %v8096_v60 = vpop.f32.mrb[96].mxu0 }
 0x445   : > { %v2713_v19 = vsel %vm2618_vm11, %v2617_v12, %v2286_v9  ;;  %v8098_v12 = vpop.f32.mrb[97].mxu0 }
 0x446   : > { %v3265_v40 = vpop.f32.mrb[20].mxu1  ;;  %3446 = vmatmul.mubr.bf16.gmra.mrb[124].mxu1 %v2713_v19  ;;  %v9231_v19 = vld [vmem:[#allocation44_spill] sm:$0xff] }
 0x447   : > { %v8070_v29 = vadd.f32 %v9222_v30, %v3265_v40  ;;  %v3267_v47 = vpop.f32.mrb[21].mxu1 }
 0x448   : > { %v3268_v28 = vpop.f32.mrb[22].mxu1  ;;  %v5478_v47 = vpop.f32.mrb[98].mxu0 }
 0x449   : > { %v3269_v46 = vpop.f32.mrb[23].mxu1 }
 0x44a   : > { %v3700_v46 = vpop.f32.mrb[99].mxu0 }
 0x44e   : > { %v3272_v53 = vpop.f32.mrb[24].mxu1 }
 0x44f   : > { %v8073_v22 = vadd.f32 %v9223_v63, %v3272_v53  ;;  %v3274_v44 = vpop.f32.mrb[25].mxu1 }
 0x450   : > { %v3275_v6 = vpop.f32.mrb[26].mxu1  ;;  %v9232_v44 = vld [vmem:[#allocation56_spill] sm:$0xff] }
 0x451   : > { %v3276_v5 = vpop.f32.mrb[27].mxu1 }
 0x456   : > { %v3279_v59 = vpop.f32.mrb[28].mxu1 }
 0x457   : > { %v8076_v51 = vadd.f32 %v9224_v43, %v3279_v59  ;;  %v3281_v2 = vpop.f32.mrb[29].mxu1 }
 0x458   : > { %v3282_v61 = vpop.f32.mrb[30].mxu1 }
 0x459   : > { %v3283_v36 = vpop.f32.mrb[31].mxu1  ;;  %v9233_v61 = vld [vmem:[#allocation40_spill] sm:$0xff] }
 0x461   : > { %v3286_v42 = vpop.f32.mrb[32].mxu1 }
 0x462   : > { %v8079_v20 = vadd.f32 %v9225_v50, %v3286_v42  ;;  %v3288_v3 = vpop.f32.mrb[33].mxu1 }
 0x463   : > { %v3289_v11 = vpop.f32.mrb[34].mxu1 }
 0x464   : > { %v3290_v4 = vpop.f32.mrb[35].mxu1 }
 0x465   : > { %v9234_v4 = vld [vmem:[#allocation8_spill] sm:$0xff] }
 0x469   : > { %v3293_v49 = vpop.f32.mrb[36].mxu1 }
 0x46a   : > { %v8082_v35 = vadd.f32 %v9226_v21, %v3293_v49  ;;  %v3295_v1 = vpop.f32.mrb[37].mxu1 }
 0x46b   : > { %v3296_v15 = vpop.f32.mrb[38].mxu1 }
 0x46c   : > { %v3297_v26 = vpop.f32.mrb[39].mxu1 }
 0x471   : > { %v3300_v7 = vpop.f32.mrb[40].mxu1 }
 0x472   : > { %v8085_v24 = vadd.f32 %v9227_v54, %v3300_v7  ;;  %v3302_v14 = vpop.f32.mrb[41].mxu1  ;;  %v9235_v7 = vld [vmem:[#allocation49_spill] sm:$0xff] }
 0x473   : > { %v3303_v33 = vpop.f32.mrb[42].mxu1 }
 0x474   : > { %v3304_v34 = vpop.f32.mrb[43].mxu1 }
 0x479   : > { %v3307_v8 = vpop.f32.mrb[44].mxu1 }
 0x47a   : > { %v8088_v48 = vadd.f32 %v9228_v23, %v3307_v8  ;;  %v3309_v38 = vpop.f32.mrb[45].mxu1  ;;  %v9236_v23 = vld [vmem:[#allocation57_spill] sm:$0xff] }
 0x47b   : > { %v3310_v45 = vpop.f32.mrb[46].mxu1 }
 0x47c   : > { %v3311_v13 = vpop.f32.mrb[47].mxu1 }
 0x481   : > { %v3314_v37 = vpop.f32.mrb[48].mxu1 }
 0x482   : > { %v8091_v10 = vadd.f32 %v9229_v39, %v3314_v37  ;;  %v3316_v55 = vpop.f32.mrb[49].mxu1 }
 0x483   : > { %v3317_v18 = vpop.f32.mrb[50].mxu1  ;;  %v9237_v55 = vld [vmem:[#allocation30_spill] sm:$0xff] }
 0x484   : > { %v3318_v57 = vpop.f32.mrb[51].mxu1 }
 0x489   : > { %v3321_v27 = vpop.f32.mrb[52].mxu1 }
 0x48a   : > { %v8094_v16 = vadd.f32 %v9230_v32, %v3321_v27  ;;  %v3323_v41 = vpop.f32.mrb[53].mxu1 }
 0x48b   : > { %v3324_v52 = vpop.f32.mrb[54].mxu1 }
 0x48c   : > { %v3325_v17 = vpop.f32.mrb[55].mxu1  ;;  %v9238_v52 = vld [vmem:[#allocation9_spill] sm:$0xff] }
 0x491   : > { %v3328_v9 = vpop.f32.mrb[56].mxu1 }
 0x492   : > { %v8101_v40 = vadd.f32 %v9231_v19, %v3328_v9  ;;  %v3330_v30 = vpop.f32.mrb[57].mxu1 }
 0x493   : > { %v3331_v28 = vpop.f32.mrb[58].mxu1 }
 0x494   : > { %v3332_v53 = vpop.f32.mrb[59].mxu1  ;;  %v9240_v28 = vld [vmem:[#allocation33_spill] sm:$0xff] }
 0x499   : > { %v3335_v63 = vpop.f32.mrb[60].mxu1 }
 0x49a   : > { %v8104_v6 = vadd.f32 %v9232_v44, %v3335_v63  ;;  %v3337_v5 = vpop.f32.mrb[61].mxu1 }
 0x49b   : > { %v3338_v59 = vpop.f32.mrb[62].mxu1 }
 0x49c   : > { %v3339_v43 = vpop.f32.mrb[63].mxu1  ;;  %v9241_v59 = vld [vmem:[#allocation41_spill] sm:$0xff] }
 0x4a1   : > { %v3342_v2 = vpop.f32.mrb[64].mxu1 }
 0x4a2   : > { %v8107_v36 = vadd.f32 %v9233_v61, %v3342_v2  ;;  %v3344_v42 = vpop.f32.mrb[65].mxu1 }
 0x4a3   : > { %v3345_v50 = vpop.f32.mrb[66].mxu1 }
 0x4a4   : > { %v3346_v3 = vpop.f32.mrb[67].mxu1 }
 0x4a5   : > { %v9242_v3 = vld [vmem:[#allocation43_spill] sm:$0xff] }
 0x4a9   : > { %v3349_v11 = vpop.f32.mrb[68].mxu1 }
 0x4aa   : > { %v8110_v49 = vadd.f32 %v9234_v4, %v3349_v11  ;;  %v3351_v21 = vpop.f32.mrb[69].mxu1 }
 0x4ab   : > { %v3352_v1 = vpop.f32.mrb[70].mxu1 }
 0x4ac   : > { %v3353_v15 = vpop.f32.mrb[71].mxu1 }
 0x4b1   : > { %v3356_v26 = vpop.f32.mrb[72].mxu1 }
 0x4b2   : > { %v8113_v54 = vadd.f32 %v9235_v7, %v3356_v26  ;;  %v3358_v14 = vpop.f32.mrb[73].mxu1  ;;  %v9243_v26 = vld [vmem:[#allocation63_spill] sm:$0xff] }
 0x4b3   : > { %v3359_v33 = vpop.f32.mrb[74].mxu1 }
 0x4b4   : > { %v3360_v34 = vpop.f32.mrb[75].mxu1 }
 0x4b5   : > { %v3797_v34 = vmul.f32 %v8026_v0, %v8026_v0 }
 0x4b9   : > { %v3363_v8 = vpop.f32.mrb[76].mxu1 }
 0x4ba   : > { %v8116_v38 = vadd.f32 %v9236_v23, %v3363_v8  ;;  %v3365_v45 = vpop.f32.mrb[77].mxu1  ;;  %v3796_v23 = vmul.f32 %v8005_v25, %v8005_v25 }
 0x4bb   : > { %v3366_v13 = vpop.f32.mrb[78].mxu1  ;;  %v3713_v45 = vsel %vm810_vm1, %v8026_v0, 0.0 }
 0x4bc   : > { %v3367_v37 = vpop.f32.mrb[79].mxu1  ;;  %v3798_v13 = vmul.f32 %v8037_v56, %v8037_v56 }
 0x4bd   : > { %v3712_v37 = vsel %vm810_vm1, %v8005_v25, 0.0 }
 0x4c1   : > { %v3370_v39 = vpop.f32.mrb[80].mxu1 }
 0x4c2   : > { %v8119_v18 = vadd.f32 %v9237_v55, %v3370_v39  ;;  %v3372_v57 = vpop.f32.mrb[81].mxu1  ;;  %v3829_v39 = vsel %vm810_vm1, %v3797_v34, 0.0  ;;  %v3715_v55 = vsel %vm810_vm1, %v8037_v56, 0.0  ;;  %v3806_v34 = vmul.f32 %v8085_v24, %v8085_v24 }
 0x4c3   : > { %v3373_v27 = vpop.f32.mrb[82].mxu1  ;;  %v3799_v57 = vmul.f32 %v8046_v31, %v8046_v31 }
 0x4c4   : > { %v3374_v32 = vpop.f32.mrb[83].mxu1  ;;  %v3828_v27 = vsel %vm810_vm1, %v3796_v23, 0.0 }
 0x4c5   : > { %v3714_v32 = vadd.f32 %v3713_v45, %v3712_v37  ;;  %v3802_v45 = vmul.f32 %v8073_v22, %v8073_v22  ;;  %v3733_v37 = vsel %vm810_vm1, %v8079_v20, 0.0 }
 0x4c9   : > { %v3377_v41 = vpop.f32.mrb[84].mxu1 }
 0x4ca   : > { %v8122_v17 = vadd.f32 %v9238_v52, %v3377_v41  ;;  %v3379_v9 = vpop.f32.mrb[85].mxu1  ;;  %v3831_v52 = vsel %vm810_vm1, %v3798_v13, 0.0 }
 0x4cb   : > { %v3380_v19 = vpop.f32.mrb[86].mxu1  ;;  %v3717_v9 = vsel %vm810_vm1, %v8046_v31, 0.0 }
 0x4cc   : > { %9239 = vst [vmem:[#allocation19_spill] sm:$0xff] %v8122_v17  ;;  %v3381_v30 = vpop.f32.mrb[87].mxu1  ;;  %v3800_v19 = vmul.f32 %v8057_v58, %v8057_v58 }
 0x4cd   : > { %v9244_v30 = vld [vmem:[#allocation59_spill] sm:$0xff] }
 0x4d1   : > { %v3384_v47 = vpop.f32.mrb[88].mxu1 }
 0x4d2   : > { %v8125_v46 = vadd.f32 %v9240_v28, %v3384_v47  ;;  %v3386_v53 = vpop.f32.mrb[89].mxu1 }
 0x4d3   : > { %v3387_v63 = vpop.f32.mrb[90].mxu1  ;;  %v3830_v53 = vadd.f32 %v3829_v39, %v3828_v27 }
 0x4d4   : > { %v3388_v44 = vpop.f32.mrb[91].mxu1  ;;  %v3716_v63 = vadd.f32 %v3715_v55, %v3714_v32  ;;  %v3736_v55 = vsel %vm810_vm1, %v8085_v24, 0.0 }
 0x4d9   : > { %v3391_v5 = vpop.f32.mrb[92].mxu1 }
 0x4da   : > { %v8128_v43 = vadd.f32 %v9241_v59, %v3391_v5  ;;  %v3393_v2 = vpop.f32.mrb[93].mxu1  ;;  %v3833_v5 = vsel %vm810_vm1, %v3799_v57, 0.0  ;;  %v3719_v59 = vsel %vm810_vm1, %v8057_v58, 0.0  ;;  %v9245_v57 = vld [vmem:[#allocation26_spill] sm:$0xff] }
 0x4db   : > { %v3394_v61 = vpop.f32.mrb[94].mxu1  ;;  %v3801_v2 = vmul.f32 %v8070_v29, %v8070_v29 }
 0x4dc   : > { %v3395_v42 = vpop.f32.mrb[95].mxu1 }
 0x4dd   : > { %v3832_v42 = vadd.f32 %v3831_v52, %v3830_v53  ;;  %v3723_v52 = vsel %vm810_vm1, %v8073_v22, 0.0  ;;  %v3852_v53 = vsel %vm810_vm1, %v3806_v34, 0.0  ;;  %v3755_v34 = vsel %vm810_vm1, %v8110_v49, 0.0 }
 0x4e1   : > { %v3398_v50 = vpop.f32.mrb[96].mxu1 }
 0x4e2   : > { %v8131_v11 = vadd.f32 %v9242_v3, %v3398_v50  ;;  %v3400_v4 = vpop.f32.mrb[97].mxu1  ;;  %v3718_v50 = vadd.f32 %v3717_v9, %v3716_v63  ;;  %v3835_v3 = vsel %vm810_vm1, %v3800_v19, 0.0  ;;  %v3807_v19 = vmul.f32 %v8088_v48, %v8088_v48 }
 0x4e3   : > { %v3401_v21 = vpop.f32.mrb[98].mxu1  ;;  %v3721_v4 = vsel %vm810_vm1, %v8070_v29, 0.0  ;;  %v3738_v63 = vsel %vm810_vm1, %v8088_v48, 0.0 }
 0x4e4   : > { %v3402_v1 = vpop.f32.mrb[99].mxu1  ;;  %v3805_v21 = vmul.f32 %v8082_v35, %v8082_v35 }
 0x4e5   : > { %v3834_v1 = vadd.f32 %v3833_v5, %v3832_v42  ;;  %v3812_v42 = vmul.f32 %v8107_v36, %v8107_v36 }
 0x4e6   : > { %v3850_v39 = vsel %vm810_vm1, %v3805_v21, 0.0  ;;  %v3814_v21 = vmul.f32 %v8113_v54, %v8113_v54 }
 0x4e9   : > { %v3405_v15 = vpop.f32.mrb[100].mxu1 }
 0x4ea   : > { %v8134_v7 = vadd.f32 %v9243_v26, %v3405_v15  ;;  %v3407_v14 = vpop.f32.mrb[101].mxu1  ;;  %v3720_v15 = vadd.f32 %v3719_v59, %v3718_v50  ;;  %v3837_v26 = vsel %vm810_vm1, %v3801_v2, 0.0 }
 0x4eb   : > { %v3408_v33 = vpop.f32.mrb[102].mxu1  ;;  %v3804_v14 = vmul.f32 %v8079_v20, %v8079_v20 }
 0x4ec   : > { %v3409_v8 = vpop.f32.mrb[103].mxu1  ;;  %v3734_v33 = vsel %vm810_vm1, %v8082_v35, 0.0  ;;  %v3722_v23 = vadd.f32 %v3721_v4, %v3720_v15  ;;  %v8210_v4 = vsel %vm810_vm1, %v8076_v51, 0.0 }
 0x4ed   : > { %v3836_v8 = vadd.f32 %v3835_v3, %v3834_v1  ;;  %v3735_v9 = vadd.f32 %v3734_v33, %v3733_v37  ;;  %v8206_v3 = vsel %vm810_vm1, %v3802_v45, 0.0  ;;  %v8216_v1 = vmul.f32 %v8076_v51, %v8076_v51 }
 0x4ee   : > { %v8203_v50 = vadd.f32 %v3723_v52, %v3722_v23  ;;  %v3740_v33 = vsel %vm810_vm1, %v8091_v10, 0.0  ;;  %v3815_v23 = vmul.f32 %v8116_v38, %v8116_v38  ;;  %v3754_v37 = vsel %vm810_vm1, %v8107_v36, 0.0 }
 0x4ef   : > { %v3737_v2 = vadd.f32 %v3736_v55, %v3735_v9  ;;  %v3816_v52 = vmul.f32 %v8119_v18, %v8119_v18 }
 0x4f1   : > { %v3412_v41 = vpop.f32.mrb[104].mxu1 }
 0x4f2   : > { %v8158_v47 = vadd.f32 %v9244_v30, %v3412_v41  ;;  %v3414_v28 = vpop.f32.mrb[105].mxu1  ;;  %v8187_v41 = vadd.f32 %v3837_v26, %v3836_v8  ;;  %v3739_v26 = vadd.f32 %v3738_v63, %v3737_v2  ;;  %v3875_v2 = vsel %vm810_vm1, %v3815_v23, 0.0 }
 0x4f3   : > { %v3415_v44 = vpop.f32.mrb[106].mxu1  ;;  %v3849_v28 = vsel %vm810_vm1, %v3804_v14, 0.0  ;;  %v3854_v14 = vsel %vm810_vm1, %v3807_v19, 0.0  ;;  %v3744_v23 = vsel %vm810_vm1, %v8101_v40, 0.0 }
 0x4f4   : > { %v3416_v61 = vpop.f32.mrb[107].mxu1  ;;  %v3813_v44 = vmul.f32 %v8110_v49, %v8110_v49  ;;  %v3851_v59 = vadd.f32 %v3850_v39, %v3849_v28  ;;  %v3870_v39 = vsel %vm810_vm1, %v3812_v42, 0.0  ;;  %v3810_v28 = vmul.f32 %v8101_v40, %v8101_v40 }
 0x4f5   : > { %v3808_v61 = vmul.f32 %v8091_v10, %v8091_v10 }
 0x4f6   : > { %v3853_v15 = vadd.f32 %v3852_v53, %v3851_v59  ;;  %v3871_v8 = vsel %vm810_vm1, %v3813_v44, 0.0  ;;  %v3756_v53 = vadd.f32 %v3755_v34, %v3754_v37  ;;  %v3759_v59 = vsel %vm810_vm1, %v8116_v38, 0.0 }
 0x4f7   : > { %v3856_v45 = vsel %vm810_vm1, %v3808_v61, 0.0  ;;  %v3872_v63 = vadd.f32 %v3871_v8, %v3870_v39  ;;  %v3817_v61 = vmul.f32 %v8122_v17, %v8122_v17  ;;  %v3818_v8 = vmul.f32 %v8125_v46, %v8125_v46 }
 0x4f9   : > { %v3419_v13 = vpop.f32.mrb[108].mxu1 }
 0x4fa   : > { %v8185_v27 = vadd.f32 %v9245_v57, %v3419_v13  ;;  %v3421_v32 = vpop.f32.mrb[109].mxu1  ;;  %v3809_v13 = vmul.f32 %v8094_v16, %v8094_v16  ;;  %v3757_v57 = vsel %vm810_vm1, %v8113_v54, 0.0 }
 0x4fb   : > { %v3422_v30 = vpop.f32.mrb[110].mxu1  ;;  %v3873_v32 = vsel %vm810_vm1, %v3814_v21, 0.0  ;;  %v3742_v21 = vsel %vm810_vm1, %v8094_v16, 0.0 }
 0x4fc   : > { %v3423_v5 = vpop.f32.mrb[111].mxu1  ;;  %v3855_v30 = vadd.f32 %v3854_v14, %v3853_v15  ;;  %v3758_v15 = vadd.f32 %v3757_v57, %v3756_v53  ;;  %v3874_v14 = vadd.f32 %v3873_v32, %v3872_v63  ;;  %v3858_v34 = vsel %vm810_vm1, %v3809_v13, 0.0 }
 0x4fd   : > { %v3741_v5 = vadd.f32 %v3740_v33, %v3739_v26  ;;  %v3761_v26 = vsel %vm810_vm1, %v8119_v18, 0.0  ;;  %v3877_v33 = vsel %vm810_vm1, %v3816_v52, 0.0  ;;  %v3763_v13 = vsel %vm810_vm1, %v8122_v17, 0.0 }
 0x4fe   : > { %v3760_v37 = vadd.f32 %v3759_v59, %v3758_v15  ;;  %v3876_v39 = vadd.f32 %v3875_v2, %v3874_v14  ;;  %v3879_v57 = vsel %vm810_vm1, %v3817_v61, 0.0  ;;  %v3819_v32 = vmul.f32 %v8128_v43, %v8128_v43  ;;  %v9247_v2 = vld [vmem:[#allocation54_spill] sm:$0xff] }
 0x4ff   : > { %v3743_v52 = vadd.f32 %v3742_v21, %v3741_v5  ;;  %v3881_v59 = vsel %vm810_vm1, %v3818_v8, 0.0 }
 0x500   : > { %v3878_v53 = vadd.f32 %v3877_v33, %v3876_v39  ;;  %v3821_v33 = vmul.f32 %v8134_v7, %v8134_v7 }
 0x501   : > { %v3426_v55 = vpop.f32.mrb[112].mxu1  ;;  %v3745_v15 = vadd.f32 %v3744_v23, %v3743_v52  ;;  %v3820_v23 = vmul.f32 %v8131_v11, %v8131_v11 }
 0x502   : > { %v8238_v9 = vadd.f32 %v7766_v62, %v3426_v55  ;;  %v3428_v19 = vpop.f32.mrb[113].mxu1  ;;  %v3857_v62 = vadd.f32 %v3856_v45, %v3855_v30  ;;  %v3860_v45 = vsel %vm810_vm1, %v3810_v28, 0.0  ;;  %v3811_v55 = vmul.f32 %v8104_v6, %v8104_v6 }
 0x503   : > { %v3429_v44 = vpop.f32.mrb[114].mxu1  ;;  %v3762_v30 = vadd.f32 %v3761_v26, %v3760_v37  ;;  %v3746_v28 = vsel %vm810_vm1, %v8104_v6, 0.0  ;;  %v3880_v5 = vadd.f32 %v3879_v57, %v3878_v53  ;;  %v3883_v26 = vsel %vm810_vm1, %v3819_v32, 0.0 }
 0x504   : > { %9246 = vst [vmem:[#allocation46_spill] sm:$0xff] %v8238_v9  ;;  %v3430_v42 = vpop.f32.mrb[115].mxu1  ;;  %v3859_v19 = vadd.f32 %v3858_v34, %v3857_v62  ;;  %v3765_v44 = vsel %vm810_vm1, %v8125_v46, 0.0  ;;  %v3862_v21 = vsel %vm810_vm1, %v3811_v55, 0.0  ;;  %v3767_v34 = vsel %vm810_vm1, %v8128_v43, 0.0 }
 0x505   : > { %v3764_v17 = vadd.f32 %v3763_v13, %v3762_v30  ;;  %v3747_v37 = vadd.f32 %v3746_v28, %v3745_v15  ;;  %v3841_v55 = vsel %vm810_vm1, %v8216_v1, 0.0  ;;  %v3776_v13 = vsel %vm810_vm1, %v8134_v7, 0.0 }
 0x506   : > { %v3861_v14 = vadd.f32 %v3860_v45, %v3859_v19  ;;  %v3840_v45 = vadd.f32 %v8206_v3, %v8187_v41  ;;  %v3822_v57 = vmul.f32 %v8158_v47, %v8158_v47  ;;  %v3726_v32 = vadd.f32 %v8210_v4, %v8203_v50 }
 0x507   : > { %v3766_v39 = vadd.f32 %v3765_v44, %v3764_v17  ;;  %v3775_v30 = vsel %vm810_vm1, %v8131_v11, 0.0  ;;  %v3892_v41 = vsel %vm810_vm1, %v3821_v33, 0.0  ;;  %v3778_v3 = vsel %vm810_vm1, %v8158_v47, 0.0 }
 0x508   : > { %v3863_v17 = vadd.f32 %v3862_v21, %v3861_v14  ;;  %v3823_v1 = vmul.f32 %v8185_v27, %v8185_v27  ;;  %v3842_v53 = vadd.f32 %v3841_v55, %v3840_v45  ;;  %v3748_v28 = vrot.slane %v3747_v37, 4 }
 0x509   : > { %v3433_v63 = vpop.f32.mrb[116].mxu1  ;;  %v3768_v52 = vadd.f32 %v3767_v34, %v3766_v39  ;;  %v3891_v44 = vsel %vm810_vm1, %v3820_v23, 0.0  ;;  %v3894_v4 = vsel %vm810_vm1, %v3822_v57, 0.0  ;;  %v3782_v39 = vsel %vm810_vm1, %v8238_v9, 0.0 }
 0x50a   : > { %v8271_v42 = vadd.f32 %v9247_v2, %v3433_v63  ;;  %v3435_v61 = vpop.f32.mrb[117].mxu1  ;;  %v3882_v63 = vadd.f32 %v3881_v59, %v3880_v5  ;;  %v3777_v59 = vadd.f32 %v3776_v13, %v3775_v30  ;;  %v3780_v2 = vsel %vm810_vm1, %v8185_v27, 0.0 }
 0x50b   : > { %v3436_v62 = vpop.f32.mrb[118].mxu1  ;;  %v3824_v61 = vmul.f32 %v8238_v9, %v8238_v9  ;;  %v3864_v5 = vrot.slane %v3863_v17, 4  ;;  %v3893_v21 = vadd.f32 %v3892_v41, %v3891_v44  ;;  %v3727_v45 = vrot.slane %v3726_v32, 4 }
 0x50c   : > { %9248 = vst [vmem:[#allocation39_spill] sm:$0xff] %v8271_v42  ;;  %v3437_v8 = vpop.f32.mrb[119].mxu1  ;;  %v3884_v19 = vadd.f32 %v3883_v26, %v3882_v63  ;;  %v3769_v62 = vrot.slane %v3768_v52, 4  ;;  %v3779_v34 = vadd.f32 %v3778_v3, %v3777_v59  ;;  %v3825_v63 = vmul.f32 %v8271_v42, %v8271_v42 }
 0x50d   : > { %v3896_v8 = vsel %vm810_vm1, %v3823_v1, 0.0  ;;  %v3843_v55 = vrot.slane %v3842_v53, 4  ;;  %v3898_v57 = vsel %vm810_vm1, %v3824_v61, 0.0  ;;  %v3784_v30 = vsel %vm810_vm1, %v8271_v42, 0.0 }
 0x50e   : > { %v3885_v33 = vrot.slane %v3884_v19, 4  ;;  %v3781_v13 = vadd.f32 %v3780_v2, %v3779_v34  ;;  %v3749_v3 = vadd.f32 %v3748_v28, %v3747_v37  ;;  %v3865_v1 = vadd.f32 %v3864_v5, %v3863_v17 }
 0x50f   : > { %v3728_v2 = vadd.f32 %v3727_v45, %v3726_v32 }
 0x510   : > { %v3783_v59 = vadd.f32 %v3782_v39, %v3781_v13  ;;  %v3750_v17 = vrot.slane %v3749_v3, 2  ;;  %v3866_v28 = vrot.slane %v3865_v1, 2 }
 0x511   : > { %v3440_v50 = vpop.f32.mrb[120].mxu1  ;;  %v3729_v39 = vrot.slane %v3728_v2, 2 }
 0x512   : > { %v8305_v15 = vadd.f32 %v8098_v12, %v3440_v50  ;;  %v3442_v14 = vpop.f32.mrb[121].mxu1  ;;  %v3895_v12 = vadd.f32 %v3894_v4, %v3893_v21  ;;  %v3770_v50 = vadd.f32 %v3769_v62, %v3768_v52  ;;  %v3844_v21 = vadd.f32 %v3843_v55, %v3842_v53 }
 0x513   : > { %v3443_v26 = vpop.f32.mrb[122].mxu1  ;;  %v3886_v14 = vadd.f32 %v3885_v33, %v3884_v19  ;;  %v3785_v34 = vadd.f32 %v3784_v30, %v3783_v59  ;;  %v3867_v13 = vadd.f32 %v3866_v28, %v3865_v1  ;;  %v3730_v59 = vadd.f32 %v3729_v39, %v3728_v2 }
 0x514   : > { %v3444_v23 = vpop.f32.mrb[123].mxu1  ;;  %v3826_v41 = vmul.f32 %v8305_v15, %v8305_v15  ;;  %v3897_v44 = vadd.f32 %v3896_v8, %v3895_v12  ;;  %v3900_v26 = vsel %vm810_vm1, %v3825_v63, 0.0  ;;  %v3786_v4 = vsel %vm810_vm1, %v8305_v15, 0.0 }
 0x515   : > { %v3787_v19 = vadd.f32 %v3786_v4, %v3785_v34  ;;  %v3771_v62 = vrot.slane %v3770_v50, 2  ;;  %v3887_v33 = vrot.slane %v3886_v14, 2  ;;  %v3845_v63 = vrot.slane %v3844_v21, 2 }
 0x516   : > { %v3899_v61 = vadd.f32 %v3898_v57, %v3897_v44  ;;  %v3902_v42 = vsel %vm810_vm1, %v3826_v41, 0.0  ;;  %v3751_v12 = vadd.f32 %v3750_v17, %v3749_v3 }
 0x517   : > { %v3772_v41 = vadd.f32 %v3771_v62, %v3770_v50  ;;  %v3888_v44 = vadd.f32 %v3887_v33, %v3886_v14 }
 0x518   : > { %v3901_v52 = vadd.f32 %v3900_v26, %v3899_v61  ;;  %v3846_v26 = vadd.f32 %v3845_v63, %v3844_v21  ;;  %v3752_v34 = vrot.slane %v3751_v12, 1 }
 0x519   : > { %v3447_v23 = vpop.f32.mrb[124].mxu1 }
 0x51a   : > { %v8322_v9 = vadd.f32 %v8096_v60, %v3447_v23  ;;  %v3449_v37 = vpop.f32.mrb[125].mxu1  ;;  %v3903_v45 = vadd.f32 %v3902_v42, %v3901_v52  ;;  %v3868_v23 = vrot.slane %v3867_v13, 1  ;;  %v3731_v42 = vrot.slane %v3730_v59, 1 }
 0x51b   : > { %v3450_v5 = vpop.f32.mrb[126].mxu1  ;;  %v3847_v52 = vrot.slane %v3846_v26, 1  ;;  %v3753_v3 = vadd.f32 %v3752_v34, %v3751_v12 }
 0x51c   : > { %9249 = vst [vmem:[#allocation14_spill] sm:$0xff] %v8322_v9  ;;  %v3788_v32 = vsel %vm810_vm1, %v8322_v9, 0.0  ;;  %v3827_v53 = vmul.f32 %v8322_v9, %v8322_v9  ;;  %v3451_v8 = vpop.f32.mrb[127].mxu1  ;;  %v3889_v9 = vrot.slane %v3888_v44, 1  ;;  %v3869_v1 = vadd.f32 %v3868_v23, %v3867_v13 }
 0x51d   : > { %v3789_v60 = vadd.f32 %v3788_v32, %v3787_v19  ;;  %v3773_v8 = vrot.slane %v3772_v41, 1  ;;  %v3732_v2 = vadd.f32 %v3731_v42, %v3730_v59  ;;  %v3848_v21 = vadd.f32 %v3847_v52, %v3846_v26 }
 0x51e   : > { %v3904_v55 = vsel %vm810_vm1, %v3827_v53, 0.0  ;;  %v3890_v14 = vadd.f32 %v3889_v9, %v3888_v44  ;;  %v5677_v9 = vld [vmem:[%s8937_s7] sm:$0xff]  }
 0x51f   : > { %v3790_v57 = vrot.slane %v3789_v60, 4  ;;  %v3905_v30 = vadd.f32 %v3904_v55, %v3903_v45  ;;  %v3774_v50 = vadd.f32 %v3773_v8, %v3772_v41  ;;  %v3916_v39 = vsel %vm1015_vm2, %v3753_v3, %v3732_v2  ;;  %5490 = vmatprep.subr.bf16.mxu0 %v5677_v9  ;;  %v9251_v3 = vld [vmem:[#allocation6_spill] sm:$0xff] }
 0x520   : > { %v3924_v63 = vsel %vm1026_vm3, %v3869_v1, %v3848_v21 }
 0x521   : > { %v3791_v4 = vadd.f32 %v3790_v57, %v3789_v60  ;;  %v3906_v61 = vrot.slane %v3905_v30, 4  ;;  %v3917_v45 = vsel %vm1017_vm4, %v3774_v50, %v3916_v39  ;;  %v3925_v60 = vsel %vm1028_vm5, %v3890_v14, %v3924_v63  ;;  %v5678_v57 = vld [vmem:[%s8937_s7 + $0x8] sm:$0xff]  }
 0x522   : > { %v9252_v14 = vld [vmem:[#allocation7_spill] sm:$0xff] }
 0x523   : > { %v3792_v37 = vrot.slane %v3791_v4, 2  ;;  %v3907_v5 = vadd.f32 %v3906_v61, %v3905_v30  ;;  %v9250_v30 = vmov 0.0|0.0  }
 0x525   : > { %v3793_v19 = vadd.f32 %v3792_v37, %v3791_v4  ;;  %v3908_v32 = vrot.slane %v3907_v5, 2  ;;  %v5170_v37 = vld [vmem:[%s8935_s5] ss:$0 sm:$0xff] }
 0x527   : > { %v3794_v17 = vrot.slane %v3793_v19, 1  ;;  %v3909_v28 = vadd.f32 %v3908_v32, %v3907_v5 }
 0x529   : > { %v3795_v62 = vadd.f32 %v3794_v17, %v3793_v19  ;;  %v3910_v33 = vrot.slane %v3909_v28, 1  ;;  %v5171_v19 = vld [vmem:[%s8936_s6] ss:$0 sm:$0xff] }
 0x52b   : > { %v3911_v53 = vadd.f32 %v3910_v33, %v3909_v28  ;;  %v3918_v55 = vsel %vm1019_vm6, %v3795_v62, %v3917_v45 }
 0x52d   : > { %v3926_v12 = vsel %vm1030_vm7, %v3911_v53, %v3925_v60 }
 0x52e   : > { %v3928_v13 = vsel %vm1033_vm8, %v3918_v55, %v3926_v12 }
 0x52f   : > { %5488 = vmatmul.mubr.msk.f32.vlgmr.msra.gmra.mrb[34].mxu0 %vm810_vm1, %v3928_v13 }
 0x530   : > { %5491 = vmatpush3.bf16.msra.mxu0 %v5677_v9 }
 0x531   : > { %5492 = vmatprep.subr.bf16.mxu0 %v5678_v57 }
 0x534   : > { %5493 = vmatpush3.bf16.msra.mxu0 %v5678_v57 }
 0x535   : > { %5573 = vmatprep.subr.bf16.mxu0 %v9250_v30 }
 0x602   : > { %v3998_v41 = vpop.f32.mrb[34].mxu0 }
 0x603   : > { %v4002_v44 = vmul.f32 0.015625, %v3998_v41  ;;  %v5489_v59 = vpop.f32.mrb[35].mxu0 }
 0x605   : > { %v4003_v26 = vmul.f32 %v4002_v44, %v4002_v44 }
 0x607   : > { %v4005_v4 = vrot.slane %v4003_v26, 4 }
 0x609   : > { %v4007_v61 = vsub.f32 %v4002_v44, %v4005_v4 }
 0x60b   : > { %v4008_v34 = vmax.f32 %v4007_v61, 0.0 }
 0x60d   : > { %v4009_v23 = vadd.f32 1e-05, %v4008_v34 }
 0x60f   : > { %5681 = vrsqrt.f32 %v4009_v23 }
 0x619   : > { %v5682_v5 = vpop.eup %5681 }
 0x61a   : > { %v4017_v8 = vmul.f32 %v5682_v5, %v5170_v37 }
 0x61c   : > { %v4019_v42 = vrot.slane %v4017_v8, 4  ;;  %v4029_v52 = vcombine.high %v4017_v8, %v4017_v8 }
 0x61e   : > { %v4021_v32 = vmul.f32 %v4019_v42, %v4002_v44  ;;  %v4036_v1 = vrot.slane %v4029_v52, %v9251_v3 }
 0x620   : > { %v4028_v17 = vsub.f32 %v5171_v19, %v4021_v32  ;;  %v4044_v28 = vrot.slane %v4036_v1, %v9251_v3  ;;  %v4037_v50 = vcombine.high %v4036_v1, %v4036_v1 }
 0x622   : > { %v4057_v2 = vrot.slane %v4044_v28, %v9252_v14  ;;  %v4113_v21 = vrot.slane %v4028_v17, %v9251_v3  ;;  %v8355_v33 = vrot.slane %v4037_v50, %v9251_v3 }
 0x624   : > { %v4114_v62 = vcombine.high %v4113_v21, %v4113_v21  ;;  %v4121_v53 = vrot.slane %v4113_v21, %v9251_v3  ;;  %v4074_v39 = vmul.f32 %v4057_v2, %v8005_v25  ;;  %v4075_v60 = vmul.f32 %v4057_v2, %v8026_v0 }
 0x625   : > { %v4076_v55 = vmul.f32 %v4057_v2, %v8037_v56  ;;  %v4077_v12 = vmul.f32 %v4057_v2, %v8046_v31  ;;  %v4078_v13 = vmul.f32 %v4057_v2, %v8057_v58  ;;  %v4079_v9 = vmul.f32 %v4057_v2, %v8070_v29 }
 0x626   : > { %v8360_v63 = vrot.slane %v4114_v62, %v9251_v3  ;;  %v4134_v45 = vrot.slane %v4121_v53, %v9252_v14  ;;  %v4061_v57 = vrot.slane %v8355_v33, %v9252_v14  ;;  %v4080_v61 = vmul.f32 %v4057_v2, %v8073_v22 }
 0x627   : > { %v4081_v37 = vmul.f32 %v4057_v2, %v8076_v51  ;;  %v4052_v62 = vcombine.high %v4044_v28, %v4044_v28 }
 0x628   : > { %v4151_v41 = vadd.f32 %v4134_v45, %v4074_v39  ;;  %v4152_v25 = vadd.f32 %v4134_v45, %v4075_v60  ;;  %v4153_v44 = vadd.f32 %v4134_v45, %v4076_v55  ;;  %v4154_v59 = vadd.f32 %v4134_v45, %v4077_v12 }
 0x629   : > { %v4155_v26 = vadd.f32 %v4134_v45, %v4078_v13  ;;  %v4156_v4 = vadd.f32 %v4134_v45, %v4079_v9  ;;  %v4138_v0 = vrot.slane %v8360_v63, %v9252_v14  ;;  %v4082_v8 = vmul.f32 %v4061_v57, %v8079_v20 }
 0x62a   : > { %v4183_v56 = vmax.f32 %v4151_v41, 0.0  ;;  %v4184_v31 = vmax.f32 %v4152_v25, 0.0  ;;  %v4185_v34 = vmax.f32 %v4153_v44, 0.0  ;;  %v4186_v58 = vmax.f32 %v4154_v59, 0.0 }
 0x62b   : > { %v4187_v23 = vmax.f32 %v4155_v26, 0.0  ;;  %v4188_v29 = vmax.f32 %v4156_v4, 0.0  ;;  %v4083_v42 = vmul.f32 %v4061_v57, %v8082_v35  ;;  %v4157_v19 = vadd.f32 %v4134_v45, %v4080_v61 }
 0x62c   : > { %v4215_v5 = vpack.c.bf16 %v4184_v31, %v4183_v56  ;;  %v4216_v52 = vpack.c.bf16 %v4186_v58, %v4185_v34  ;;  %v4158_v32 = vadd.f32 %v4134_v45, %v4081_v37  ;;  %v4159_v1 = vadd.f32 %v4138_v0, %v4082_v8 }
 0x62d   : > { %v4217_v22 = vpack.c.bf16 %v4188_v29, %v4187_v23  ;;  %v4160_v17 = vadd.f32 %v4138_v0, %v4083_v42  ;;  %v4189_v50 = vmax.f32 %v4157_v19, 0.0  ;;  %v4084_v20 = vmul.f32 %v4061_v57, %v8085_v24 }
 0x62e   : > { %5494 = vmatprep.mubr.msk.bf16.mxu0 %vm810_vm1, %v4215_v5  ;;  %v4190_v21 = vmax.f32 %v4158_v32, 0.0  ;;  %v4191_v51 = vmax.f32 %v4159_v1, 0.0  ;;  %v4085_v35 = vmul.f32 %v4061_v57, %v8088_v48  ;;  %v4086_v39 = vmul.f32 %v4061_v57, %v8091_v10 }
 0x62f   : > { %5495 = vmatmul.mubr.msk.bf16.vlgmr.msra.gmra.mrb[100].mxu0 %vm810_vm1, %v4216_v52  ;;  %v4192_v2 = vmax.f32 %v4160_v17, 0.0  ;;  %v4087_v45 = vmul.f32 %v4061_v57, %v8094_v16  ;;  %v4161_v55 = vadd.f32 %v4138_v0, %v4084_v20  ;;  %v4129_v13 = vcombine.high %v4121_v53, %v4121_v53 }
 0x630   : > { %5498 = vmatprep.mubr.msk.bf16.mxu0 %vm810_vm1, %v4217_v22  ;;  %v4218_v60 = vpack.c.bf16 %v4190_v21, %v4189_v50  ;;  %v4162_v12 = vadd.f32 %v4138_v0, %v4085_v35  ;;  %v4163_v41 = vadd.f32 %v4138_v0, %v4086_v39  ;;  %v4065_v44 = vrot.slane %v4052_v62, %v9252_v14 }
 0x631   : > { %v4219_v9 = vpack.c.bf16 %v4192_v2, %v4191_v51  ;;  %v4164_v25 = vadd.f32 %v4138_v0, %v4087_v45  ;;  %v4193_v24 = vmax.f32 %v4161_v55, 0.0  ;;  %v4142_v28 = vrot.slane %v4129_v13, %v9252_v14 }
 0x632   : > { %v4194_v48 = vmax.f32 %v4162_v12, 0.0  ;;  %v4195_v10 = vmax.f32 %v4163_v41, 0.0  ;;  %v4088_v16 = vmul.f32 %v4061_v57, %v8101_v40  ;;  %v4089_v26 = vmul.f32 %v4061_v57, %v8104_v6  ;;  %v9254_v41 = vld [vmem:[#allocation46_spill] sm:$0xff] }
 0x633   : > { %v4196_v59 = vmax.f32 %v4164_v25, 0.0  ;;  %v4090_v53 = vmul.f32 %v4065_v44, %v8107_v36  ;;  %v4091_v4 = vmul.f32 %v4065_v44, %v8110_v49  ;;  %v4092_v6 = vmul.f32 %v4065_v44, %v8113_v54  ;;  %v9255_v25 = vld [vmem:[#allocation39_spill] sm:$0xff] }
 0x634   : > { %v4220_v61 = vpack.c.bf16 %v4194_v48, %v4193_v24  ;;  %v4165_v56 = vadd.f32 %v4138_v0, %v4088_v16  ;;  %v4166_v31 = vadd.f32 %v4138_v0, %v4089_v26  ;;  %v4093_v36 = vmul.f32 %v4065_v44, %v8116_v38  ;;  %v9253_v0 = vld [vmem:[#allocation19_spill] sm:$0xff] }
 0x635   : > { %v4221_v34 = vpack.c.bf16 %v4196_v59, %v4195_v10  ;;  %v4167_v58 = vadd.f32 %v4142_v28, %v4090_v53  ;;  %v4168_v23 = vadd.f32 %v4142_v28, %v4091_v4  ;;  %v4053_v49 = vcombine.high %v8355_v33, %v8355_v33 }
 0x636   : > { %v4197_v29 = vmax.f32 %v4165_v56, 0.0  ;;  %v4198_v37 = vmax.f32 %v4166_v31, 0.0  ;;  %v4094_v57 = vmul.f32 %v4065_v44, %v8119_v18  ;;  %v4095_v8 = vmul.f32 %v4065_v44, %v9253_v0 }
 0x637   : > { %5499 = vmatmul.mubr.msk.bf16.gmra.mrb[104].mxu0 %vm810_vm1, %v4218_v60  ;;  %v4199_v5 = vmax.f32 %v4167_v58, 0.0  ;;  %v4200_v40 = vmax.f32 %v4168_v23, 0.0  ;;  %v4169_v52 = vadd.f32 %v4142_v28, %v4092_v6  ;;  %v4170_v19 = vadd.f32 %v4142_v28, %v4093_v36  ;;  %v4459_v6 = vld [vmem:[%s8941_s11 + $0x8] sm:$0xff]  ;;  %v4460_v36 = vld [vmem:[%s8941_s11 + $0x10] sm:$0xff] }
 0x638   : > { %5502 = vmatprep.mubr.msk.bf16.mxu0 %vm810_vm1, %v4219_v9  ;;  %v4222_v42 = vpack.c.bf16 %v4198_v37, %v4197_v29  ;;  %v4130_v32 = vcombine.high %v8360_v63, %v8360_v63  ;;  %v4171_v1 = vadd.f32 %v4142_v28, %v4094_v57  ;;  %v4172_v17 = vadd.f32 %v4142_v28, %v4095_v8  ;;  %v4461_v57 = vld [vmem:[%s8941_s11 + $0x18] sm:$0xff]  ;;  %v4462_v8 = vld [vmem:[%s8941_s11 + $0x20] sm:$0xff] }
 0x639   : > { %v4223_v22 = vpack.c.bf16 %v4200_v40, %v4199_v5  ;;  %v4069_v54 = vrot.slane %v4053_v49, %v9252_v14  ;;  %v4201_v38 = vmax.f32 %v4169_v52, 0.0  ;;  %v4202_v33 = vmax.f32 %v4170_v19, 0.0  ;;  %v4464_v52 = vld [vmem:[%s8941_s11 + $0x30] sm:$0xff] }
 0x63a   : > { %v4146_v18 = vrot.slane %v4130_v32, %v9252_v14  ;;  %v4203_v50 = vmax.f32 %v4171_v1, 0.0  ;;  %v4204_v21 = vmax.f32 %v4172_v17, 0.0  ;;  %v4096_v51 = vmul.f32 %v4065_v44, %v8125_v46  ;;  %v4465_v32 = vld [vmem:[%s8941_s11 + $0x38] sm:$0xff]  ;;  %v4466_v1 = vld [vmem:[%s8941_s11 + $0x40] sm:$0xff]  ;;  %v4467_v17 = vld [vmem:[%s8941_s11 + $0x48] sm:$0xff] }
 0x63b   : > { %v4097_v2 = vmul.f32 %v4065_v44, %v8128_v43  ;;  %v4098_v63 = vmul.f32 %v4069_v54, %v8131_v11  ;;  %v4099_v20 = vmul.f32 %v4069_v54, %v8134_v7  ;;  %v4224_v35 = vpack.c.bf16 %v4202_v33, %v4201_v38  ;;  %v4468_v38 = vld [vmem:[%s8941_s11 + $0x50] sm:$0xff]  ;;  %v4469_v33 = vld [vmem:[%s8941_s11 + $0x58] sm:$0xff] }
 0x63c   : > { %v4173_v62 = vadd.f32 %v4142_v28, %v4096_v51  ;;  %v4225_v45 = vpack.c.bf16 %v4204_v21, %v4203_v50  ;;  %v4100_v43 = vmul.f32 %v4069_v54, %v8158_v47  ;;  %v4101_v11 = vmul.f32 %v4069_v54, %v8185_v27  ;;  %v4470_v50 = vld [vmem:[%s8941_s11 + $0x60] sm:$0xff]  ;;  %v4471_v21 = vld [vmem:[%s8941_s11 + $0x68] sm:$0xff]  ;;  %v4472_v51 = vld [vmem:[%s8941_s11 + $0x70] sm:$0xff] }
 0x63d   : > { %v4174_v39 = vadd.f32 %v4142_v28, %v4097_v2  ;;  %v4175_v60 = vadd.f32 %v4146_v18, %v4098_v63  ;;  %v4176_v55 = vadd.f32 %v4146_v18, %v4099_v20  ;;  %v4102_v7 = vmul.f32 %v4069_v54, %v9254_v41  ;;  %v4473_v63 = vld [vmem:[%s8941_s11 + $0x78] sm:$0xff] }
 0x63e   : > { %v4205_v12 = vmax.f32 %v4173_v62, 0.0  ;;  %v4103_v44 = vmul.f32 %v4069_v54, %v9255_v25  ;;  %v4177_v48 = vadd.f32 %v4146_v18, %v4100_v43  ;;  %v4178_v28 = vadd.f32 %v4146_v18, %v4101_v11 }
 0x63f   : > { %5503 = vmatmul.mubr.msk.bf16.gmra.mrb[108].mxu0 %vm810_vm1, %v4220_v61  ;;  %v4206_v13 = vmax.f32 %v4174_v39, 0.0  ;;  %v4207_v9 = vmax.f32 %v4175_v60, 0.0  ;;  %v4208_v46 = vmax.f32 %v4176_v55, 0.0  ;;  %v4179_v59 = vadd.f32 %v4146_v18, %v4102_v7  ;;  %v9256_v61 = vld [vmem:[#allocation14_spill] sm:$0xff] }
 0x640   : > { %5506 = vmatprep.mubr.msk.bf16.mxu0 %vm810_vm1, %v4221_v34  ;;  %v4180_v16 = vadd.f32 %v4146_v18, %v4103_v44  ;;  %v4209_v26 = vmax.f32 %v4177_v48, 0.0  ;;  %v4210_v53 = vmax.f32 %v4178_v28, 0.0  ;;  %v4104_v27 = vmul.f32 %v4069_v54, %v8305_v15  ;;  %v4458_v15 = vld [vmem:[%s8941_s11] sm:$0xff] }
 0x641   : > { %v4226_v24 = vpack.c.bf16 %v4206_v13, %v4205_v12  ;;  %v4227_v10 = vpack.c.bf16 %v4208_v46, %v4207_v9  ;;  %v4211_v4 = vmax.f32 %v4179_v59, 0.0  ;;  %v4105_v56 = vmul.f32 %v4069_v54, %v9256_v61 }
 0x642   : > { %v4212_v47 = vmax.f32 %v4180_v16, 0.0  ;;  %v4228_v31 = vpack.c.bf16 %v4210_v53, %v4209_v26  ;;  %v4181_v34 = vadd.f32 %v4146_v18, %v4104_v27  ;;  %v9257_v40 = vmov 0.0  }
 0x643   : > { %v4182_v58 = vadd.f32 %v4146_v18, %v4105_v56  ;;  %v5574_v49 = vpack.c.bf16 %v4459_v6, %v4458_v15  ;;  %v5577_v0 = vpack.c.bf16 %v4461_v57, %v4460_v36  ;;  %v5586_v54 = vpack.c.bf16 %v4467_v17, %v4466_v1 }
 0x644   : > { %v4229_v23 = vpack.c.bf16 %v4212_v47, %v4211_v4  ;;  %v4213_v29 = vmax.f32 %v4181_v34, 0.0  ;;  %v5589_v18 = vpack.c.bf16 %v4469_v33, %v4468_v38  ;;  %v5592_v2 = vpack.c.bf16 %v4471_v21, %v4470_v50 }
 0x645   : > { %v4214_v37 = vmax.f32 %v4182_v58, 0.0  ;;  %5575 = vmatpush3.bf16.msra.mxu0 %v5574_v49  ;;  %v5595_v20 = vpack.c.bf16 %v4473_v63, %v4472_v51 }
 0x646   : > { %5576 = vmatprep.subr.bf16.mxu0 %v9250_v30 }
 0x647   : > { %5507 = vmatmul.mubr.msk.bf16.gmra.mrb[112].mxu0 %vm810_vm1, %v4222_v42  ;;  %v4230_v5 = vpack.c.bf16 %v4214_v37, %v4213_v29  ;;  %v4463_v42 = vld [vmem:[%s8941_s11 + $0x28] sm:$0xff] }
 0x648   : > { %5510 = vmatprep.mubr.msk.bf16.mxu0 %vm810_vm1, %v4223_v22  ;;  %v5580_v19 = vpack.c.bf16 %v4463_v42, %v4462_v8  ;;  %v5583_v22 = vpack.c.bf16 %v4465_v32, %v4464_v52 }
 0x649   : > { %5578 = vmatpush3.bf16.msra.mxu0 %v5577_v0 }
 0x64a   : > { %5579 = vmatprep.subr.bf16.mxu0 %v9250_v30 }
 0x64d   : > { %5581 = vmatpush3.bf16.msra.mxu0 %v5580_v19 }
 0x64e   : > { %5582 = vmatprep.subr.bf16.mxu0 %v9250_v30 }
 0x64f   : > { %5511 = vmatmul.mubr.msk.bf16.gmra.mrb[116].mxu0 %vm810_vm1, %v4224_v35 }
 0x650   : > { %5514 = vmatprep.mubr.msk.bf16.mxu0 %vm810_vm1, %v4225_v45 }
 0x651   : > { %5584 = vmatpush3.bf16.msra.mxu0 %v5583_v22 }
 0x652   : > { %5585 = vmatprep.subr.bf16.mxu0 %v9250_v30 }
 0x655   : > { %5587 = vmatpush3.bf16.msra.mxu0 %v5586_v54 }
 0x656   : > { %5588 = vmatprep.subr.bf16.mxu0 %v9250_v30 }
 0x657   : > { %5515 = vmatmul.mubr.msk.bf16.gmra.mrb[120].mxu0 %vm810_vm1, %v4226_v24 }
 0x658   : > { %5518 = vmatprep.mubr.msk.bf16.mxu0 %vm810_vm1, %v4227_v10 }
 0x659   : > { %5590 = vmatpush3.bf16.msra.mxu0 %v5589_v18 }
 0x65a   : > { %5591 = vmatprep.subr.bf16.mxu0 %v9250_v30 }
 0x65d   : > { %5593 = vmatpush3.bf16.msra.mxu0 %v5592_v2 }
 0x65e   : > { %5594 = vmatprep.subr.bf16.mxu0 %v9250_v30 }
 0x65f   : > { %5519 = vmatmul.mubr.msk.bf16.gmra.mrb[124].mxu0 %vm810_vm1, %v4228_v31 }
 0x660   : > { %5522 = vmatprep.mubr.msk.bf16.mxu0 %vm810_vm1, %v4229_v23 }
 0x661   : > { %5596 = vmatpush3.bf16.msra.mxu0 %v5595_v20 }
 0x667   : > { %5523 = vmatmul.mubr.msk.bf16.gmra.mrb[128].mxu0 %vm810_vm1, %v4230_v5 }
 0x668   : > { %5558 = vmatprep.mubr.msk.f32.mxu0 %vm5782_vm0, %v9257_v40 }
 0x702   : > { %v8479_v35 = vpop.f32.mrb[100].mxu0 }
 0x703   : > { %v8481_v62 = vpop.f32.mrb[101].mxu0  ;;  %v4528_v30 = vmul.f32 %v8479_v35, %v8479_v35 }
 0x704   : > { %v8483_v39 = vpop.f32.mrb[102].mxu0  ;;  %v4526_v60 = vmul.f32 %v8481_v62, %v8481_v62 }
 0x705   : > { %v8485_v45 = vpop.f32.mrb[103].mxu0  ;;  %v4529_v46 = vmul.f32 %v8483_v39, %v8483_v39 }
 0x706   : > { %v4474_v55 = vadd.f32 %v8485_v45, %v8481_v62  ;;  %v4527_v12 = vmul.f32 %v8485_v45, %v8485_v45 }
 0x708   : > { %v4475_v13 = vadd.f32 %v8479_v35, %v4474_v55  ;;  %v4558_v9 = vadd.f32 %v4527_v12, %v4526_v60 }
 0x70a   : > { %v4559_v43 = vadd.f32 %v4558_v9, %v4528_v30  ;;  %v8498_v11 = vpop.f32.mrb[104].mxu0  ;;  %v4476_v41 = vadd.f32 %v8483_v39, %v4475_v13 }
 0x70b   : > { %v8501_v7 = vpop.f32.mrb[105].mxu0  ;;  %v4532_v26 = vmul.f32 %v8498_v11, %v8498_v11 }
 0x70c   : > { %v4477_v25 = vadd.f32 %v4476_v41, %v8501_v7  ;;  %v4530_v44 = vmul.f32 %v8501_v7, %v8501_v7  ;;  %v4560_v24 = vadd.f32 %v4559_v43, %v4529_v46  ;;  %v8506_v48 = vpop.f32.mrb[106].mxu0 }
 0x70d   : > { %v8508_v28 = vpop.f32.mrb[107].mxu0  ;;  %v4533_v47 = vmul.f32 %v8506_v48, %v8506_v48 }
 0x70e   : > { %v4561_v10 = vadd.f32 %v4560_v24, %v4530_v44  ;;  %v4478_v59 = vadd.f32 %v4477_v25, %v8508_v28  ;;  %v4531_v16 = vmul.f32 %v8508_v28, %v8508_v28 }
 0x710   : > { %v4479_v53 = vadd.f32 %v8498_v11, %v4478_v59  ;;  %v4562_v4 = vadd.f32 %v4561_v10, %v4531_v16 }
 0x712   : > { %v4480_v27 = vadd.f32 %v8506_v48, %v4479_v53  ;;  %v4563_v61 = vadd.f32 %v4562_v4, %v4532_v26  ;;  %v8519_v56 = vpop.f32.mrb[108].mxu0 }
 0x713   : > { %v8521_v31 = vpop.f32.mrb[109].mxu0  ;;  %v4536_v40 = vmul.f32 %v8519_v56, %v8519_v56 }
 0x714   : > { %v4564_v34 = vadd.f32 %v4563_v61, %v4533_v47  ;;  %v8523_v58 = vpop.f32.mrb[110].mxu0  ;;  %v4534_v29 = vmul.f32 %v8521_v31, %v8521_v31  ;;  %v4481_v36 = vrot.slane %v4480_v27, 4 }
 0x715   : > { %v8525_v23 = vpop.f32.mrb[111].mxu0  ;;  %v4537_v8 = vmul.f32 %v8523_v58, %v8523_v58 }
 0x716   : > { %v4487_v37 = vadd.f32 %v8525_v23, %v8521_v31  ;;  %v4535_v5 = vmul.f32 %v8525_v23, %v8525_v23  ;;  %v4482_v22 = vadd.f32 %v4481_v36, %v4480_v27  ;;  %v4565_v1 = vrot.slane %v4564_v34, 4 }
 0x718   : > { %v4488_v15 = vadd.f32 %v8519_v56, %v4487_v37  ;;  %v4571_v6 = vadd.f32 %v4535_v5, %v4534_v29  ;;  %v4483_v21 = vrot.slane %v4482_v22, 2  ;;  %v4566_v51 = vadd.f32 %v4565_v1, %v4564_v34 }
 0x71a   : > { %v4572_v49 = vadd.f32 %v4571_v6, %v4536_v40  ;;  %v8536_v57 = vpop.f32.mrb[112].mxu0  ;;  %v4489_v0 = vadd.f32 %v8523_v58, %v4488_v15  ;;  %v4484_v46 = vadd.f32 %v4483_v21, %v4482_v22  ;;  %v4567_v43 = vrot.slane %v4566_v51, 2 }
 0x71b   : > { %v8541_v42 = vpop.f32.mrb[113].mxu0  ;;  %v4540_v2 = vmul.f32 %v8536_v57, %v8536_v57 }
 0x71c   : > { %v4490_v52 = vadd.f32 %v4489_v0, %v8541_v42  ;;  %v4538_v19 = vmul.f32 %v8541_v42, %v8541_v42  ;;  %v8546_v32 = vpop.f32.mrb[114].mxu0  ;;  %v4573_v17 = vadd.f32 %v4572_v49, %v4537_v8  ;;  %v4485_v27 = vrot.slane %v4484_v46, 1 }
 0x71d   : > { %v8548_v54 = vpop.f32.mrb[115].mxu0  ;;  %v4541_v55 = vmul.f32 %v8546_v32, %v8546_v32  ;;  %v4568_v61 = vadd.f32 %v4567_v43, %v4566_v51 }
 0x71e   : > { %v4491_v38 = vadd.f32 %v4490_v52, %v8548_v54  ;;  %v4539_v33 = vmul.f32 %v8548_v54, %v8548_v54  ;;  %v4574_v18 = vadd.f32 %v4573_v17, %v4538_v19  ;;  %v4486_v22 = vadd.f32 %v4485_v27, %v4484_v46 }
 0x71f   : > { %v4569_v1 = vrot.slane %v4568_v61, 1 }
 0x720   : > { %v4492_v50 = vadd.f32 %v8536_v57, %v4491_v38  ;;  %v4575_v63 = vadd.f32 %v4574_v18, %v4539_v33 }
 0x722   : > { %v4493_v20 = vadd.f32 %v8546_v32, %v4492_v50  ;;  %v8557_v60 = vpop.f32.mrb[116].mxu0  ;;  %v4576_v12 = vadd.f32 %v4575_v63, %v4540_v2 }
 0x723   : > { %v8561_v30 = vpop.f32.mrb[117].mxu0  ;;  %v4544_v53 = vmul.f32 %v8557_v60, %v8557_v60 }
 0x724   : > { %v4494_v13 = vrot.slane %v4493_v20, 4  ;;  %v8563_v9 = vpop.f32.mrb[118].mxu0  ;;  %v4577_v41 = vadd.f32 %v4576_v12, %v4541_v55  ;;  %v4542_v24 = vmul.f32 %v8561_v30, %v8561_v30  ;;  %v4570_v12 = vadd.f32 %v4569_v1, %v4568_v61 }
 0x725   : > { %v8565_v25 = vpop.f32.mrb[119].mxu0  ;;  %v4545_v37 = vmul.f32 %v8563_v9, %v8563_v9 }
 0x726   : > { %v4495_v44 = vadd.f32 %v4494_v13, %v4493_v20  ;;  %v4500_v10 = vadd.f32 %v8565_v25, %v8561_v30  ;;  %v4543_v59 = vmul.f32 %v8565_v25, %v8565_v25  ;;  %v4578_v16 = vrot.slane %v4577_v41, 4 }
 0x728   : > { %v4496_v26 = vrot.slane %v4495_v44, 2  ;;  %v4501_v4 = vadd.f32 %v8557_v60, %v4500_v10  ;;  %v4584_v47 = vadd.f32 %v4543_v59, %v4542_v24  ;;  %v4579_v34 = vadd.f32 %v4578_v16, %v4577_v41 }
 0x72a   : > { %v4497_v29 = vadd.f32 %v4496_v26, %v4495_v44  ;;  %v4585_v5 = vadd.f32 %v4584_v47, %v4544_v53  ;;  %v8578_v40 = vpop.f32.mrb[120].mxu0  ;;  %v4502_v15 = vadd.f32 %v8563_v9, %v4501_v4  ;;  %v4580_v6 = vrot.slane %v4579_v34, 2 }
 0x72b   : > { %v8581_v36 = vpop.f32.mrb[121].mxu0  ;;  %v4548_v2 = vmul.f32 %v8578_v40, %v8578_v40 }
 0x72c   : > { %v4498_v49 = vrot.slane %v4497_v29, 1  ;;  %v4503_v0 = vadd.f32 %v4502_v15, %v8581_v36  ;;  %v4546_v8 = vmul.f32 %v8581_v36, %v8581_v36  ;;  %v4586_v52 = vadd.f32 %v4585_v5, %v4545_v37  ;;  %v8586_v19 = vpop.f32.mrb[122].mxu0 }
 0x72d   : > { %v4581_v17 = vadd.f32 %v4580_v6, %v4579_v34  ;;  %v8588_v38 = vpop.f32.mrb[123].mxu0  ;;  %v4549_v46 = vmul.f32 %v8586_v19, %v8586_v19 }
 0x72e   : > { %v4499_v33 = vadd.f32 %v4498_v49, %v4497_v29  ;;  %v4587_v18 = vadd.f32 %v4586_v52, %v4546_v8  ;;  %v4504_v50 = vadd.f32 %v4503_v0, %v8588_v38  ;;  %v4547_v21 = vmul.f32 %v8588_v38, %v8588_v38 }
 0x72f   : > { %v4582_v51 = vrot.slane %v4581_v17, 1 }
 0x730   : > { %v4505_v63 = vadd.f32 %v8578_v40, %v4504_v50  ;;  %v4588_v20 = vadd.f32 %v4587_v18, %v4547_v21  ;;  %v4614_v55 = vsel %vm1015_vm2, %v4499_v33, %v4486_v22 }
 0x731   : > { %v4583_v13 = vadd.f32 %v4582_v51, %v4581_v17 }
 0x732   : > { %v4506_v43 = vadd.f32 %v8586_v19, %v4505_v63  ;;  %v4589_v41 = vadd.f32 %v4588_v20, %v4548_v2  ;;  %v8600_v44 = vpop.f32.mrb[124].mxu0 }
 0x733   : > { %v8602_v24 = vpop.f32.mrb[125].mxu0  ;;  %v4622_v10 = vsel %vm1026_vm3, %v4583_v13, %v4570_v12  ;;  %v4552_v29 = vmul.f32 %v8600_v44, %v8600_v44 }
 0x734   : > { %v4507_v59 = vrot.slane %v4506_v43, 4  ;;  %v4590_v16 = vadd.f32 %v4589_v41, %v4549_v46  ;;  %v8605_v26 = vpop.f32.mrb[126].mxu0  ;;  %v4550_v53 = vmul.f32 %v8602_v24, %v8602_v24 }
 0x735   : > { %v8609_v4 = vpop.f32.mrb[127].mxu0  ;;  %v4553_v1 = vmul.f32 %v8605_v26, %v8605_v26 }
 0x736   : > { %v4508_v47 = vadd.f32 %v4507_v59, %v4506_v43  ;;  %v4591_v27 = vrot.slane %v4590_v16, 4  ;;  %v4513_v61 = vadd.f32 %v8609_v4, %v8602_v24  ;;  %v4551_v34 = vmul.f32 %v8609_v4, %v8609_v4 }
 0x738   : > { %v4509_v37 = vrot.slane %v4508_v47, 2  ;;  %v4592_v5 = vadd.f32 %v4591_v27, %v4590_v16  ;;  %v4514_v15 = vadd.f32 %v8600_v44, %v4513_v61  ;;  %v4597_v6 = vadd.f32 %v4551_v34, %v4550_v53 }
 0x73a   : > { %v4510_v49 = vadd.f32 %v4509_v37, %v4508_v47  ;;  %v4593_v0 = vrot.slane %v4592_v5, 2  ;;  %v4598_v8 = vadd.f32 %v4597_v6, %v4552_v29  ;;  %v8618_v52 = vpop.f32.mrb[128].mxu0  ;;  %v4515_v22 = vadd.f32 %v8605_v26, %v4514_v15 }
 0x73b   : > { %v8623_v17 = vpop.f32.mrb[129].mxu0  ;;  %v4556_v53 = vmul.f32 %v8618_v52, %v8618_v52 }
 0x73c   : > { %v4511_v33 = vrot.slane %v4510_v49, 1  ;;  %v4594_v18 = vadd.f32 %v4593_v0, %v4592_v5  ;;  %v4516_v50 = vadd.f32 %v4515_v22, %v8623_v17  ;;  %v4554_v21 = vmul.f32 %v8623_v17, %v8623_v17  ;;  %v8628_v51 = vpop.f32.mrb[130].mxu0 }
 0x73d   : > { %v4599_v2 = vadd.f32 %v4598_v8, %v4553_v1  ;;  %v8630_v63 = vpop.f32.mrb[131].mxu0  ;;  %v4557_v34 = vmul.f32 %v8628_v51, %v8628_v51 }
 0x73e   : > { %v4512_v20 = vadd.f32 %v4511_v33, %v4510_v49  ;;  %v4595_v12 = vrot.slane %v4594_v18, 1  ;;  %v4517_v13 = vadd.f32 %v4516_v50, %v8630_v63  ;;  %v4555_v46 = vmul.f32 %v8630_v63, %v8630_v63 }
 0x73f   : > { %v4600_v43 = vadd.f32 %v4599_v2, %v4554_v21 }
 0x740   : > { %v4518_v41 = vadd.f32 %v8618_v52, %v4517_v13  ;;  %v4596_v59 = vadd.f32 %v4595_v12, %v4594_v18  ;;  %v4615_v16 = vsel %vm1017_vm4, %v4512_v20, %v4614_v55 }
 0x741   : > { %v4601_v47 = vadd.f32 %v4600_v43, %v4555_v46 }
 0x742   : > { %v4519_v27 = vadd.f32 %v8628_v51, %v4518_v41  ;;  %v4623_v61 = vsel %vm1028_vm5, %v4596_v59, %v4622_v10 }
 0x743   : > { %v4602_v29 = vadd.f32 %v4601_v47, %v4556_v53  ;;  %v5190_v47 = vld [vmem:[%s8938_s8] ss:$0 sm:$0xff] }
 0x744   : > { %v4520_v37 = vrot.slane %v4519_v27, 4 }
 0x745   : > { %v4603_v5 = vadd.f32 %v4602_v29, %v4557_v34  ;;  %v5191_v29 = vld [vmem:[%s8939_s9] ss:$0 sm:$0xff] }
 0x746   : > { %v4521_v15 = vadd.f32 %v4520_v37, %v4519_v27 }
 0x747   : > { %v4604_v6 = vrot.slane %v4603_v5, 4 }
 0x748   : > { %v4522_v49 = vrot.slane %v4521_v15, 2 }
 0x749   : > { %v4605_v0 = vadd.f32 %v4604_v6, %v4603_v5 }
 0x74a   : > { %v4523_v8 = vadd.f32 %v4522_v49, %v4521_v15 }
 0x74b   : > { %v4606_v55 = vrot.slane %v4605_v0, 2 }
 0x74c   : > { %v4524_v22 = vrot.slane %v4523_v8, 1 }
 0x74d   : > { %v4607_v1 = vadd.f32 %v4606_v55, %v4605_v0 }
 0x74e   : > { %v4525_v33 = vadd.f32 %v4524_v22, %v4523_v8 }
 0x74f   : > { %v4608_v18 = vrot.slane %v4607_v1, 1 }
 0x750   : > { %v4616_v50 = vsel %vm1019_vm6, %v4525_v33, %v4615_v16 }
 0x751   : > { %v4609_v21 = vadd.f32 %v4608_v18, %v4607_v1 }
 0x753   : > { %v4624_v10 = vsel %vm1030_vm7, %v4609_v21, %v4623_v61 }
 0x754   : > { %v4626_v2 = vsel %vm1033_vm8, %v4616_v50, %v4624_v10 }
 0x755   : > { %5559 = vmatmul.mubr.f32.vlgmr.msra.gmra.mrb[132].mxu0 %v4626_v2 }
 0x828   : > { %v4693_v20 = vpop.f32.mrb[132].mxu0 }
 0x829   : > { %v4698_v12 = vmul.f32 0.00390625, %v4693_v20  ;;  %v5560_v13 = vpop.f32.mrb[133].mxu0 }
 0x82b   : > { %v4699_v46 = vmul.f32 %v4698_v12, %v4698_v12 }
 0x82d   : > { %v4701_v43 = vrot.slane %v4699_v46, 4 }
 0x82f   : > { %v4703_v41 = vsub.f32 %v4698_v12, %v4701_v43 }
 0x831   : > { %v4704_v59 = vmax.f32 %v4703_v41, 0.0 }
 0x833   : > { %v4705_v53 = vadd.f32 1e-05, %v4704_v59 }
 0x835   : > { %5683 = vrsqrt.f32 %v4705_v53 }
 0x83f   : > { %v5684_v16 = vpop.eup %5683 }
 0x840   : > { %v4713_v27 = vmul.f32 %v5684_v16, %v5190_v47 }
 0x842   : > { %v4715_v34 = vrot.slane %v4713_v27, 4  ;;  %v4725_v61 = vcombine.high %v4713_v27, %v4713_v27 }
 0x844   : > { %v4717_v37 = vmul.f32 %v4715_v34, %v4698_v12  ;;  %v4732_v5 = vrot.slane %v4725_v61, %v9251_v3 }
 0x846   : > { %v4724_v15 = vsub.f32 %v5191_v29, %v4717_v37  ;;  %v4733_v6 = vcombine.high %v4732_v5, %v4732_v5  ;;  %v4740_v49 = vrot.slane %v4732_v5, %v9251_v3 }
 0x848   : > { %v4747_v0 = vrot.slane %v4733_v6, %v9251_v3  ;;  %v4748_v8 = vcombine.high %v4740_v49, %v4740_v49  ;;  %v4753_v55 = vrot.slane %v4740_v49, %v9252_v14  ;;  %v4809_v22 = vrot.slane %v4724_v15, %v9251_v3 }
 0x84a   : > { %v4749_v1 = vcombine.high %v4747_v0, %v4747_v0  ;;  %v4757_v33 = vrot.slane %v4747_v0, %v9252_v14  ;;  %v4761_v18 = vrot.slane %v4748_v8, %v9252_v14  ;;  %v4770_v50 = vmul.f32 %v4753_v55, %v8481_v62 }
 0x84b   : > { %v4771_v21 = vmul.f32 %v4753_v55, %v8485_v45  ;;  %v4772_v10 = vmul.f32 %v8479_v35, %v4753_v55  ;;  %v4773_v2 = vmul.f32 %v8483_v39, %v4753_v55  ;;  %v4774_v20 = vmul.f32 %v4753_v55, %v8501_v7 }
 0x84c   : > { %v4765_v12 = vrot.slane %v4749_v1, %v9252_v14  ;;  %v4775_v13 = vmul.f32 %v4753_v55, %v8508_v28  ;;  %v4776_v46 = vmul.f32 %v8498_v11, %v4753_v55  ;;  %v4777_v43 = vmul.f32 %v8506_v48, %v4753_v55 }
 0x84d   : > { %v4778_v41 = vmul.f32 %v4757_v33, %v8521_v31  ;;  %v4779_v62 = vmul.f32 %v4757_v33, %v8525_v23  ;;  %v4780_v45 = vmul.f32 %v8519_v56, %v4757_v33  ;;  %v4781_v35 = vmul.f32 %v8523_v58, %v4757_v33 }
 0x84e   : > { %v4782_v39 = vmul.f32 %v4757_v33, %v8541_v42  ;;  %v4783_v7 = vmul.f32 %v4757_v33, %v8548_v54  ;;  %v4784_v59 = vmul.f32 %v8536_v57, %v4757_v33  ;;  %v4785_v28 = vmul.f32 %v8546_v32, %v4757_v33 }
 0x84f   : > { %v4786_v11 = vmul.f32 %v4761_v18, %v8561_v30  ;;  %v4787_v48 = vmul.f32 %v4761_v18, %v8565_v25  ;;  %v4788_v31 = vmul.f32 %v8557_v60, %v4761_v18  ;;  %v4789_v23 = vmul.f32 %v8563_v9, %v4761_v18 }
 0x850   : > { %v4790_v56 = vmul.f32 %v4761_v18, %v8581_v36  ;;  %v4791_v58 = vmul.f32 %v4761_v18, %v8588_v38  ;;  %v4792_v42 = vmul.f32 %v8578_v40, %v4761_v18  ;;  %v4793_v54 = vmul.f32 %v8586_v19, %v4761_v18 }
 0x851   : > { %v4794_v57 = vmul.f32 %v4765_v12, %v8602_v24  ;;  %v4795_v32 = vmul.f32 %v4765_v12, %v8609_v4  ;;  %v4796_v30 = vmul.f32 %v8600_v44, %v4765_v12  ;;  %v4797_v25 = vmul.f32 %v8605_v26, %v4765_v12 }
 0x852   : > { %v4798_v60 = vmul.f32 %v4765_v12, %v8623_v17  ;;  %v4799_v9 = vmul.f32 %v4765_v12, %v8630_v63  ;;  %v4800_v36 = vmul.f32 %v8618_v52, %v4765_v12  ;;  %v4801_v38 = vmul.f32 %v8628_v51, %v4765_v12 }
 0x853   : > { %v4810_v53 = vcombine.high %v4809_v22, %v4809_v22  ;;  %v4817_v40 = vrot.slane %v4809_v22, %v9251_v3 }
 0x855   : > { %v4824_v19 = vrot.slane %v4810_v53, %v9251_v3  ;;  %v4825_v24 = vcombine.high %v4817_v40, %v4817_v40  ;;  %v4830_v4 = vrot.slane %v4817_v40, %v9252_v14  ;;  %v5697_v40 = vld [vmem:[%s5918_s15 + $0x60] sm:$0xff] }
 0x857   : > { %v4826_v47 = vcombine.high %v4824_v19, %v4824_v19  ;;  %v4834_v44 = vrot.slane %v4824_v19, %v9252_v14  ;;  %v4838_v26 = vrot.slane %v4825_v24, %v9252_v14  ;;  %v4847_v17 = vadd.f32 %v4830_v4, %v4770_v50  ;;  %v5698_v24 = vld [vmem:[%s5918_s15 + $0x68] sm:$0xff] }
 0x858   : > { %v4848_v16 = vadd.f32 %v4830_v4, %v4771_v21  ;;  %v4849_v63 = vadd.f32 %v4830_v4, %v4772_v10  ;;  %v4850_v27 = vadd.f32 %v4830_v4, %v4773_v2  ;;  %v4851_v52 = vadd.f32 %v4830_v4, %v4774_v20 }
 0x859   : > { %v4842_v51 = vrot.slane %v4826_v47, %v9252_v14  ;;  %v4852_v34 = vadd.f32 %v4830_v4, %v4775_v13  ;;  %v4853_v61 = vadd.f32 %v4830_v4, %v4776_v46  ;;  %v4854_v29 = vadd.f32 %v4830_v4, %v4777_v43  ;;  %v5699_v47 = vld [vmem:[%s5918_s15 + $0x70] sm:$0xff] }
 0x85a   : > { %v4855_v37 = vadd.f32 %v4834_v44, %v4778_v41  ;;  %v4856_v3 = vadd.f32 %v4834_v44, %v4779_v62  ;;  %v4857_v5 = vadd.f32 %v4834_v44, %v4780_v45  ;;  %v4858_v15 = vadd.f32 %v4834_v44, %v4781_v35  ;;  %v5685_v62 = vld [vmem:[%s5918_s15] sm:$0xff]  ;;  %v5686_v35 = vld [vmem:[%s5918_s15 + $0x8] sm:$0xff] }
 0x85b   : > { %v4859_v6 = vadd.f32 %v4834_v44, %v4782_v39  ;;  %v4860_v49 = vadd.f32 %v4834_v44, %v4783_v7  ;;  %v4861_v0 = vadd.f32 %v4834_v44, %v4784_v59  ;;  %v4862_v8 = vadd.f32 %v4834_v44, %v4785_v28  ;;  %v5687_v7 = vld [vmem:[%s5918_s15 + $0x10] sm:$0xff]  ;;  %v5688_v28 = vld [vmem:[%s5918_s15 + $0x18] sm:$0xff] }
 0x85c   : > { %v4863_v55 = vadd.f32 %v4838_v26, %v4786_v11  ;;  %v4864_v22 = vadd.f32 %v4838_v26, %v4787_v48  ;;  %v4865_v1 = vadd.f32 %v4838_v26, %v4788_v31  ;;  %v4866_v33 = vadd.f32 %v4838_v26, %v4789_v23  ;;  %v5689_v48 = vld [vmem:[%s5918_s15 + $0x20] sm:$0xff]  ;;  %v5690_v23 = vld [vmem:[%s5918_s15 + $0x28] sm:$0xff] }
 0x85d   : > { %v4867_v18 = vadd.f32 %v4838_v26, %v4790_v56  ;;  %v4868_v14 = vadd.f32 %v4838_v26, %v4791_v58  ;;  %v4869_v50 = vadd.f32 %v4838_v26, %v4792_v42  ;;  %v4870_v21 = vadd.f32 %v4838_v26, %v4793_v54  ;;  %v5691_v58 = vld [vmem:[%s5918_s15 + $0x30] sm:$0xff]  ;;  %v5692_v54 = vld [vmem:[%s5918_s15 + $0x38] sm:$0xff] }
 0x85e   : > { %v4871_v10 = vadd.f32 %v4842_v51, %v4794_v57  ;;  %v4872_v2 = vadd.f32 %v4842_v51, %v4795_v32  ;;  %v4873_v20 = vadd.f32 %v4842_v51, %v4796_v30  ;;  %v4874_v12 = vadd.f32 %v4842_v51, %v4797_v25  ;;  %v5693_v32 = vld [vmem:[%s5918_s15 + $0x40] sm:$0xff]  ;;  %v5694_v25 = vld [vmem:[%s5918_s15 + $0x48] sm:$0xff]  ;;  %v5700_v26 = vld [vmem:[%s5918_s15 + $0x78] sm:$0xff] }
 0x85f   : > { %v8698_v13 = vadd.f32 %v4842_v51, %v4798_v60  ;;  %v8700_v46 = vadd.f32 %v4842_v51, %v4799_v9  ;;  %v8702_v43 = vadd.f32 %v4842_v51, %v4800_v36  ;;  %v8704_v41 = vadd.f32 %v4842_v51, %v4801_v38  ;;  %v5695_v9 = vld [vmem:[%s5918_s15 + $0x50] sm:$0xff]  ;;  %v5696_v38 = vld [vmem:[%s5918_s15 + $0x58] sm:$0xff] }
 0x860   : > { %v8707_v45 = vadd.f32 %v5685_v62, %v4847_v17  ;;  %v8710_v39 = vadd.f32 %v5686_v35, %v4848_v16  ;;  %v8713_v59 = vadd.f32 %v5687_v7, %v4849_v63  ;;  %v8716_v11 = vadd.f32 %v5688_v28, %v4850_v27  ;;  %v5701_v16 = vld [vmem:[%s5918_s15 + $0x80] sm:$0xff]  ;;  %v5702_v27 = vld [vmem:[%s5918_s15 + $0x88] sm:$0xff]  ;;  %v5703_v51 = vld [vmem:[%s5918_s15 + $0x90] sm:$0xff] }
 0x861   : > { %v8720_v31 = vadd.f32 %v5689_v48, %v4851_v52  ;;  %v8723_v56 = vadd.f32 %v5690_v23, %v4852_v34  ;;  %v8726_v42 = vadd.f32 %v5691_v58, %v4853_v61  ;;  %v8729_v57 = vadd.f32 %v5692_v54, %v4854_v29  ;;  %v5704_v61 = vld [vmem:[%s5918_s15 + $0x98] sm:$0xff]  ;;  %v5713_v7 = vld [vmem:[%s5918_s15 + $0xe0] sm:$0xff]  ;;  %v5714_v28 = vld [vmem:[%s5918_s15 + $0xe8] sm:$0xff] }
 0x862   : > { %v8732_v30 = vadd.f32 %v5693_v32, %v4855_v37  ;;  %v8735_v60 = vadd.f32 %v5694_v25, %v4856_v3  ;;  %v8738_v36 = vadd.f32 %v5695_v9, %v4857_v5  ;;  %v8741_v53 = vadd.f32 %v5696_v38, %v4858_v15  ;;  %v5705_v37 = vld [vmem:[%s5918_s15 + $0xa0] sm:$0xff]  ;;  %v5706_v5 = vld [vmem:[%s5918_s15 + $0xa8] sm:$0xff]  ;;  %v5712_v35 = vld [vmem:[%s5918_s15 + $0xd8] sm:$0xff] }
 0x863   : > { %v8744_v19 = vadd.f32 %v5697_v40, %v4859_v6  ;;  %v8747_v4 = vadd.f32 %v5698_v24, %v4860_v49  ;;  %v8750_v44 = vadd.f32 %v5699_v47, %v4861_v0  ;;  %v8753_v17 = vadd.f32 %v5700_v26, %v4862_v8  ;;  %v5707_v6 = vld [vmem:[%s5918_s15 + $0xb0] sm:$0xff]  ;;  %v5708_v0 = vld [vmem:[%s5918_s15 + $0xb8] sm:$0xff] }
 0x864   : > { %v8760_v63 = vadd.f32 %v5701_v16, %v4863_v55  ;;  %v8763_v52 = vadd.f32 %v5702_v27, %v4864_v22  ;;  %v8766_v34 = vadd.f32 %v5703_v51, %v4865_v1  ;;  %v8769_v29 = vadd.f32 %v5704_v61, %v4866_v33  ;;  %v5709_v55 = vld [vmem:[%s5918_s15 + $0xc0] sm:$0xff]  ;;  %v5710_v1 = vld [vmem:[%s5918_s15 + $0xc8] sm:$0xff]  ;;  %v5715_v48 = vld [vmem:[%s5918_s15 + $0xf0] sm:$0xff] }
 0x865   : > { %v8772_v3 = vadd.f32 %v5705_v37, %v4867_v18  ;;  %v8775_v15 = vadd.f32 %v5706_v5, %v4868_v14  ;;  %v8778_v49 = vadd.f32 %v5707_v6, %v4869_v50  ;;  %v8781_v8 = vadd.f32 %v5708_v0, %v4870_v21  ;;  %v5711_v18 = vld [vmem:[%s5918_s15 + $0xd0] sm:$0xff] }
 0x866   : > { %v8784_v22 = vadd.f32 %v5709_v55, %v4871_v10  ;;  %v8787_v33 = vadd.f32 %v5710_v1, %v4872_v2  ;;  %v8790_v62 = vadd.f32 %v5711_v18, %v4873_v20  ;;  %v8793_v14 = vadd.f32 %v5712_v35, %v4874_v12  ;;  %v5716_v2 = vld [vmem:[%s5918_s15 + $0xf8] sm:$0xff]  ;;  %s8824_s15 = scalar_lea.vmem [#allocation2], %s8757_s19  ;;  %s5721_s19 = sshll.u32 %s5789_s18, 4  ;;  %s5722_s19 = int_to_ptr.vmem [resolvable:$false] %s5721_s19 }
 0x867   : > { %v8797_v50 = vadd.f32 %v5713_v7, %v8698_v13  ;;  %v8801_v21 = vadd.f32 %v5714_v28, %v8700_v46  ;;  %v8805_v10 = vadd.f32 %v5715_v48, %v8702_v43  ;;  %v8809_v20 = vadd.f32 %v5716_v2, %v8704_v41  ;;  %s4990_s16 = sshll.u32 %s8824_s15, 4  ;;  %s5723_s20 = scalar_lea.vmem %s5722_s19, 8192  ;;  %s8869_s16 = int_to_ptr.vmem [resolvable:$true] %s4990_s16 }
 0x868   : > { %v4911_v12 = vmax.f32 %v8707_v45, 0.0  ;;  %v4912_v23 = vmax.f32 %v8710_v39, 0.0  ;;  %v4913_v13 = vmax.f32 %v8713_v59, 0.0  ;;  %v4914_v58 = vmax.f32 %v8716_v11, 0.0  ;;  %s5717_s29 = scalar_lea.vmem %s8869_s16, 4096  ;;  %p5724_p0 = scmp.lt.s32.totalorder %s8869_s16, %s5722_s19 }
 0x869   : > { %v4915_v46 = vmax.f32 %v8720_v31, 0.0  ;;  %v4916_v54 = vmax.f32 %v8723_v56, 0.0  ;;  %v4917_v32 = vmax.f32 %v8726_v42, 0.0  ;;  %v4918_v43 = vmax.f32 %v8729_v57, 0.0  ;;  %p5718_p11 = scmp.ne.s32.totalorder %s8869_s16, %s5717_s29  ;;  %p5725_p1 = scmp.lt.s32.totalorder %s5723_s20, %s5717_s29 }
 0x86a   : > { %v4919_v25 = vmax.f32 %v8732_v30, 0.0  ;;  %v4920_v41 = vmax.f32 %v8735_v60, 0.0  ;;  %v4921_v45 = vmax.f32 %v8738_v36, 0.0  ;;  %v4922_v39 = vmax.f32 %v8741_v53, 0.0  ;;  %4943 = vst [vmem:[%s8824_s15] sm:$0xff] %v4911_v12  ;;  %4944 = vst [vmem:[%s8824_s15 + $0x8] sm:$0xff] %v4912_v23 }
 0x86b   : > { %4945 = vst [vmem:[%s8824_s15 + $0x10] sm:$0xff] %v4913_v13  ;;  %4946 = vst [vmem:[%s8824_s15 + $0x18] sm:$0xff] %v4914_v58  ;;  %v4923_v59 = vmax.f32 %v8744_v19, 0.0  ;;  %v4924_v11 = vmax.f32 %v8747_v4, 0.0  ;;  %v4925_v31 = vmax.f32 %v8750_v44, 0.0  ;;  %v4926_v56 = vmax.f32 %v8753_v17, 0.0  ;;  %p5719_p12 = pnand %p5718_p11, %p5895_p5  ;;  %p5726_p2 = por %p5725_p1, %p5724_p0 }
 0x86c   : > { %4947 = vst [vmem:[%s8824_s15 + $0x20] sm:$0xff] %v4915_v46  ;;  %4948 = vst [vmem:[%s8824_s15 + $0x28] sm:$0xff] %v4916_v54  ;;  %v4927_v42 = vmax.f32 %v8760_v63, 0.0  ;;  %v4928_v57 = vmax.f32 %v8763_v52, 0.0  ;;  %v4929_v30 = vmax.f32 %v8766_v34, 0.0  ;;  %v4930_v60 = vmax.f32 %v8769_v29, 0.0 }
 0x86d   : > { %4949 = vst [vmem:[%s8824_s15 + $0x30] sm:$0xff] %v4917_v32  ;;  %4950 = vst [vmem:[%s8824_s15 + $0x38] sm:$0xff] %v4918_v43  ;;  %v4931_v9 = vmax.f32 %v8772_v3, 0.0  ;;  %v4932_v36 = vmax.f32 %v8775_v15, 0.0  ;;  %v4933_v38 = vmax.f32 %v8778_v49, 0.0  ;;  %v4934_v53 = vmax.f32 %v8781_v8, 0.0  ;;  %p5720_p13 = pneg %p5719_p12 }
 0x86e   : > { %4951 = vst [vmem:[%s8824_s15 + $0x40] sm:$0xff] %v4919_v25  ;;  %4952 = vst [vmem:[%s8824_s15 + $0x48] sm:$0xff] %v4920_v41  ;;  %v4935_v40 = vmax.f32 %v8784_v22, 0.0  ;;  %v4936_v19 = vmax.f32 %v8787_v33, 0.0  ;;  %v4937_v24 = vmax.f32 %v8790_v62, 0.0  ;;  %v4938_v4 = vmax.f32 %v8793_v14, 0.0 }
 0x86f   : > { %4953 = vst [vmem:[%s8824_s15 + $0x50] sm:$0xff] %v4921_v45  ;;  %4954 = vst [vmem:[%s8824_s15 + $0x58] sm:$0xff] %v4922_v39  ;;  %v4939_v47 = vmax.f32 %v8797_v50, 0.0  ;;  %v4940_v44 = vmax.f32 %v8801_v21, 0.0  ;;  %v4941_v26 = vmax.f32 %v8805_v10, 0.0  ;;  %v4942_v17 = vmax.f32 %v8809_v20, 0.0  ;;  %p5727_p3 = pnand %p5726_p2, %p5720_p13 }
 0x870   : > { %4955 = vst [vmem:[%s8824_s15 + $0x60] sm:$0xff] %v4923_v59  ;;  %4956 = vst [vmem:[%s8824_s15 + $0x68] sm:$0xff] %v4924_v11 }
 0x871   : > { %4957 = vst [vmem:[%s8824_s15 + $0x70] sm:$0xff] %v4925_v31  ;;  %4958 = vst [vmem:[%s8824_s15 + $0x78] sm:$0xff] %v4926_v56 }
 0x872   : > { %4959 = vst [vmem:[%s8824_s15 + $0x80] sm:$0xff] %v4927_v42  ;;  %4960 = vst [vmem:[%s8824_s15 + $0x88] sm:$0xff] %v4928_v57 }
 0x873   : > { %4961 = vst [vmem:[%s8824_s15 + $0x90] sm:$0xff] %v4929_v30  ;;  %4962 = vst [vmem:[%s8824_s15 + $0x98] sm:$0xff] %v4930_v60 }
 0x874   : > { %4963 = vst [vmem:[%s8824_s15 + $0xa0] sm:$0xff] %v4931_v9  ;;  %4964 = vst [vmem:[%s8824_s15 + $0xa8] sm:$0xff] %v4932_v36 }
 0x875   : > { %4965 = vst [vmem:[%s8824_s15 + $0xb0] sm:$0xff] %v4933_v38  ;;  %4966 = vst [vmem:[%s8824_s15 + $0xb8] sm:$0xff] %v4934_v53 }
 0x876   : > { %4967 = vst [vmem:[%s8824_s15 + $0xc0] sm:$0xff] %v4935_v40  ;;  %4968 = vst [vmem:[%s8824_s15 + $0xc8] sm:$0xff] %v4936_v19 }
 0x877   : > { %4969 = vst [vmem:[%s8824_s15 + $0xd0] sm:$0xff] %v4937_v24  ;;  %4970 = vst [vmem:[%s8824_s15 + $0xd8] sm:$0xff] %v4938_v4 }
 0x878   : > { %4971 = vst [vmem:[%s8824_s15 + $0xe0] sm:$0xff] %v4939_v47  ;;  %4972 = vst [vmem:[%s8824_s15 + $0xe8] sm:$0xff] %v4940_v44 }
 0x879   : > { %4973 = vst [vmem:[%s8824_s15 + $0xf0] sm:$0xff] %v4941_v26  ;;  %4974 = vst [vmem:[%s8824_s15 + $0xf8] sm:$0xff] %v4942_v17 }
 0x87a   : > { %5730 = shalt.err (!%p5727_p3)
}
 0x87b   : > { %s5731_s30 = scalar_lea.hbm %s8867_s26, 4096  ;;  %s5735_s17 = scalar_lea.hbm %s8942_s12, 8192 }
 0x87c   : > { %p5732_p4 = scmp.ne.s32.totalorder %s8867_s26, %s5731_s30  ;;  %p5736_p9 = scmp.lt.u32.totalorder %s8867_s26, %s8942_s12 }
 0x87d   : > { %p5737_p10 = scmp.lt.u32.totalorder %s5735_s17, %s5731_s30  ;;  %p5739_p12 = scmp.lt.u32.totalorder %s5731_s30, %s8867_s26 }
 0x87e   : > { %p5733_p7 = pnand %p5732_p4, %p5895_p5 }
 0x87f   : > { %p5738_p11 = por %p5737_p10, %p5736_p9 }
 0x880   : > { %p5734_p8 = pneg %p5733_p7 }
 0x881   : > { %p5740_p13 = por %p5739_p12, %p5738_p11 }
 0x883   : > { %p5741_p0 = pnand %p5740_p13, %p5734_p8 }
 0x885   : > { %5744 = shalt.err (!%p5741_p0)
}
 0x886   : > { %s5790_s29 = smov 128   ;;  %s5791_s20 = smov 8  }
 0x887   : > { %5597 = dma.vmem_to_hbm [thread:$0]  (%p5895_p5), %s8869_s16, 4096, %s8867_s26, %s8889_s28, %s5790_s29, %s5790_s29, %s5791_s20  }
 0x888 PF: > { %p5603_p1 = scmp.ge.s32.totalorder %s5779_s24, 2  ;;  %s5005_s15 = sand.u32 1, %s5767_s21  }
 0x889   : > { %s5006_s30 = scalar_lea.sflag [#allocation3], %s5005_s15 }
 0x88a   : > { %p5600_p2 = pnand %p5603_p1, %p5899_p6 }
 0x88c   : > { %5762 = dma.done.wait (!%p5600_p2), %s5006_s30, 4096  }
 0x88d   : > { %5764 = vsyncadd (!%p5600_p2), %s5006_s30, 4294963200  ;;  %s9258_s25 = sld [smem:[#allocation5_spill]]  ;;  %p22_p3 = scmp.ge.s32.totalorder %s5882_s27, 4  }
 0x88e   : > { %s9259_s21 = smov %s5771_s22  ;;  %s9260_s22 = smov %s5775_s23 }
 0x88f   : > { %s9262_s24 = smov %s5882_s27  ;;  %24 = sbr.rel (!%p22_p3) target bundleno = 3 (0x3), region = 103 }
 0x893   : > { %s9261_s23 = smov %s9258_s25 }
 0x896   :  { %5011 = vsyncpa [#allocation3], 1 }
 0x897   :  { %5013 = vsyncpa [#allocation3 + $0x1], 1 }

</bundles_post_ra>
